<compile_context>
chip_gen: v5e
topology: v5e:2x2
jax: 0.10.0
libtpu: 0.0.40
codegen_flags: <defaults>
</compile_context>

<pallas_src>
import jax
import jax.numpy as jnp
from jax import lax
from jax.experimental import pallas as pl
from jax.experimental.pallas import tpu as pltpu
import numpy as np


# ----------------------------------------------------------------------------
# Pallas kernels
# ----------------------------------------------------------------------------
def conv_block_kernel(p_ref, w_ref, b_ref, o_ref):
    """Fused conv-as-matmul + 2x2 max-pool + bias + ReLU.

    p_ref : (4, tm, K)  packed im2col slabs (one per pool offset), bf16
    w_ref : (K, Cout)   bf16
    b_ref : (1, Cout)   f32
    o_ref : (tm, Cout)  bf16 (pooled, biased, ReLU'd activations)

    Uses max_d relu(x_d @ W + b) == relu(max_d(x_d @ W) + b)  (shared bias, monotone ReLU).
    """
    w = w_ref[...]
    acc = jnp.dot(p_ref[0], w, preferred_element_type=jnp.float32)
    for s in range(1, p_ref.shape[0]):
        acc = jnp.maximum(acc, jnp.dot(p_ref[s], w, preferred_element_type=jnp.float32))
    o_ref[...] = jnp.maximum(acc + b_ref[...], 0.0).astype(o_ref.dtype)


def fc_kernel(x_ref, w1_ref, b1_ref, w2_ref, b2_ref, o_ref):
    """fc: Linear(1024,512) -> ReLU -> Linear(512,10), bf16 MXU inputs, f32 accumulate."""
    h = jnp.dot(x_ref[...], w1_ref[...], preferred_element_type=jnp.float32) + b1_ref[...]
    h = jnp.maximum(h, 0.0)
    y = jnp.dot(h.astype(jnp.bfloat16), w2_ref[...],
                preferred_element_type=jnp.float32) + b2_ref[...]
    o_ref[...] = y.astype(o_ref.dtype)


# ----------------------------------------------------------------------------
# Tiling helpers
# ----------------------------------------------------------------------------
# Conservative per-call budget for the double-buffered input/output blocks: keeps total
# kernel VMEM well under v5e's 16 MiB default scoped limit and v7x's 64 MiB physical VMEM.
_TILE_VMEM_BUDGET = 10 * 1024 * 1024
_VMEM_LIMIT_BYTES = 32 * 1024 * 1024  # explicit scoped-VMEM headroom (harmless where it's the default)


def _pick_row_tile(m, bytes_per_row, *, vmem_budget=_TILE_VMEM_BUDGET, min_steps=2):
    """Largest row tile that (a) divides m, (b) is a multiple of 16 (bf16 sublane packing),
    (c) keeps double-buffered block bytes under `vmem_budget`, and (d) leaves at least
    `min_steps` grid steps when possible (so v7x's two TensorCores both get work)."""
    cap = max(16, vmem_budget // max(1, 2 * bytes_per_row))
    divisors = [d for d in range(16, m + 1, 16) if m % d == 0 and d <= cap]
    if not divisors:
        divisors = [d for d in range(8, m + 1, 8) if m % d == 0 and d <= cap] or [m]
    with_steps = [d for d in divisors if m // d >= min_steps]
    return max(with_steps) if with_steps else max(divisors)


# ----------------------------------------------------------------------------
# Wrappers / glue (all channel-last; no activation transposes between kernels)
# ----------------------------------------------------------------------------
def _im2col_pooled_nhwc(x, k):
    """x: (B, H, W, Cin) channel-last -> packed (4, B*Hp*Wp, K*K*Cin) im2col slabs,
    one slab per 2x2 max-pool offset.  Feature ordering is (kh, kw, cin), matching
    W(OIHW).transpose(2,3,1,0).reshape(K*K*Cin, Cout)."""
    b, h, w, cin = x.shape
    ho, wo = h - k + 1, w - k + 1
    hp, wp = ho // 2, wo // 2
    cols = [x[:, kh:kh + ho, kw:kw + wo, :] for kh in range(k) for kw in range(k)]
    pat = jnp.stack(cols, axis=3).reshape(b, ho, wo, k * k * cin)
    slabs = []
    for di in range(2):
        for dj in range(2):
            q = pat[:, di::2, dj::2, :]                       # (B, Hp, Wp, K*K*Cin)
            slabs.append(q.reshape(b * hp * wp, k * k * cin))
    return jnp.stack(slabs, axis=0), (hp, wp)                 # (4, M, K*K*Cin)


def conv_block(packed, w_mat, bias_2d):
    """packed: (4, M, K) bf16; w_mat: (K, Cout) bf16; bias_2d: (1, Cout) f32 -> (M, Cout) bf16."""
    _, m, kd = packed.shape
    cout = w_mat.shape[1]
    # bytes per output row, double-buffered: 4 im2col rows (bf16) in + 1 output row (bf16) out.
    bytes_per_row = 4 * kd * packed.dtype.itemsize + cout * 2
    tm = _pick_row_tile(m, bytes_per_row)
    grid = (m // tm,)
    return pl.pallas_call(
        conv_block_kernel,
        out_shape=jax.ShapeDtypeStruct((m, cout), jnp.bfloat16),
        grid=grid,
        in_specs=[
            pl.BlockSpec((4, tm, kd), lambda i: (0, i, 0)),   # one packed DMA stream per step
            pl.BlockSpec((kd, cout), lambda i: (0, 0)),       # weight resident across row tiles
            pl.BlockSpec((1, cout), lambda i: (0, 0)),
        ],
        out_specs=pl.BlockSpec((tm, cout), lambda i: (i, 0)),
        compiler_params=pltpu.CompilerParams(
            dimension_semantics=("parallel",),
            vmem_limit_bytes=_VMEM_LIMIT_BYTES,
        ),
    )(packed, w_mat, bias_2d)


def fc_head(x, w1, b1, w2, b2):
    """x: (B, 1024) bf16; w1: (1024, 512) bf16; w2: (512, 10) bf16; biases f32 -> (B, 10) f32."""
    b, din = x.shape
    dout = w2.shape[1]
    if b % 16 == 0:
        tb = _pick_row_tile(b, din * x.dtype.itemsize + dout * 4)
    else:
        tb = b  # small / ragged batch: single full-batch block
    return pl.pallas_call(
        fc_kernel,
        out_shape=jax.ShapeDtypeStruct((b, dout), jnp.float32),
        grid=(b // tb,),
        in_specs=[
            pl.BlockSpec((tb, din), lambda i: (i, 0)),
            pl.BlockSpec(w1.shape, lambda i: (0, 0)),         # FC1 weight stays VMEM-resident
            pl.BlockSpec((1, w1.shape[1]), lambda i: (0, 0)),
            pl.BlockSpec(w2.shape, lambda i: (0, 0)),
            pl.BlockSpec((1, dout), lambda i: (0, 0)),
        ],
        out_specs=pl.BlockSpec((tb, dout), lambda i: (i, 0)),
        compiler_params=pltpu.CompilerParams(
            dimension_semantics=("parallel",),
            vmem_limit_bytes=_VMEM_LIMIT_BYTES,
        ),
    )(x, w1, b1, w2, b2)


@jax.jit
def net_forward(x, params):
    """x: (B, 1, 28, 28) NCHW float32.  Returns logits (B, 10) float32."""
    (c1w, c1b, c2w, c2b, f1w, f1b, f2w, f2b) = params
    b = x.shape[0]

    # NCHW -> NHWC once at the entry (Cin=1, effectively free).
    xh = jnp.transpose(x, (0, 2, 3, 1))

    # conv block 1: Conv2d(1, 32, 5) -> ReLU -> MaxPool(2,2) -> Dropout(identity)
    p1, (hp1, wp1) = _im2col_pooled_nhwc(xh, 5)
    w1m = jnp.transpose(c1w, (2, 3, 1, 0)).reshape(5 * 5 * 1, 32).astype(jnp.bfloat16)
    y1 = conv_block(p1.astype(jnp.bfloat16), w1m, c1b.reshape(1, 32))   # (B*12*12, 32) bf16
    y1 = y1.reshape(b, hp1, wp1, 32)                                    # NHWC, no transpose

    # conv block 2: Conv2d(32, 64, 5) -> ReLU -> MaxPool(2,2) -> Dropout(identity)
    p2, (hp2, wp2) = _im2col_pooled_nhwc(y1, 5)                         # already bf16
    w2m = jnp.transpose(c2w, (2, 3, 1, 0)).reshape(5 * 5 * 32, 64).astype(jnp.bfloat16)
    kpad = (-p2.shape[-1]) % 128                                        # 800 -> 896 for aligned K-fill
    p2 = jnp.pad(p2, ((0, 0), (0, 0), (0, kpad)))
    w2m = jnp.pad(w2m, ((0, kpad), (0, 0)))
    y2 = conv_block(p2, w2m, c2b.reshape(1, 64))                        # (B*4*4, 64) bf16

    # Flatten: rows are (b, h, w)-ordered so this reshape is free; features end up (h, w, c)
    # per batch element.  Permute FC1's weight ONCE from torch's (c, h, w) input ordering.
    flat = y2.reshape(b, hp2 * wp2 * 64)
    w_fc1 = (f1w.reshape(512, 64, hp2, wp2)
                .transpose(0, 2, 3, 1)
                .reshape(512, hp2 * wp2 * 64)).T.astype(jnp.bfloat16)   # (1024, 512)
    w_fc2 = f2w.T.astype(jnp.bfloat16)                                  # (512, 10)

    # fc: Linear(1024, 512) -> ReLU -> Linear(512, 10)
    return fc_head(flat, w_fc1, f1b.reshape(1, 512), w_fc2, f2b.reshape(1, 10))


# ----------------------------------------------------------------------------
# Pure-JAX reference (mirrors the PyTorch forward, f32) for a correctness check
# ----------------------------------------------------------------------------
def reference_forward(x, params):
    (c1w, c1b, c2w, c2b, f1w, f1b, f2w, f2b) = params
    dn = ("NCHW", "OIHW", "NCHW")

    def pool(v):
        return lax.reduce_window(v, -jnp.inf, lax.max, (1, 1, 2, 2), (1, 1, 2, 2), "VALID")

    y = lax.conv_general_dilated(x, c1w, (1, 1), "VALID", dimension_numbers=dn)
    y = pool(jnp.maximum(y + c1b[None, :, None, None], 0.0))
    y = lax.conv_general_dilated(y, c2w, (1, 1), "VALID", dimension_numbers=dn)
    y = pool(jnp.maximum(y + c2b[None, :, None, None], 0.0))
    y = y.reshape(x.shape[0], -1)
    y = jnp.maximum(y @ f1w.T + f1b, 0.0)
    return y @ f2w.T + f2b


def init_params(key):
    ks = jax.random.split(key, 8)
    c1w = jax.random.normal(ks[0], (32, 1, 5, 5), jnp.float32) * 0.1
    c1b = jax.random.normal(ks[1], (32,), jnp.float32) * 0.1
    c2w = jax.random.normal(ks[2], (64, 32, 5, 5), jnp.float32) * 0.05
    c2b = jax.random.normal(ks[3], (64,), jnp.float32) * 0.1
    f1w = jax.random.normal(ks[4], (512, 1024), jnp.float32) * 0.02   # torch Linear layout (out, in)
    f1b = jax.random.normal(ks[5], (512,), jnp.float32) * 0.1
    f2w = jax.random.normal(ks[6], (10, 512), jnp.float32) * 0.02
    f2b = jax.random.normal(ks[7], (10,), jnp.float32) * 0.1
    return (c1w, c1b, c2w, c2b, f1w, f1b, f2w, f2b)


if __name__ == "__main__":
    key = jax.random.PRNGKey(0)
    pkey, xkey = jax.random.split(key)
    params = init_params(pkey)

    # The module hard-codes 64*4*4 after two (conv5 + pool2) stages -> 28x28 inputs.
    x = jax.random.normal(xkey, (2, 1, 28, 28), jnp.float32)

    logits = jax.block_until_ready(net_forward(x, params))
    ref = jax.block_until_ready(reference_forward(x, params))

    # bf16 MXU inputs (f32 accumulation) -> slightly relaxed tolerance vs the f32 reference.
    np.testing.assert_allclose(np.asarray(logits), np.asarray(ref), rtol=2e-2, atol=2e-2)

    assert logits.shape == (2, 10) and logits.dtype == jnp.float32
    print("KERNEL_OK")
</pallas_src>

<mosaic_0001>
module attributes {stable_mosaic.version = 11 : i64} {
  func.func @conv_block_kernel(%arg0: i32, %arg1: memref<4x144x25xbf16, #tpu.memory_space<vmem>>, %arg2: memref<25x32xbf16, #tpu.memory_space<vmem>>, %arg3: memref<1x32xf32, #tpu.memory_space<vmem>>, %arg4: memref<144x32xbf16, #tpu.memory_space<vmem>>) attributes {dimension_semantics = [#tpu.dimension_semantics<parallel>], iteration_bounds = array<i64: 2>, scalar_prefetch = 0 : i64, scratch_operands = 0 : i64, tpu.core_type = #tpu.core_type<tc>, window_params = [{transform_indices = @transform_0, window_bounds = array<i64: 4, 144, 25>}, {pipeline_mode = #tpu.pipeline_mode<synchronous>, transform_indices = @transform_1, window_bounds = array<i64: 25, 32>}, {pipeline_mode = #tpu.pipeline_mode<synchronous>, transform_indices = @transform_2, window_bounds = array<i64: 1, 32>}, {transform_indices = @transform_3, window_bounds = array<i64: 144, 32>}]} {
    %c0 = arith.constant 0 : index
    %c0_0 = arith.constant 0 : index
    %0 = vector.load %arg2[%c0, %c0_0] : memref<25x32xbf16, #tpu.memory_space<vmem>>, vector<25x32xbf16>
    %c0_1 = arith.constant 0 : index
    %c0_2 = arith.constant 0 : index
    %c0_3 = arith.constant 0 : index
    %1 = vector.load %arg1[%c0_1, %c0_2, %c0_3] : memref<4x144x25xbf16, #tpu.memory_space<vmem>>, vector<1x144x25xbf16>
    %2 = vector.shape_cast %1 : vector<1x144x25xbf16> to vector<144x25xbf16>
    %cst = arith.constant dense<0.000000e+00> : vector<144x32xf32>
    %3 = tpu.matmul %2, %0, %cst {dimension_numbers = #tpu.dot_dimension_numbers<[1], [0], [0], [1], [0, 0, 1, 1], [], []>} : vector<144x25xbf16>, vector<25x32xbf16>, vector<144x32xf32> -> vector<144x32xf32>
    %c1 = arith.constant 1 : index
    %c0_4 = arith.constant 0 : index
    %c0_5 = arith.constant 0 : index
    %4 = vector.load %arg1[%c1, %c0_4, %c0_5] : memref<4x144x25xbf16, #tpu.memory_space<vmem>>, vector<1x144x25xbf16>
    %5 = vector.shape_cast %4 : vector<1x144x25xbf16> to vector<144x25xbf16>
    %cst_6 = arith.constant dense<0.000000e+00> : vector<144x32xf32>
    %6 = tpu.matmul %5, %0, %cst_6 {dimension_numbers = #tpu.dot_dimension_numbers<[1], [0], [0], [1], [0, 0, 1, 1], [], []>} : vector<144x25xbf16>, vector<25x32xbf16>, vector<144x32xf32> -> vector<144x32xf32>
    %7 = arith.maximumf %3, %6 : vector<144x32xf32>
    %c2 = arith.constant 2 : index
    %c0_7 = arith.constant 0 : index
    %c0_8 = arith.constant 0 : index
    %8 = vector.load %arg1[%c2, %c0_7, %c0_8] : memref<4x144x25xbf16, #tpu.memory_space<vmem>>, vector<1x144x25xbf16>
    %9 = vector.shape_cast %8 : vector<1x144x25xbf16> to vector<144x25xbf16>
    %cst_9 = arith.constant dense<0.000000e+00> : vector<144x32xf32>
    %10 = tpu.matmul %9, %0, %cst_9 {dimension_numbers = #tpu.dot_dimension_numbers<[1], [0], [0], [1], [0, 0, 1, 1], [], []>} : vector<144x25xbf16>, vector<25x32xbf16>, vector<144x32xf32> -> vector<144x32xf32>
    %11 = arith.maximumf %7, %10 : vector<144x32xf32>
    %c3 = arith.constant 3 : index
    %c0_10 = arith.constant 0 : index
    %c0_11 = arith.constant 0 : index
    %12 = vector.load %arg1[%c3, %c0_10, %c0_11] : memref<4x144x25xbf16, #tpu.memory_space<vmem>>, vector<1x144x25xbf16>
    %13 = vector.shape_cast %12 : vector<1x144x25xbf16> to vector<144x25xbf16>
    %cst_12 = arith.constant dense<0.000000e+00> : vector<144x32xf32>
    %14 = tpu.matmul %13, %0, %cst_12 {dimension_numbers = #tpu.dot_dimension_numbers<[1], [0], [0], [1], [0, 0, 1, 1], [], []>} : vector<144x25xbf16>, vector<25x32xbf16>, vector<144x32xf32> -> vector<144x32xf32>
    %15 = arith.maximumf %11, %14 : vector<144x32xf32>
    %c0_13 = arith.constant 0 : index
    %c0_14 = arith.constant 0 : index
    %16 = vector.load %arg3[%c0_13, %c0_14] : memref<1x32xf32, #tpu.memory_space<vmem>>, vector<1x32xf32>
    %17 = vector.broadcast %16 : vector<1x32xf32> to vector<144x32xf32>
    %18 = arith.addf %15, %17 : vector<144x32xf32>
    %cst_15 = arith.constant 0.000000e+00 : f32
    %19 = vector.broadcast %cst_15 : f32 to vector<144x32xf32>
    %20 = arith.maximumf %18, %19 : vector<144x32xf32>
    %21 = arith.truncf %20 : vector<144x32xf32> to vector<144x32xbf16>
    %c0_16 = arith.constant 0 : index
    %c0_17 = arith.constant 0 : index
    %22 = vector.load %arg4[%c0_16, %c0_17] : memref<144x32xbf16, #tpu.memory_space<vmem>>, vector<144x32xbf16>
    tpu.vector_store %arg4[%c0_16, %c0_17], %21 {strides = array<i32>} : memref<144x32xbf16, #tpu.memory_space<vmem>>, vector<144x32xbf16>,
    return
  }
  func.func @transform_0(%arg0: i32) -> (i32, i32, i32) {
    %c0_i32 = arith.constant 0 : i32
    %c0_i32_0 = arith.constant 0 : i32
    %c0_i32_1 = arith.constant 0 : i32
    return %c0_i32, %arg0, %c0_i32_0 : i32, i32, i32
  }
  func.func @transform_1(%arg0: i32) -> (i32, i32) {
    %c0_i32 = arith.constant 0 : i32
    %c0_i32_0 = arith.constant 0 : i32
    %c0_i32_1 = arith.constant 0 : i32
    return %c0_i32, %c0_i32_0 : i32, i32
  }
  func.func @transform_2(%arg0: i32) -> (i32, i32) {
    %c0_i32 = arith.constant 0 : i32
    %c0_i32_0 = arith.constant 0 : i32
    %c0_i32_1 = arith.constant 0 : i32
    return %c0_i32, %c0_i32_0 : i32, i32
  }
  func.func @transform_3(%arg0: i32) -> (i32, i32) {
    %c0_i32 = arith.constant 0 : i32
    %c0_i32_0 = arith.constant 0 : i32
    return %arg0, %c0_i32 : i32, i32
  }
}

module attributes {stable_mosaic.version = 11 : i64} {
  func.func @conv_block_kernel(%arg0: i32, %arg1: memref<4x16x896xbf16, #tpu.memory_space<vmem>>, %arg2: memref<896x64xbf16, #tpu.memory_space<vmem>>, %arg3: memref<1x64xf32, #tpu.memory_space<vmem>>, %arg4: memref<16x64xbf16, #tpu.memory_space<vmem>>) attributes {dimension_semantics = [#tpu.dimension_semantics<parallel>], iteration_bounds = array<i64: 2>, scalar_prefetch = 0 : i64, scratch_operands = 0 : i64, tpu.core_type = #tpu.core_type<tc>, window_params = [{transform_indices = @transform_0, window_bounds = array<i64: 4, 16, 896>}, {pipeline_mode = #tpu.pipeline_mode<synchronous>, transform_indices = @transform_1, window_bounds = array<i64: 896, 64>}, {pipeline_mode = #tpu.pipeline_mode<synchronous>, transform_indices = @transform_2, window_bounds = array<i64: 1, 64>}, {transform_indices = @transform_3, window_bounds = array<i64: 16, 64>}]} {
    %c0 = arith.constant 0 : index
    %c0_0 = arith.constant 0 : index
    %0 = vector.load %arg2[%c0, %c0_0] : memref<896x64xbf16, #tpu.memory_space<vmem>>, vector<896x64xbf16>
    %c0_1 = arith.constant 0 : index
    %c0_2 = arith.constant 0 : index
    %c0_3 = arith.constant 0 : index
    %1 = vector.load %arg1[%c0_1, %c0_2, %c0_3] : memref<4x16x896xbf16, #tpu.memory_space<vmem>>, vector<1x16x896xbf16>
    %2 = vector.shape_cast %1 : vector<1x16x896xbf16> to vector<16x896xbf16>
    %cst = arith.constant dense<0.000000e+00> : vector<16x64xf32>
    %3 = tpu.matmul %2, %0, %cst {dimension_numbers = #tpu.dot_dimension_numbers<[1], [0], [0], [1], [0, 0, 1, 1], [], []>} : vector<16x896xbf16>, vector<896x64xbf16>, vector<16x64xf32> -> vector<16x64xf32>
    %c1 = arith.constant 1 : index
    %c0_4 = arith.constant 0 : index
    %c0_5 = arith.constant 0 : index
    %4 = vector.load %arg1[%c1, %c0_4, %c0_5] : memref<4x16x896xbf16, #tpu.memory_space<vmem>>, vector<1x16x896xbf16>
    %5 = vector.shape_cast %4 : vector<1x16x896xbf16> to vector<16x896xbf16>
    %cst_6 = arith.constant dense<0.000000e+00> : vector<16x64xf32>
    %6 = tpu.matmul %5, %0, %cst_6 {dimension_numbers = #tpu.dot_dimension_numbers<[1], [0], [0], [1], [0, 0, 1, 1], [], []>} : vector<16x896xbf16>, vector<896x64xbf16>, vector<16x64xf32> -> vector<16x64xf32>
    %7 = arith.maximumf %3, %6 : vector<16x64xf32>
    %c2 = arith.constant 2 : index
    %c0_7 = arith.constant 0 : index
    %c0_8 = arith.constant 0 : index
    %8 = vector.load %arg1[%c2, %c0_7, %c0_8] : memref<4x16x896xbf16, #tpu.memory_space<vmem>>, vector<1x16x896xbf16>
    %9 = vector.shape_cast %8 : vector<1x16x896xbf16> to vector<16x896xbf16>
    %cst_9 = arith.constant dense<0.000000e+00> : vector<16x64xf32>
    %10 = tpu.matmul %9, %0, %cst_9 {dimension_numbers = #tpu.dot_dimension_numbers<[1], [0], [0], [1], [0, 0, 1, 1], [], []>} : vector<16x896xbf16>, vector<896x64xbf16>, vector<16x64xf32> -> vector<16x64xf32>
    %11 = arith.maximumf %7, %10 : vector<16x64xf32>
    %c3 = arith.constant 3 : index
    %c0_10 = arith.constant 0 : index
    %c0_11 = arith.constant 0 : index
    %12 = vector.load %arg1[%c3, %c0_10, %c0_11] : memref<4x16x896xbf16, #tpu.memory_space<vmem>>, vector<1x16x896xbf16>
    %13 = vector.shape_cast %12 : vector<1x16x896xbf16> to vector<16x896xbf16>
    %cst_12 = arith.constant dense<0.000000e+00> : vector<16x64xf32>
    %14 = tpu.matmul %13, %0, %cst_12 {dimension_numbers = #tpu.dot_dimension_numbers<[1], [0], [0], [1], [0, 0, 1, 1], [], []>} : vector<16x896xbf16>, vector<896x64xbf16>, vector<16x64xf32> -> vector<16x64xf32>
    %15 = arith.maximumf %11, %14 : vector<16x64xf32>
    %c0_13 = arith.constant 0 : index
    %c0_14 = arith.constant 0 : index
    %16 = vector.load %arg3[%c0_13, %c0_14] : memref<1x64xf32, #tpu.memory_space<vmem>>, vector<1x64xf32>
    %17 = vector.broadcast %16 : vector<1x64xf32> to vector<16x64xf32>
    %18 = arith.addf %15, %17 : vector<16x64xf32>
    %cst_15 = arith.constant 0.000000e+00 : f32
    %19 = vector.broadcast %cst_15 : f32 to vector<16x64xf32>
    %20 = arith.maximumf %18, %19 : vector<16x64xf32>
    %21 = arith.truncf %20 : vector<16x64xf32> to vector<16x64xbf16>
    %c0_16 = arith.constant 0 : index
    %c0_17 = arith.constant 0 : index
    %22 = vector.load %arg4[%c0_16, %c0_17] : memref<16x64xbf16, #tpu.memory_space<vmem>>, vector<16x64xbf16>
    tpu.vector_store %arg4[%c0_16, %c0_17], %21 {strides = array<i32>} : memref<16x64xbf16, #tpu.memory_space<vmem>>, vector<16x64xbf16>,
    return
  }
  func.func @transform_0(%arg0: i32) -> (i32, i32, i32) {
    %c0_i32 = arith.constant 0 : i32
    %c0_i32_0 = arith.constant 0 : i32
    %c0_i32_1 = arith.constant 0 : i32
    return %c0_i32, %arg0, %c0_i32_0 : i32, i32, i32
  }
  func.func @transform_1(%arg0: i32) -> (i32, i32) {
    %c0_i32 = arith.constant 0 : i32
    %c0_i32_0 = arith.constant 0 : i32
    %c0_i32_1 = arith.constant 0 : i32
    return %c0_i32, %c0_i32_0 : i32, i32
  }
  func.func @transform_2(%arg0: i32) -> (i32, i32) {
    %c0_i32 = arith.constant 0 : i32
    %c0_i32_0 = arith.constant 0 : i32
    %c0_i32_1 = arith.constant 0 : i32
    return %c0_i32, %c0_i32_0 : i32, i32
  }
  func.func @transform_3(%arg0: i32) -> (i32, i32) {
    %c0_i32 = arith.constant 0 : i32
    %c0_i32_0 = arith.constant 0 : i32
    return %arg0, %c0_i32 : i32, i32
  }
}

module attributes {stable_mosaic.version = 11 : i64} {
  func.func @fc_kernel(%arg0: i32, %arg1: memref<2x1024xbf16, #tpu.memory_space<vmem>>, %arg2: memref<1024x512xbf16, #tpu.memory_space<vmem>>, %arg3: memref<1x512xf32, #tpu.memory_space<vmem>>, %arg4: memref<512x10xbf16, #tpu.memory_space<vmem>>, %arg5: memref<1x10xf32, #tpu.memory_space<vmem>>, %arg6: memref<2x10xf32, #tpu.memory_space<vmem>>) attributes {dimension_semantics = [#tpu.dimension_semantics<parallel>], iteration_bounds = array<i64: 1>, scalar_prefetch = 0 : i64, scratch_operands = 0 : i64, tpu.core_type = #tpu.core_type<tc>, window_params = [{transform_indices = @transform_0, window_bounds = array<i64: 2, 1024>}, {pipeline_mode = #tpu.pipeline_mode<synchronous>, transform_indices = @transform_1, window_bounds = array<i64: 1024, 512>}, {pipeline_mode = #tpu.pipeline_mode<synchronous>, transform_indices = @transform_2, window_bounds = array<i64: 1, 512>}, {pipeline_mode = #tpu.pipeline_mode<synchronous>, transform_indices = @transform_3, window_bounds = array<i64: 512, 10>}, {pipeline_mode = #tpu.pipeline_mode<synchronous>, transform_indices = @transform_4, window_bounds = array<i64: 1, 10>}, {transform_indices = @transform_5, window_bounds = array<i64: 2, 10>}]} {
    %c0 = arith.constant 0 : index
    %c0_0 = arith.constant 0 : index
    %0 = vector.load %arg1[%c0, %c0_0] : memref<2x1024xbf16, #tpu.memory_space<vmem>>, vector<2x1024xbf16>
    %c0_1 = arith.constant 0 : index
    %c0_2 = arith.constant 0 : index
    %1 = vector.load %arg2[%c0_1, %c0_2] : memref<1024x512xbf16, #tpu.memory_space<vmem>>, vector<1024x512xbf16>
    %cst = arith.constant dense<0.000000e+00> : vector<2x512xf32>
    %2 = tpu.matmul %0, %1, %cst {dimension_numbers = #tpu.dot_dimension_numbers<[1], [0], [0], [1], [0, 0, 1, 1], [], []>} : vector<2x1024xbf16>, vector<1024x512xbf16>, vector<2x512xf32> -> vector<2x512xf32>
    %c0_3 = arith.constant 0 : index
    %c0_4 = arith.constant 0 : index
    %3 = vector.load %arg3[%c0_3, %c0_4] : memref<1x512xf32, #tpu.memory_space<vmem>>, vector<1x512xf32>
    %4 = vector.broadcast %3 : vector<1x512xf32> to vector<2x512xf32>
    %5 = arith.addf %2, %4 : vector<2x512xf32>
    %cst_5 = arith.constant 0.000000e+00 : f32
    %6 = vector.broadcast %cst_5 : f32 to vector<2x512xf32>
    %7 = arith.maximumf %5, %6 : vector<2x512xf32>
    %8 = arith.truncf %7 : vector<2x512xf32> to vector<2x512xbf16>
    %c0_6 = arith.constant 0 : index
    %c0_7 = arith.constant 0 : index
    %9 = vector.load %arg4[%c0_6, %c0_7] : memref<512x10xbf16, #tpu.memory_space<vmem>>, vector<512x10xbf16>
    %cst_8 = arith.constant dense<0.000000e+00> : vector<2x10xf32>
    %10 = tpu.matmul %8, %9, %cst_8 {dimension_numbers = #tpu.dot_dimension_numbers<[1], [0], [0], [1], [0, 0, 1, 1], [], []>} : vector<2x512xbf16>, vector<512x10xbf16>, vector<2x10xf32> -> vector<2x10xf32>
    %c0_9 = arith.constant 0 : index
    %c0_10 = arith.constant 0 : index
    %11 = vector.load %arg5[%c0_9, %c0_10] : memref<1x10xf32, #tpu.memory_space<vmem>>, vector<1x10xf32>
    %12 = vector.broadcast %11 : vector<1x10xf32> to vector<2x10xf32>
    %13 = arith.addf %10, %12 : vector<2x10xf32>
    %c0_11 = arith.constant 0 : index
    %c0_12 = arith.constant 0 : index
    %14 = vector.load %arg6[%c0_11, %c0_12] : memref<2x10xf32, #tpu.memory_space<vmem>>, vector<2x10xf32>
    tpu.vector_store %arg6[%c0_11, %c0_12], %13 {strides = array<i32>} : memref<2x10xf32, #tpu.memory_space<vmem>>, vector<2x10xf32>,
    return
  }
  func.func @transform_0(%arg0: i32) -> (i32, i32) {
    %c0_i32 = arith.constant 0 : i32
    %c0_i32_0 = arith.constant 0 : i32
    return %arg0, %c0_i32 : i32, i32
  }
  func.func @transform_1(%arg0: i32) -> (i32, i32) {
    %c0_i32 = arith.constant 0 : i32
    %c0_i32_0 = arith.constant 0 : i32
    %c0_i32_1 = arith.constant 0 : i32
    return %c0_i32, %c0_i32_0 : i32, i32
  }
  func.func @transform_2(%arg0: i32) -> (i32, i32) {
    %c0_i32 = arith.constant 0 : i32
    %c0_i32_0 = arith.constant 0 : i32
    %c0_i32_1 = arith.constant 0 : i32
    return %c0_i32, %c0_i32_0 : i32, i32
  }
  func.func @transform_3(%arg0: i32) -> (i32, i32) {
    %c0_i32 = arith.constant 0 : i32
    %c0_i32_0 = arith.constant 0 : i32
    %c0_i32_1 = arith.constant 0 : i32
    return %c0_i32, %c0_i32_0 : i32, i32
  }
  func.func @transform_4(%arg0: i32) -> (i32, i32) {
    %c0_i32 = arith.constant 0 : i32
    %c0_i32_0 = arith.constant 0 : i32
    %c0_i32_1 = arith.constant 0 : i32
    return %c0_i32, %c0_i32_0 : i32, i32
  }
  func.func @transform_5(%arg0: i32) -> (i32, i32) {
    %c0_i32 = arith.constant 0 : i32
    %c0_i32_0 = arith.constant 0 : i32
    return %arg0, %c0_i32 : i32, i32
  }
}

</mosaic_0001>

<bundles_post_ra>
// kernel: net_forward.3
= control target key start
LH: loop header
LB: loop body
LE: loop exit
PB: predicated region body
PF: predicated region fallthrough
CT: control target
= control target key end

     0   :  { %s1660_s12 = smov 0   ;;  %s1662_s13 = smov 0   ;;  %s1932_s0 = inlined_call_operand.vmem [shape: bf16[4,288,25], index: 0, kind: input, shape index: {}]   ;;  %s1933_s1 = inlined_call_operand.vmem [shape: bf16[25,32], index: 1, kind: input, shape index: {}]   ;;  %s1934_s2 = inlined_call_operand.vmem [shape: f32[1,32], index: 2, kind: input, shape index: {}]   ;;  %s1935_s3 = inlined_call_operand.vmem [shape: bf16[288,32], index: 3, kind: output, shape index: {}]  }
   0x1   :  { %s1664_s14 = smov 0  }
   0x2 LB: > { %s1297_s15 = sadd.s32 4294967295, %s1637_s14   ;;  %s1677_s16 = sadd.s32 1, %s1637_s14   ;;  %s1637_s14 = sphi %s1664_s14, %s1938_s14   ;;  %s1633_s13 = sphi %s1662_s13, %s1937_s13   ;;  %s1629_s12 = sphi %s1660_s12, %s1936_s12  }
   0x3   : > { %s17_s17 = ssub.s32 %s1637_s14, %s1677_s16  ;;  %s20_s18 = sadd.s32 1, %s1633_s13 }
   0x4   : > { %p18_p0 = scmp.eq.s32.totalorder %s17_s17, 0  ;;  %p27_p1 = scmp.ne.s32.totalorder %s1633_s13, %s1629_s12 }
   0x5   : > { %p28_p2 = scmp.eq.s32.totalorder %s1637_s14, 0  ;;  %p1300_p4 = scmp.ge.s32.totalorder %s1637_s14, 2 }
   0x6   : > { %s1686_s19 = scalar_select %p18_p0, %s1633_s13, %s20_s18  }
   0x7   : > { %p29_p3 = por %p28_p2, %p27_p1  ;;  %127 = sbr.rel (%p1300_p4) target bundleno = 53 (0x35), region = 24 }
   0xc   : > { %130 = sbr.rel (!%p29_p3) target bundleno = 53 (0x35), region = 28  ;;  %s132_s20 = sand.u32 (%p29_p3), 1, %s1633_s13  }
   0xd   : > { %s1548_s21 = smul.u32 (%p29_p3), 72, %s1637_s14 }
   0xe   : > { %s1587_s22 = smul.u32 (%p29_p3), 288, %s132_s20 }
   0xf   : > { %s1694_s25 = scalar_lea.vmem (%p29_p3), %s1932_s0, %s1548_s21 }
  0x10   : > { %v154_v0 = vld [vmem:[%s1694_s25] sm:$0xff] (%p29_p3)   ;;  %v158_v1 = vld [vmem:[%s1694_s25 + $0x8] sm:$0xff] (%p29_p3)   ;;  %v162_v2 = vld [vmem:[%s1694_s25 + $0x10] sm:$0xff] (%p29_p3)   ;;  %s1699_s26 = scalar_lea.vmem (%p29_p3), [#allocation2], %s1587_s22 }
  0x11   : > { %155 = vst [vmem:[%s1699_s26] sm:$0xff] %v154_v0   ;;  %v166_v3 = vld [vmem:[%s1694_s25 + $0x18] sm:$0xff]   ;;  %v170_v4 = vld [vmem:[%s1694_s25 + $0x20] sm:$0xff]   ;;  %v174_v5 = vld [vmem:[%s1694_s25 + $0x28] sm:$0xff]  }
  0x12   : > { %159 = vst [vmem:[%s1699_s26 + $0x8] sm:$0xff] %v158_v1   ;;  %v178_v6 = vld [vmem:[%s1694_s25 + $0x30] sm:$0xff]   ;;  %v182_v7 = vld [vmem:[%s1694_s25 + $0x38] sm:$0xff]   ;;  %v186_v8 = vld [vmem:[%s1694_s25 + $0x40] sm:$0xff]  }
  0x13   : > { %163 = vst [vmem:[%s1699_s26 + $0x10] sm:$0xff] %v162_v2   ;;  %v190_v9 = vld [vmem:[%s1694_s25 + $0x90] sm:$0xff]   ;;  %v194_v10 = vld [vmem:[%s1694_s25 + $0x98] sm:$0xff]   ;;  %v198_v11 = vld [vmem:[%s1694_s25 + $0xa0] sm:$0xff]  }
  0x14   : > { %167 = vst [vmem:[%s1699_s26 + $0x18] sm:$0xff] %v166_v3   ;;  %v202_v12 = vld [vmem:[%s1694_s25 + $0xa8] sm:$0xff]   ;;  %v206_v13 = vld [vmem:[%s1694_s25 + $0xb0] sm:$0xff]   ;;  %v210_v14 = vld [vmem:[%s1694_s25 + $0xb8] sm:$0xff]  }
  0x15   : > { %171 = vst [vmem:[%s1699_s26 + $0x20] sm:$0xff] %v170_v4   ;;  %v214_v15 = vld [vmem:[%s1694_s25 + $0xc0] sm:$0xff]   ;;  %v218_v16 = vld [vmem:[%s1694_s25 + $0xc8] sm:$0xff]   ;;  %v222_v17 = vld [vmem:[%s1694_s25 + $0xd0] sm:$0xff]  }
  0x16   : > { %175 = vst [vmem:[%s1699_s26 + $0x28] sm:$0xff] %v174_v5   ;;  %v226_v18 = vld [vmem:[%s1694_s25 + $0x120] sm:$0xff]   ;;  %v230_v19 = vld [vmem:[%s1694_s25 + $0x128] sm:$0xff]   ;;  %v234_v20 = vld [vmem:[%s1694_s25 + $0x130] sm:$0xff]  }
  0x17   : > { %179 = vst [vmem:[%s1699_s26 + $0x30] sm:$0xff] %v178_v6   ;;  %v238_v21 = vld [vmem:[%s1694_s25 + $0x138] sm:$0xff]   ;;  %v242_v22 = vld [vmem:[%s1694_s25 + $0x140] sm:$0xff]   ;;  %v246_v23 = vld [vmem:[%s1694_s25 + $0x148] sm:$0xff]  }
  0x18   : > { %183 = vst [vmem:[%s1699_s26 + $0x38] sm:$0xff] %v182_v7   ;;  %v250_v24 = vld [vmem:[%s1694_s25 + $0x150] sm:$0xff]   ;;  %v254_v25 = vld [vmem:[%s1694_s25 + $0x158] sm:$0xff]   ;;  %v258_v26 = vld [vmem:[%s1694_s25 + $0x160] sm:$0xff]  }
  0x19   : > { %187 = vst [vmem:[%s1699_s26 + $0x40] sm:$0xff] %v186_v8   ;;  %v262_v27 = vld [vmem:[%s1694_s25 + $0x1b0] sm:$0xff]   ;;  %v266_v28 = vld [vmem:[%s1694_s25 + $0x1b8] sm:$0xff]   ;;  %v270_v29 = vld [vmem:[%s1694_s25 + $0x1c0] sm:$0xff]  }
  0x1a   : > { %191 = vst [vmem:[%s1699_s26 + $0x48] sm:$0xff] %v190_v9   ;;  %v274_v30 = vld [vmem:[%s1694_s25 + $0x1c8] sm:$0xff]   ;;  %v278_v31 = vld [vmem:[%s1694_s25 + $0x1d0] sm:$0xff]   ;;  %v282_v32 = vld [vmem:[%s1694_s25 + $0x1d8] sm:$0xff]  }
  0x1b   : > { %195 = vst [vmem:[%s1699_s26 + $0x50] sm:$0xff] %v194_v10   ;;  %v286_v33 = vld [vmem:[%s1694_s25 + $0x1e0] sm:$0xff]   ;;  %v290_v34 = vld [vmem:[%s1694_s25 + $0x1e8] sm:$0xff]   ;;  %v294_v35 = vld [vmem:[%s1694_s25 + $0x1f0] sm:$0xff]  }
  0x1c   : > { %199 = vst [vmem:[%s1699_s26 + $0x58] sm:$0xff] %v198_v11  }
  0x1d   : > { %203 = vst [vmem:[%s1699_s26 + $0x60] sm:$0xff] %v202_v12  }
  0x1e   : > { %207 = vst [vmem:[%s1699_s26 + $0x68] sm:$0xff] %v206_v13  }
  0x1f   : > { %211 = vst [vmem:[%s1699_s26 + $0x70] sm:$0xff] %v210_v14  }
  0x20   : > { %215 = vst [vmem:[%s1699_s26 + $0x78] sm:$0xff] %v214_v15  }
  0x21   : > { %219 = vst [vmem:[%s1699_s26 + $0x80] sm:$0xff] %v218_v16  }
  0x22   : > { %223 = vst [vmem:[%s1699_s26 + $0x88] sm:$0xff] %v222_v17  }
  0x23   : > { %227 = vst [vmem:[%s1699_s26 + $0x90] sm:$0xff] %v226_v18  }
  0x24   : > { %231 = vst [vmem:[%s1699_s26 + $0x98] sm:$0xff] %v230_v19  }
  0x25   : > { %235 = vst [vmem:[%s1699_s26 + $0xa0] sm:$0xff] %v234_v20  }
  0x26   : > { %239 = vst [vmem:[%s1699_s26 + $0xa8] sm:$0xff] %v238_v21  }
  0x27   : > { %243 = vst [vmem:[%s1699_s26 + $0xb0] sm:$0xff] %v242_v22  }
  0x28   : > { %247 = vst [vmem:[%s1699_s26 + $0xb8] sm:$0xff] %v246_v23  }
  0x29   : > { %251 = vst [vmem:[%s1699_s26 + $0xc0] sm:$0xff] %v250_v24  }
  0x2a   : > { %255 = vst [vmem:[%s1699_s26 + $0xc8] sm:$0xff] %v254_v25  }
  0x2b   : > { %259 = vst [vmem:[%s1699_s26 + $0xd0] sm:$0xff] %v258_v26  }
  0x2c   : > { %263 = vst [vmem:[%s1699_s26 + $0xd8] sm:$0xff] %v262_v27  }
  0x2d   : > { %267 = vst [vmem:[%s1699_s26 + $0xe0] sm:$0xff] %v266_v28  }
  0x2e   : > { %271 = vst [vmem:[%s1699_s26 + $0xe8] sm:$0xff] %v270_v29  }
  0x2f   : > { %275 = vst [vmem:[%s1699_s26 + $0xf0] sm:$0xff] %v274_v30  }
  0x30   : > { %279 = vst [vmem:[%s1699_s26 + $0xf8] sm:$0xff] %v278_v31  }
  0x31   : > { %283 = vst [vmem:[%s1699_s26 + $0x100] sm:$0xff] %v282_v32  }
  0x32   : > { %287 = vst [vmem:[%s1699_s26 + $0x108] sm:$0xff] %v286_v33  }
  0x33   : > { %291 = vst [vmem:[%s1699_s26 + $0x110] sm:$0xff] %v290_v34  }
  0x34   : > { %295 = vst [vmem:[%s1699_s26 + $0x118] sm:$0xff] %v294_v35  }
  0x35 PF: > { %p1302_p5 = scmp.ge.s32.totalorder %s1637_s14, 1  ;;  %p464_p6 = scmp.lt.s32.totalorder %s1637_s14, 3 }
  0x37   : > { %p465_p7 = pnand %p1302_p5, %p464_p6 }
  0x38   : > { %s471_s4 = sand.u32 (!%p465_p7), 1, %s1629_s12   ;;  %s495_s9 = smul.u32 (!%p465_p7), 18, %s1297_s15 }
  0x39   : > { %468 = sbr.rel (%p465_p7) target bundleno = 355 (0x163), region = 69 }
  0x3a   : > { %s1588_s5 = smul.u32 (!%p465_p7), 288, %s471_s4  ;;  %p496_p8 = scmp.lt.s32.totalorder (!%p465_p7), %s495_s9, 35 }
  0x3c   : > { %s1782_s8 = scalar_lea.vmem (!%p465_p7), [#allocation2], %s1588_s5 }
  0x3e   : > { %v1346_v36 = vld [vmem:[%s1933_s1 + $0x8] sm:$0xf]  ;;  %v1550_v37 = vld [vmem:[%s1933_s1 + $0x8] sm:$0x10]  ;;  %vm608_vm0 = vcmask 1043456   ;;  %vm609_vm1 = vcmask 1044480  }
  0x3f   : > { %v1347_v38 = vor.u32 %v1550_v37, %v1346_v36  ;;  %v1639_v39 = vmov 65535   ;;  %v1549_v43 = vld [vmem:[%s1933_s1] sm:$0xff]  ;;  %v1560_v45 = vld [vmem:[%s1782_s8 + $0x48] sm:$0xff]  ;;  %vm580_vm2 = vcmask 203776   ;;  %v1569_v46 = vld [vmem:[%s1782_s8 + $0x90] sm:$0xff]  ;;  %s1940_s9 = smov (!%p496_p8, %s495_s9), 35 }
  0x40   : > { %v610_v40 = vsel %vm608_vm0, 4294967295, %v1639_v39  ;;  %v1551_v44 = vld [vmem:[%s1782_s8] sm:$0xff]  ;;  %v1578_v47 = vld [vmem:[%s1782_s8 + $0xd8] sm:$0xff]  ;;  %v1552_v48 = vld [vmem:[%s1782_s8 + $0x8] sm:$0xff]  ;;  %s1303_s12 = sshll.u32 %s1940_s9, 2  ;;  %vm1216_vm3 = vcmask 257024  }
  0x41   : > { %v611_v41 = vsel %vm609_vm1, %v610_v40, 0  ;;  %v1561_v49 = vld [vmem:[%s1782_s8 + $0x50] sm:$0xff]  ;;  %v1570_v50 = vld [vmem:[%s1782_s8 + $0x98] sm:$0xff]  ;;  %v1579_v51 = vld [vmem:[%s1782_s8 + $0xe0] sm:$0xff]  ;;  %s1867_s17 = scalar_lea.vmem %s1935_s3, %s1303_s12 }
  0x42   : > { %v613_v42 = vand.u32 %v1347_v38, %v611_v41  ;;  %v1553_v52 = vld [vmem:[%s1782_s8 + $0x10] sm:$0xff]  ;;  %v1562_v53 = vld [vmem:[%s1782_s8 + $0x58] sm:$0xff]  ;;  %v1571_v54 = vld [vmem:[%s1782_s8 + $0xa0] sm:$0xff] }
  0x43   : > { %v1580_v55 = vld [vmem:[%s1782_s8 + $0xe8] sm:$0xff]  ;;  %v1554_v56 = vld [vmem:[%s1782_s8 + $0x18] sm:$0xff]  ;;  %v1563_v57 = vld [vmem:[%s1782_s8 + $0x60] sm:$0xff] }
  0x44   : > { %621 = vmatpush.bf16.msra.mxu0 %v613_v42  ;;  %766 = vmatpush.bf16.msra.mxu1 %v613_v42  ;;  %v1572_v58 = vld [vmem:[%s1782_s8 + $0xa8] sm:$0xff]  ;;  %v1581_v59 = vld [vmem:[%s1782_s8 + $0xf0] sm:$0xff]  ;;  %v1555_v60 = vld [vmem:[%s1782_s8 + $0x20] sm:$0xff] }
  0x45   : > { %929 = vmatpush.bf16.msra.mxu2 %v613_v42  ;;  %1092 = vmatpush.bf16.msra.mxu3 %v613_v42  ;;  %v1564_v61 = vld [vmem:[%s1782_s8 + $0x68] sm:$0xff]  ;;  %v1573_v62 = vld [vmem:[%s1782_s8 + $0xb0] sm:$0xff]  ;;  %v1582_v63 = vld [vmem:[%s1782_s8 + $0xf8] sm:$0xff] }
  0x46   : > { %v1556_v0 = vld [vmem:[%s1782_s8 + $0x28] sm:$0xff]  ;;  %v1565_v1 = vld [vmem:[%s1782_s8 + $0x70] sm:$0xff]  ;;  %v1574_v2 = vld [vmem:[%s1782_s8 + $0xb8] sm:$0xff] }
  0x47   : > { %v1583_v3 = vld [vmem:[%s1782_s8 + $0x100] sm:$0xff]  ;;  %v1557_v4 = vld [vmem:[%s1782_s8 + $0x30] sm:$0xff]  ;;  %v1566_v5 = vld [vmem:[%s1782_s8 + $0x78] sm:$0xff] }
  0x48   : > { %622 = vmatpush.bf16.msra.mxu0 %v1549_v43  ;;  %767 = vmatpush.bf16.msra.mxu1 %v1549_v43  ;;  %v1575_v6 = vld [vmem:[%s1782_s8 + $0xc0] sm:$0xff]  ;;  %v1584_v7 = vld [vmem:[%s1782_s8 + $0x108] sm:$0xff]  ;;  %v1558_v8 = vld [vmem:[%s1782_s8 + $0x38] sm:$0xff] }
  0x49   : > { %930 = vmatpush.bf16.msra.mxu2 %v1549_v43  ;;  %1093 = vmatpush.bf16.msra.mxu3 %v1549_v43  ;;  %v1567_v9 = vld [vmem:[%s1782_s8 + $0x80] sm:$0xff]  ;;  %v1576_v10 = vld [vmem:[%s1782_s8 + $0xc8] sm:$0xff]  ;;  %v1585_v11 = vld [vmem:[%s1782_s8 + $0x110] sm:$0xff] }
  0x4a   : > { %v1559_v12 = vld [vmem:[%s1782_s8 + $0x40] sm:$0xff]  ;;  %v1568_v13 = vld [vmem:[%s1782_s8 + $0x88] sm:$0xff]  ;;  %v1577_v16 = vld [vmem:[%s1782_s8 + $0xd0] sm:$0xff] }
  0x4b   : > { %1348 = vmatmul.msk.bf16.vlgmr.msra.gmra.mxu0 %vm580_vm2, %v1551_v44  ;;  %1411 = vmatmul.msk.bf16.vlgmr.msra.gmra.mxu1 %vm580_vm2, %v1560_v45  ;;  %v1586_v17 = vld [vmem:[%s1782_s8 + $0x118] sm:$0xff]  ;;  %v1861_v22 = vld [vmem:[%s1934_s2] ss:$0 sm:$0xff] }
  0x4c   : > { %1474 = vmatmul.msk.bf16.vlgmr.msra.gmra.mxu2 %vm580_vm2, %v1569_v46  ;;  %1537 = vmatmul.msk.bf16.vlgmr.msra.gmra.mxu3 %vm580_vm2, %v1578_v47 }
  0x5b   : > { %1349 = vmatmul.msk.bf16.gmra.mxu0 %vm580_vm2, %v1552_v48  ;;  %1412 = vmatmul.msk.bf16.gmra.mxu1 %vm580_vm2, %v1561_v49 }
  0x5c   : > { %1475 = vmatmul.msk.bf16.gmra.mxu2 %vm580_vm2, %v1570_v50  ;;  %1538 = vmatmul.msk.bf16.gmra.mxu3 %vm580_vm2, %v1579_v51 }
  0x6b   : > { %1350 = vmatmul.msk.bf16.gmra.mxu0 %vm580_vm2, %v1553_v52  ;;  %1413 = vmatmul.msk.bf16.gmra.mxu1 %vm580_vm2, %v1562_v53 }
  0x6c   : > { %1476 = vmatmul.msk.bf16.gmra.mxu2 %vm580_vm2, %v1571_v54  ;;  %1539 = vmatmul.msk.bf16.gmra.mxu3 %vm580_vm2, %v1580_v55 }
  0x7b   : > { %1351 = vmatmul.msk.bf16.gmra.mxu0 %vm580_vm2, %v1554_v56  ;;  %1414 = vmatmul.msk.bf16.gmra.mxu1 %vm580_vm2, %v1563_v57 }
  0x7c   : > { %1477 = vmatmul.msk.bf16.gmra.mxu2 %vm580_vm2, %v1572_v58  ;;  %1540 = vmatmul.msk.bf16.gmra.mxu3 %vm580_vm2, %v1581_v59 }
  0x8b   : > { %1352 = vmatmul.msk.bf16.gmra.mxu0 %vm580_vm2, %v1555_v60  ;;  %1415 = vmatmul.msk.bf16.gmra.mxu1 %vm580_vm2, %v1564_v61 }
  0x8c   : > { %1478 = vmatmul.msk.bf16.gmra.mxu2 %vm580_vm2, %v1573_v62  ;;  %1541 = vmatmul.msk.bf16.gmra.mxu3 %vm580_vm2, %v1582_v63 }
  0x9b   : > { %1353 = vmatmul.msk.bf16.gmra.mxu0 %vm580_vm2, %v1556_v0  ;;  %1416 = vmatmul.msk.bf16.gmra.mxu1 %vm580_vm2, %v1565_v1 }
  0x9c   : > { %1479 = vmatmul.msk.bf16.gmra.mxu2 %vm580_vm2, %v1574_v2  ;;  %1542 = vmatmul.msk.bf16.gmra.mxu3 %vm580_vm2, %v1583_v3 }
  0xab   : > { %1354 = vmatmul.msk.bf16.gmra.mxu0 %vm580_vm2, %v1557_v4  ;;  %1417 = vmatmul.msk.bf16.gmra.mxu1 %vm580_vm2, %v1566_v5 }
  0xac   : > { %1480 = vmatmul.msk.bf16.gmra.mxu2 %vm580_vm2, %v1575_v6  ;;  %1543 = vmatmul.msk.bf16.gmra.mxu3 %vm580_vm2, %v1584_v7 }
  0xbb   : > { %1355 = vmatmul.msk.bf16.gmra.mxu0 %vm580_vm2, %v1558_v8  ;;  %1418 = vmatmul.msk.bf16.gmra.mxu1 %vm580_vm2, %v1567_v9 }
  0xbc   : > { %1481 = vmatmul.msk.bf16.gmra.mxu2 %vm580_vm2, %v1576_v10  ;;  %1544 = vmatmul.msk.bf16.gmra.mxu3 %vm580_vm2, %v1585_v11 }
  0xc8   : > { %v624_v14 = vpop.f32.mrf.mxu0  ;;  %v769_v15 = vpop.f32.mrf.mxu1 }
  0xc9   : > { %v814_v18 = vmax.f32 %v624_v14, %v769_v15 }
  0xcb   : > { %1356 = vmatmul.msk.bf16.gmra.mxu0 %vm580_vm2, %v1559_v12  ;;  %1419 = vmatmul.msk.bf16.gmra.mxu1 %vm580_vm2, %v1568_v13 }
  0xcc   : > { %1482 = vmatmul.msk.bf16.gmra.mxu2 %vm580_vm2, %v1577_v16  ;;  %1545 = vmatmul.msk.bf16.gmra.mxu3 %vm580_vm2, %v1586_v17 }
  0xcf   : > { %v932_v19 = vpop.f32.mrf.mxu2  ;;  %v1095_v20 = vpop.f32.mrf.mxu3 }
  0xd0   : > { %v977_v21 = vmax.f32 %v814_v18, %v932_v19  ;;  %v626_v23 = vpop.f32.mrf.mxu0  ;;  %v771_v24 = vpop.f32.mrf.mxu1 }
  0xd1   : > { %v815_v28 = vmax.f32 %v626_v23, %v771_v24 }
  0xd2   : > { %v1140_v25 = vmax.f32 %v977_v21, %v1095_v20 }
  0xd4   : > { %v1162_v26 = vadd.f32 %v1861_v22, %v1140_v25 }
  0xd6   : > { %v1180_v27 = vmax.f32 %v1162_v26, 0.0 }
  0xd7   : > { %v934_v29 = vpop.f32.mrf.mxu2  ;;  %v1097_v30 = vpop.f32.mrf.mxu3 }
  0xd8   : > { %v1198_v31 = vpack.c.bf16 %v1180_v27, %v1180_v27  ;;  %v978_v32 = vmax.f32 %v815_v28, %v934_v29  ;;  %v629_v33 = vpop.f32.mrf.mxu0  ;;  %v774_v34 = vpop.f32.mrf.mxu1 }
  0xd9   : > { %v816_v37 = vmax.f32 %v629_v33, %v774_v34 }
  0xda   : > { %1217 = vst.msk [vmem:[%s1867_s17] sm:$0xf] %vm1216_vm3, %v1198_v31  ;;  %v1141_v35 = vmax.f32 %v978_v32, %v1097_v30 }
  0xdc   : > { %v1163_v36 = vadd.f32 %v1861_v22, %v1141_v35 }
  0xde   : > { %v1181_v38 = vmax.f32 %v1163_v36, 0.0 }
  0xdf   : > { %v937_v39 = vpop.f32.mrf.mxu2  ;;  %v1100_v40 = vpop.f32.mrf.mxu3 }
  0xe0   : > { %v1199_v41 = vpack.c.bf16 %v1181_v38, %v1181_v38  ;;  %v979_v42 = vmax.f32 %v816_v37, %v937_v39  ;;  %v631_v43 = vpop.f32.mrf.mxu0  ;;  %v776_v44 = vpop.f32.mrf.mxu1 }
  0xe1   : > { %v817_v48 = vmax.f32 %v631_v43, %v776_v44 }
  0xe2   : > { %1218 = vst.msk [vmem:[%s1867_s17 + $0x4] sm:$0xf] %vm1216_vm3, %v1199_v41  ;;  %v1142_v45 = vmax.f32 %v979_v42, %v1100_v40 }
  0xe4   : > { %v1164_v46 = vadd.f32 %v1861_v22, %v1142_v45 }
  0xe6   : > { %v1182_v47 = vmax.f32 %v1164_v46, 0.0 }
  0xe7   : > { %v939_v49 = vpop.f32.mrf.mxu2  ;;  %v1102_v50 = vpop.f32.mrf.mxu3 }
  0xe8   : > { %v1200_v51 = vpack.c.bf16 %v1182_v47, %v1182_v47  ;;  %v980_v52 = vmax.f32 %v817_v48, %v939_v49  ;;  %v634_v53 = vpop.f32.mrf.mxu0  ;;  %v779_v54 = vpop.f32.mrf.mxu1 }
  0xe9   : > { %v818_v57 = vmax.f32 %v634_v53, %v779_v54 }
  0xea   : > { %1219 = vst.msk [vmem:[%s1867_s17 + $0x8] sm:$0xf] %vm1216_vm3, %v1200_v51  ;;  %v1143_v55 = vmax.f32 %v980_v52, %v1102_v50 }
  0xec   : > { %v1165_v56 = vadd.f32 %v1861_v22, %v1143_v55 }
  0xee   : > { %v1183_v58 = vmax.f32 %v1165_v56, 0.0 }
  0xef   : > { %v942_v59 = vpop.f32.mrf.mxu2  ;;  %v1105_v60 = vpop.f32.mrf.mxu3 }
  0xf0   : > { %v1201_v61 = vpack.c.bf16 %v1183_v58, %v1183_v58  ;;  %v981_v62 = vmax.f32 %v818_v57, %v942_v59  ;;  %v636_v63 = vpop.f32.mrf.mxu0  ;;  %v781_v0 = vpop.f32.mrf.mxu1 }
  0xf1   : > { %v819_v4 = vmax.f32 %v636_v63, %v781_v0 }
  0xf2   : > { %1220 = vst.msk [vmem:[%s1867_s17 + $0xc] sm:$0xf] %vm1216_vm3, %v1201_v61  ;;  %v1144_v1 = vmax.f32 %v981_v62, %v1105_v60 }
  0xf4   : > { %v1166_v2 = vadd.f32 %v1861_v22, %v1144_v1 }
  0xf6   : > { %v1184_v3 = vmax.f32 %v1166_v2, 0.0 }
  0xf7   : > { %v944_v5 = vpop.f32.mrf.mxu2  ;;  %v1107_v6 = vpop.f32.mrf.mxu3 }
  0xf8   : > { %v1202_v7 = vpack.c.bf16 %v1184_v3, %v1184_v3  ;;  %v982_v8 = vmax.f32 %v819_v4, %v944_v5  ;;  %v639_v9 = vpop.f32.mrf.mxu0  ;;  %v784_v10 = vpop.f32.mrf.mxu1 }
  0xf9   : > { %v820_v13 = vmax.f32 %v639_v9, %v784_v10 }
  0xfa   : > { %1221 = vst.msk [vmem:[%s1867_s17 + $0x10] sm:$0xf] %vm1216_vm3, %v1202_v7  ;;  %v1145_v11 = vmax.f32 %v982_v8, %v1107_v6 }
  0xfc   : > { %v1167_v12 = vadd.f32 %v1861_v22, %v1145_v11 }
  0xfe   : > { %v1185_v14 = vmax.f32 %v1167_v12, 0.0 }
  0xff   : > { %v947_v15 = vpop.f32.mrf.mxu2  ;;  %v1110_v16 = vpop.f32.mrf.mxu3 }
 0x100   : > { %v1203_v17 = vpack.c.bf16 %v1185_v14, %v1185_v14  ;;  %v983_v18 = vmax.f32 %v820_v13, %v947_v15  ;;  %v641_v19 = vpop.f32.mrf.mxu0  ;;  %v786_v20 = vpop.f32.mrf.mxu1 }
 0x101   : > { %v821_v25 = vmax.f32 %v641_v19, %v786_v20 }
 0x102   : > { %1222 = vst.msk [vmem:[%s1867_s17 + $0x14] sm:$0xf] %vm1216_vm3, %v1203_v17  ;;  %v1146_v21 = vmax.f32 %v983_v18, %v1110_v16 }
 0x104   : > { %v1168_v23 = vadd.f32 %v1861_v22, %v1146_v21 }
 0x106   : > { %v1186_v24 = vmax.f32 %v1168_v23, 0.0 }
 0x107   : > { %v949_v26 = vpop.f32.mrf.mxu2  ;;  %v1112_v27 = vpop.f32.mrf.mxu3 }
 0x108   : > { %v1204_v28 = vpack.c.bf16 %v1186_v24, %v1186_v24  ;;  %v984_v29 = vmax.f32 %v821_v25, %v949_v26  ;;  %v644_v30 = vpop.f32.mrf.mxu0  ;;  %v789_v31 = vpop.f32.mrf.mxu1 }
 0x109   : > { %v822_v34 = vmax.f32 %v644_v30, %v789_v31 }
 0x10a   : > { %1223 = vst.msk [vmem:[%s1867_s17 + $0x18] sm:$0xf] %vm1216_vm3, %v1204_v28  ;;  %v1147_v32 = vmax.f32 %v984_v29, %v1112_v27 }
 0x10c   : > { %v1169_v33 = vadd.f32 %v1861_v22, %v1147_v32 }
 0x10e   : > { %v1187_v35 = vmax.f32 %v1169_v33, 0.0 }
 0x10f   : > { %v952_v36 = vpop.f32.mrf.mxu2  ;;  %v1115_v37 = vpop.f32.mrf.mxu3 }
 0x110   : > { %v1205_v38 = vpack.c.bf16 %v1187_v35, %v1187_v35  ;;  %v985_v39 = vmax.f32 %v822_v34, %v952_v36  ;;  %v646_v40 = vpop.f32.mrf.mxu0  ;;  %v791_v41 = vpop.f32.mrf.mxu1 }
 0x111   : > { %v823_v45 = vmax.f32 %v646_v40, %v791_v41 }
 0x112   : > { %1224 = vst.msk [vmem:[%s1867_s17 + $0x1c] sm:$0xf] %vm1216_vm3, %v1205_v38  ;;  %v1148_v42 = vmax.f32 %v985_v39, %v1115_v37 }
 0x114   : > { %v1170_v43 = vadd.f32 %v1861_v22, %v1148_v42 }
 0x116   : > { %v1188_v44 = vmax.f32 %v1170_v43, 0.0 }
 0x117   : > { %v954_v46 = vpop.f32.mrf.mxu2  ;;  %v1117_v47 = vpop.f32.mrf.mxu3 }
 0x118   : > { %v1206_v48 = vpack.c.bf16 %v1188_v44, %v1188_v44  ;;  %v986_v49 = vmax.f32 %v823_v45, %v954_v46  ;;  %v649_v50 = vpop.f32.mrf.mxu0  ;;  %v794_v51 = vpop.f32.mrf.mxu1 }
 0x119   : > { %v824_v54 = vmax.f32 %v649_v50, %v794_v51 }
 0x11a   : > { %1225 = vst.msk [vmem:[%s1867_s17 + $0x20] sm:$0xf] %vm1216_vm3, %v1206_v48  ;;  %v1149_v52 = vmax.f32 %v986_v49, %v1117_v47 }
 0x11c   : > { %v1171_v53 = vadd.f32 %v1861_v22, %v1149_v52 }
 0x11e   : > { %v1189_v55 = vmax.f32 %v1171_v53, 0.0 }
 0x11f   : > { %v957_v56 = vpop.f32.mrf.mxu2  ;;  %v1120_v57 = vpop.f32.mrf.mxu3 }
 0x120   : > { %v1207_v58 = vpack.c.bf16 %v1189_v55, %v1189_v55  ;;  %v987_v59 = vmax.f32 %v824_v54, %v957_v56  ;;  %v651_v60 = vpop.f32.mrf.mxu0  ;;  %v796_v61 = vpop.f32.mrf.mxu1 }
 0x121   : > { %v825_v1 = vmax.f32 %v651_v60, %v796_v61 }
 0x122   : > { %1226 = vst.msk [vmem:[%s1867_s17 + $0x24] sm:$0xf] %vm1216_vm3, %v1207_v58  ;;  %v1150_v62 = vmax.f32 %v987_v59, %v1120_v57 }
 0x124   : > { %v1172_v63 = vadd.f32 %v1861_v22, %v1150_v62 }
 0x126   : > { %v1190_v0 = vmax.f32 %v1172_v63, 0.0 }
 0x127   : > { %v959_v2 = vpop.f32.mrf.mxu2  ;;  %v1122_v3 = vpop.f32.mrf.mxu3 }
 0x128   : > { %v1208_v4 = vpack.c.bf16 %v1190_v0, %v1190_v0  ;;  %v988_v5 = vmax.f32 %v825_v1, %v959_v2  ;;  %v654_v6 = vpop.f32.mrf.mxu0  ;;  %v799_v7 = vpop.f32.mrf.mxu1 }
 0x129   : > { %v826_v10 = vmax.f32 %v654_v6, %v799_v7 }
 0x12a   : > { %1227 = vst.msk [vmem:[%s1867_s17 + $0x28] sm:$0xf] %vm1216_vm3, %v1208_v4  ;;  %v1151_v8 = vmax.f32 %v988_v5, %v1122_v3 }
 0x12c   : > { %v1173_v9 = vadd.f32 %v1861_v22, %v1151_v8 }
 0x12e   : > { %v1191_v11 = vmax.f32 %v1173_v9, 0.0 }
 0x12f   : > { %v962_v12 = vpop.f32.mrf.mxu2  ;;  %v1125_v13 = vpop.f32.mrf.mxu3 }
 0x130   : > { %v1209_v14 = vpack.c.bf16 %v1191_v11, %v1191_v11  ;;  %v989_v15 = vmax.f32 %v826_v10, %v962_v12  ;;  %v656_v16 = vpop.f32.mrf.mxu0  ;;  %v801_v17 = vpop.f32.mrf.mxu1 }
 0x131   : > { %v827_v21 = vmax.f32 %v656_v16, %v801_v17 }
 0x132   : > { %1228 = vst.msk [vmem:[%s1867_s17 + $0x2c] sm:$0xf] %vm1216_vm3, %v1209_v14  ;;  %v1152_v18 = vmax.f32 %v989_v15, %v1125_v13 }
 0x134   : > { %v1174_v19 = vadd.f32 %v1861_v22, %v1152_v18 }
 0x136   : > { %v1192_v20 = vmax.f32 %v1174_v19, 0.0 }
 0x137   : > { %v964_v23 = vpop.f32.mrf.mxu2  ;;  %v1127_v24 = vpop.f32.mrf.mxu3 }
 0x138   : > { %v1210_v25 = vpack.c.bf16 %v1192_v20, %v1192_v20  ;;  %v990_v26 = vmax.f32 %v827_v21, %v964_v23  ;;  %v659_v27 = vpop.f32.mrf.mxu0  ;;  %v804_v28 = vpop.f32.mrf.mxu1 }
 0x139   : > { %v828_v31 = vmax.f32 %v659_v27, %v804_v28 }
 0x13a   : > { %1229 = vst.msk [vmem:[%s1867_s17 + $0x30] sm:$0xf] %vm1216_vm3, %v1210_v25  ;;  %v1153_v29 = vmax.f32 %v990_v26, %v1127_v24 }
 0x13c   : > { %v1175_v30 = vadd.f32 %v1861_v22, %v1153_v29 }
 0x13e   : > { %v1193_v32 = vmax.f32 %v1175_v30, 0.0 }
 0x13f   : > { %v967_v33 = vpop.f32.mrf.mxu2  ;;  %v1130_v34 = vpop.f32.mrf.mxu3 }
 0x140   : > { %v1211_v35 = vpack.c.bf16 %v1193_v32, %v1193_v32  ;;  %v991_v36 = vmax.f32 %v828_v31, %v967_v33  ;;  %v661_v37 = vpop.f32.mrf.mxu0  ;;  %v806_v38 = vpop.f32.mrf.mxu1 }
 0x141   : > { %v829_v42 = vmax.f32 %v661_v37, %v806_v38 }
 0x142   : > { %1230 = vst.msk [vmem:[%s1867_s17 + $0x34] sm:$0xf] %vm1216_vm3, %v1211_v35  ;;  %v1154_v39 = vmax.f32 %v991_v36, %v1130_v34 }
 0x144   : > { %v1176_v40 = vadd.f32 %v1861_v22, %v1154_v39 }
 0x146   : > { %v1194_v41 = vmax.f32 %v1176_v40, 0.0 }
 0x147   : > { %v969_v43 = vpop.f32.mrf.mxu2  ;;  %v1132_v44 = vpop.f32.mrf.mxu3 }
 0x148   : > { %v1212_v45 = vpack.c.bf16 %v1194_v41, %v1194_v41  ;;  %v992_v46 = vmax.f32 %v829_v42, %v969_v43  ;;  %v664_v47 = vpop.f32.mrf.mxu0  ;;  %v809_v48 = vpop.f32.mrf.mxu1 }
 0x149   : > { %v830_v51 = vmax.f32 %v664_v47, %v809_v48 }
 0x14a   : > { %1231 = vst.msk [vmem:[%s1867_s17 + $0x38] sm:$0xf] %vm1216_vm3, %v1212_v45  ;;  %v1155_v49 = vmax.f32 %v992_v46, %v1132_v44 }
 0x14c   : > { %v1177_v50 = vadd.f32 %v1861_v22, %v1155_v49 }
 0x14e   : > { %v1195_v52 = vmax.f32 %v1177_v50, 0.0 }
 0x14f   : > { %v972_v53 = vpop.f32.mrf.mxu2  ;;  %v1135_v54 = vpop.f32.mrf.mxu3 }
 0x150   : > { %v1213_v55 = vpack.c.bf16 %v1195_v52, %v1195_v52  ;;  %v993_v56 = vmax.f32 %v830_v51, %v972_v53  ;;  %v666_v58 = vpop.f32.mrf.mxu0  ;;  %v811_v59 = vpop.f32.mrf.mxu1 }
 0x151   : > { %v831_v62 = vmax.f32 %v666_v58, %v811_v59 }
 0x152   : > { %1232 = vst.msk [vmem:[%s1867_s17 + $0x3c] sm:$0xf] %vm1216_vm3, %v1213_v55  ;;  %v1156_v57 = vmax.f32 %v993_v56, %v1135_v54 }
 0x154   : > { %v1178_v60 = vadd.f32 %v1861_v22, %v1156_v57 }
 0x156   : > { %v1196_v61 = vmax.f32 %v1178_v60, 0.0 }
 0x157   : > { %v974_v63 = vpop.f32.mrf.mxu2  ;;  %v1137_v2 = vpop.f32.mrf.mxu3 }
 0x158   : > { %v1214_v0 = vpack.c.bf16 %v1196_v61, %v1196_v61  ;;  %v994_v1 = vmax.f32 %v831_v62, %v974_v63 }
 0x15a   : > { %1233 = vst.msk [vmem:[%s1867_s17 + $0x40] sm:$0xf] %vm1216_vm3, %v1214_v0  ;;  %v1157_v3 = vmax.f32 %v994_v1, %v1137_v2 }
 0x15c   : > { %v1179_v4 = vadd.f32 %v1861_v22, %v1157_v3 }
 0x15e   : > { %v1197_v5 = vmax.f32 %v1179_v4, 0.0 }
 0x160   : > { %v1215_v6 = vpack.c.bf16 %v1197_v5, %v1197_v5 }
 0x162   : > { %1234 = vst.msk [vmem:[%s1867_s17 + $0x44] sm:$0xf] %vm1216_vm3, %v1215_v6 }
 0x163 PF: > { %p10_p9 = scmp.ge.s32.totalorder %s1677_s16, 4   ;;  %s1936_s12 = smov %s1633_s13 }
 0x164   : > { %s1937_s13 = smov %s1686_s19  ;;  %s1938_s14 = smov %s1677_s16 }
 0x165   :  { %12 = sbr.rel (!%p10_p9) target bundleno = 2 (0x2), region = 111 }

// kernel: net_forward.4
= control target key start
LH: loop header
LB: loop body
LE: loop exit
PB: predicated region body
PF: predicated region fallthrough
CT: control target
= control target key end

     0   :  { %s1914_s12 = smov 0   ;;  %s1916_s13 = smov 0   ;;  %s2611_s0 = inlined_call_operand.vmem [shape: bf16[4,32,896], index: 0, kind: input, shape index: {}]   ;;  %s2612_s1 = inlined_call_operand.vmem [shape: bf16[896,64], index: 1, kind: input, shape index: {}]   ;;  %s2613_s2 = inlined_call_operand.vmem [shape: f32[1,64], index: 2, kind: input, shape index: {}]   ;;  %s2614_s3 = inlined_call_operand.vmem [shape: bf16[32,64], index: 3, kind: output, shape index: {}]  }
   0x1   :  { %s1918_s14 = smov 0  }
   0x2 LB: > { %s1370_s15 = sadd.s32 4294967295, %s1892_s14   ;;  %s1931_s16 = sadd.s32 1, %s1892_s14   ;;  %s1892_s14 = sphi %s1918_s14, %s2641_s14   ;;  %s1888_s13 = sphi %s1916_s13, %s2640_s13   ;;  %s1884_s12 = sphi %s1914_s12, %s2639_s12  }
   0x3   : > { %s17_s17 = ssub.s32 %s1892_s14, %s1931_s16  ;;  %s20_s18 = sadd.s32 1, %s1888_s13 }
   0x4   : > { %p18_p0 = scmp.eq.s32.totalorder %s17_s17, 0  ;;  %p27_p1 = scmp.ne.s32.totalorder %s1888_s13, %s1884_s12 }
   0x5   : > { %p28_p2 = scmp.eq.s32.totalorder %s1892_s14, 0  ;;  %p1373_p4 = scmp.ge.s32.totalorder %s1892_s14, 2 }
   0x6   : > { %s1940_s19 = scalar_select %p18_p0, %s1888_s13, %s20_s18  }
   0x7   : > { %p29_p3 = por %p28_p2, %p27_p1  ;;  %127 = sbr.rel (%p1373_p4) target bundleno = 49 (0x31), region = 24 }
   0xc   : > { %130 = sbr.rel (!%p29_p3) target bundleno = 49 (0x31), region = 28  ;;  %s132_s20 = sand.u32 (%p29_p3), 1, %s1888_s13  }
   0xd   : > { %s1843_s21 = smul.u32 (%p29_p3), 56, %s1892_s14 }
   0xe   : > { %s1842_s22 = smul.u32 (%p29_p3), 224, %s132_s20 }
   0xf   : > { %s1948_s25 = scalar_lea.vmem (%p29_p3), %s2611_s0, %s1843_s21 }
  0x10   : > { %v153_v0 = vld [vmem:[%s1948_s25] sm:$0xff] (%p29_p3)  ;;  %v155_v1 = vld [vmem:[%s1948_s25 + $0x8] sm:$0xff] (%p29_p3)  ;;  %v157_v2 = vld [vmem:[%s1948_s25 + $0x10] sm:$0xff] (%p29_p3)  ;;  %s1953_s26 = scalar_lea.vmem (%p29_p3), [#allocation2], %s1842_s22 }
  0x11   : > { %154 = vst [vmem:[%s1953_s26] sm:$0xff] %v153_v0  ;;  %v159_v3 = vld [vmem:[%s1948_s25 + $0x1c] sm:$0xff]  ;;  %v161_v4 = vld [vmem:[%s1948_s25 + $0x24] sm:$0xff]  ;;  %v163_v5 = vld [vmem:[%s1948_s25 + $0x2c] sm:$0xff] }
  0x12   : > { %156 = vst [vmem:[%s1953_s26 + $0x8] sm:$0xff] %v155_v1  ;;  %v165_v6 = vld [vmem:[%s1948_s25 + $0x70] sm:$0xff]  ;;  %v167_v7 = vld [vmem:[%s1948_s25 + $0x78] sm:$0xff]  ;;  %v169_v8 = vld [vmem:[%s1948_s25 + $0x80] sm:$0xff] }
  0x13   : > { %158 = vst [vmem:[%s1953_s26 + $0x10] sm:$0xff] %v157_v2  ;;  %v171_v9 = vld [vmem:[%s1948_s25 + $0x8c] sm:$0xff]  ;;  %v173_v10 = vld [vmem:[%s1948_s25 + $0x94] sm:$0xff]  ;;  %v175_v11 = vld [vmem:[%s1948_s25 + $0x9c] sm:$0xff] }
  0x14   : > { %160 = vst [vmem:[%s1953_s26 + $0x1c] sm:$0xff] %v159_v3  ;;  %v177_v12 = vld [vmem:[%s1948_s25 + $0xe0] sm:$0xff]  ;;  %v179_v13 = vld [vmem:[%s1948_s25 + $0xe8] sm:$0xff]  ;;  %v181_v14 = vld [vmem:[%s1948_s25 + $0xf0] sm:$0xff] }
  0x15   : > { %162 = vst [vmem:[%s1953_s26 + $0x24] sm:$0xff] %v161_v4  ;;  %v183_v15 = vld [vmem:[%s1948_s25 + $0xfc] sm:$0xff]  ;;  %v185_v16 = vld [vmem:[%s1948_s25 + $0x104] sm:$0xff]  ;;  %v187_v17 = vld [vmem:[%s1948_s25 + $0x10c] sm:$0xff] }
  0x16   : > { %164 = vst [vmem:[%s1953_s26 + $0x2c] sm:$0xff] %v163_v5  ;;  %v189_v18 = vld [vmem:[%s1948_s25 + $0x150] sm:$0xff]  ;;  %v191_v19 = vld [vmem:[%s1948_s25 + $0x158] sm:$0xff]  ;;  %v193_v20 = vld [vmem:[%s1948_s25 + $0x160] sm:$0xff] }
  0x17   : > { %166 = vst [vmem:[%s1953_s26 + $0x38] sm:$0xff] %v165_v6  ;;  %v195_v21 = vld [vmem:[%s1948_s25 + $0x16c] sm:$0xff]  ;;  %v197_v22 = vld [vmem:[%s1948_s25 + $0x174] sm:$0xff]  ;;  %v199_v23 = vld [vmem:[%s1948_s25 + $0x17c] sm:$0xff] }
  0x18   : > { %168 = vst [vmem:[%s1953_s26 + $0x40] sm:$0xff] %v167_v7  ;;  %v1377_v24 = vld [vmem:[%s1948_s25 + $0x18] sm:$0xf]  ;;  %v1379_v25 = vld [vmem:[%s1948_s25 + $0x34] sm:$0xf] }
  0x19   : > { %170 = vst [vmem:[%s1953_s26 + $0x48] sm:$0xff] %v169_v8  ;;  %v1381_v26 = vld [vmem:[%s1948_s25 + $0x88] sm:$0xf]  ;;  %v1383_v27 = vld [vmem:[%s1948_s25 + $0xa4] sm:$0xf] }
  0x1a   : > { %172 = vst [vmem:[%s1953_s26 + $0x54] sm:$0xff] %v171_v9  ;;  %v1385_v28 = vld [vmem:[%s1948_s25 + $0xf8] sm:$0xf]  ;;  %v1387_v29 = vld [vmem:[%s1948_s25 + $0x114] sm:$0xf] }
  0x1b   : > { %174 = vst [vmem:[%s1953_s26 + $0x5c] sm:$0xff] %v173_v10  ;;  %v1389_v30 = vld [vmem:[%s1948_s25 + $0x168] sm:$0xf]  ;;  %v1391_v31 = vld [vmem:[%s1948_s25 + $0x184] sm:$0xf] }
  0x1c   : > { %176 = vst [vmem:[%s1953_s26 + $0x64] sm:$0xff] %v175_v11 }
  0x1d   : > { %178 = vst [vmem:[%s1953_s26 + $0x70] sm:$0xff] %v177_v12 }
  0x1e   : > { %180 = vst [vmem:[%s1953_s26 + $0x78] sm:$0xff] %v179_v13 }
  0x1f   : > { %182 = vst [vmem:[%s1953_s26 + $0x80] sm:$0xff] %v181_v14 }
  0x20   : > { %184 = vst [vmem:[%s1953_s26 + $0x8c] sm:$0xff] %v183_v15 }
  0x21   : > { %186 = vst [vmem:[%s1953_s26 + $0x94] sm:$0xff] %v185_v16 }
  0x22   : > { %188 = vst [vmem:[%s1953_s26 + $0x9c] sm:$0xff] %v187_v17 }
  0x23   : > { %190 = vst [vmem:[%s1953_s26 + $0xa8] sm:$0xff] %v189_v18 }
  0x24   : > { %192 = vst [vmem:[%s1953_s26 + $0xb0] sm:$0xff] %v191_v19 }
  0x25   : > { %194 = vst [vmem:[%s1953_s26 + $0xb8] sm:$0xff] %v193_v20 }
  0x26   : > { %196 = vst [vmem:[%s1953_s26 + $0xc4] sm:$0xff] %v195_v21 }
  0x27   : > { %198 = vst [vmem:[%s1953_s26 + $0xcc] sm:$0xff] %v197_v22 }
  0x28   : > { %200 = vst [vmem:[%s1953_s26 + $0xd4] sm:$0xff] %v199_v23 }
  0x29   : > { %1378 = vst [vmem:[%s1953_s26 + $0x18] sm:$0xf] %v1377_v24 }
  0x2a   : > { %1380 = vst [vmem:[%s1953_s26 + $0x34] sm:$0xf] %v1379_v25 }
  0x2b   : > { %1382 = vst [vmem:[%s1953_s26 + $0x50] sm:$0xf] %v1381_v26 }
  0x2c   : > { %1384 = vst [vmem:[%s1953_s26 + $0x6c] sm:$0xf] %v1383_v27 }
  0x2d   : > { %1386 = vst [vmem:[%s1953_s26 + $0x88] sm:$0xf] %v1385_v28 }
  0x2e   : > { %1388 = vst [vmem:[%s1953_s26 + $0xa4] sm:$0xf] %v1387_v29 }
  0x2f   : > { %1390 = vst [vmem:[%s1953_s26 + $0xc0] sm:$0xf] %v1389_v30 }
  0x30   : > { %1392 = vst [vmem:[%s1953_s26 + $0xdc] sm:$0xf] %v1391_v31 }
  0x31 PF: > { %p1393_p5 = scmp.ge.s32.totalorder %s1892_s14, 1  ;;  %p229_p6 = scmp.lt.s32.totalorder %s1892_s14, 3 }
  0x33   : > { %p230_p7 = pnand %p1393_p5, %p229_p6 }
  0x35   : > { %233 = sbr.rel (%p230_p7) target bundleno = 437 (0x1b5), region = 54 }
  0x3a   : > { %v2021_v32 = vld [vmem:[%s2612_s1 + $0x38] sm:$0xff]  ;;  %v2043_v36 = vld [vmem:[%s2612_s1 + $0x30] sm:$0xff]  ;;  %v2067_v40 = vld [vmem:[%s2612_s1 + $0x28] sm:$0xff]  ;;  %s236_s25 = sand.u32 1, %s1884_s12   ;;  %vm1301_vm0 = vcmask 519168  }
  0x3b   : > { %v2026_v33 = vld [vmem:[%s2612_s1 + $0x78] sm:$0xff]  ;;  %758 = vmatpush.bf16.msra.mxu0 %v2021_v32  ;;  %v2048_v37 = vld [vmem:[%s2612_s1 + $0x70] sm:$0xff]  ;;  %v2072_v41 = vld [vmem:[%s2612_s1 + $0x68] sm:$0xff]  ;;  %s1844_s6 = smul.u32 224, %s236_s25 }
  0x3c   : > { %v2031_v34 = vld [vmem:[%s2612_s1 + $0xb8] sm:$0xff]  ;;  %772 = vmatpush.bf16.msra.mxu1 %v2026_v33  ;;  %v2055_v38 = vld [vmem:[%s2612_s1 + $0xb0] sm:$0xff]  ;;  %v2079_v42 = vld [vmem:[%s2612_s1 + $0xa8] sm:$0xff] }
  0x3d   : > { %v2036_v35 = vld [vmem:[%s2612_s1 + $0xf8] sm:$0xff]  ;;  %786 = vmatpush.bf16.msra.mxu2 %v2031_v34  ;;  %v2060_v39 = vld [vmem:[%s2612_s1 + $0xf0] sm:$0xff]  ;;  %v2084_v43 = vld [vmem:[%s2612_s1 + $0xe8] sm:$0xff]  ;;  %s2215_s5 = scalar_lea.vmem [#allocation2], %s1844_s6 }
  0x3e   : > { %800 = vmatpush.bf16.msra.mxu3 %v2036_v35  ;;  %v2091_v44 = vld [vmem:[%s2612_s1 + $0x20] sm:$0xff]  ;;  %v2115_v48 = vld [vmem:[%s2612_s1 + $0x18] sm:$0xff]  ;;  %v2140_v52 = vld [vmem:[%s2612_s1 + $0x10] sm:$0xff] }
  0x3f   : > { %759 = vmatpush.bf16.msra.mxu0 %v2043_v36  ;;  %v2096_v45 = vld [vmem:[%s2612_s1 + $0x60] sm:$0xff]  ;;  %v2120_v49 = vld [vmem:[%s2612_s1 + $0x58] sm:$0xff]  ;;  %2625 = vst [vmem:[#allocation3_spill] sm:$0xff] %v2140_v52  ;;  %v2145_v53 = vld [vmem:[%s2612_s1 + $0x50] sm:$0xff] }
  0x40   : > { %773 = vmatpush.bf16.msra.mxu1 %v2048_v37  ;;  %v2103_v46 = vld [vmem:[%s2612_s1 + $0xa0] sm:$0xff]  ;;  %v2127_v50 = vld [vmem:[%s2612_s1 + $0x98] sm:$0xff]  ;;  %2626 = vst [vmem:[#allocation4_spill] sm:$0xff] %v2145_v53  ;;  %v2152_v54 = vld [vmem:[%s2612_s1 + $0x90] sm:$0xff] }
  0x41   : > { %787 = vmatpush.bf16.msra.mxu2 %v2055_v38  ;;  %v2108_v47 = vld [vmem:[%s2612_s1 + $0xe0] sm:$0xff]  ;;  %v2132_v51 = vld [vmem:[%s2612_s1 + $0xd8] sm:$0xff]  ;;  %v2157_v55 = vld [vmem:[%s2612_s1 + $0xd0] sm:$0xff] }
  0x42   : > { %801 = vmatpush.bf16.msra.mxu3 %v2060_v39  ;;  %v2164_v56 = vld [vmem:[%s2612_s1 + $0x8] sm:$0xff]  ;;  %v2186_v60 = vld [vmem:[%s2612_s1] sm:$0xff]  ;;  %v2208_v0 = vld [vmem:[%s2612_s1 + $0x138] sm:$0xff] }
  0x43   : > { %760 = vmatpush.bf16.msra.mxu0 %v2067_v40  ;;  %2627 = vst [vmem:[#allocation5_spill] sm:$0xff] %v2164_v56  ;;  %v2169_v57 = vld [vmem:[%s2612_s1 + $0x48] sm:$0xff]  ;;  %v2191_v61 = vld [vmem:[%s2612_s1 + $0x40] sm:$0xff]  ;;  %v2213_v1 = vld [vmem:[%s2612_s1 + $0x178] sm:$0xff] }
  0x44   : > { %774 = vmatpush.bf16.msra.mxu1 %v2072_v41  ;;  %v2176_v58 = vld [vmem:[%s2612_s1 + $0x88] sm:$0xff]  ;;  %v2196_v62 = vld [vmem:[%s2612_s1 + $0x80] sm:$0xff]  ;;  %v1817_v3 = vld [vmem:[%s2215_s5 + $0x18] sm:$0xf0] }
  0x45   : > { %788 = vmatpush.bf16.msra.mxu2 %v2079_v42  ;;  %v2181_v59 = vld [vmem:[%s2612_s1 + $0xc8] sm:$0xff]  ;;  %v2201_v63 = vld [vmem:[%s2612_s1 + $0xc0] sm:$0xff]  ;;  %v2230_v10 = vld [vmem:[%s2612_s1 + $0x1b8] sm:$0xff] }
  0x46   : > { %802 = vmatpush.bf16.msra.mxu3 %v2084_v43  ;;  %v1398_v2 = vld [vmem:[%s2215_s5] sm:$0xf]  ;;  %v1406_v4 = vld [vmem:[%s2215_s5 + $0x8] sm:$0xf]  ;;  %v1818_v5 = vld [vmem:[%s2215_s5 + $0x20] sm:$0xf0] }
  0x47   : > { %761 = vmatpush.bf16.msra.mxu0 %v2091_v44  ;;  %v1814_v6 = vld [vmem:[%s2215_s5 + $0x4] sm:$0xf]  ;;  %v1400_v7 = vld [vmem:[%s2215_s5 + $0x1c] sm:$0xf0]  ;;  %v1815_v8 = vld [vmem:[%s2215_s5 + $0xc] sm:$0xf]  ;;  %v1399_v11 = vor.u32 %v1817_v3, %v1398_v2  ;;  %v1407_v12 = vor.u32 %v1818_v5, %v1406_v4 }
  0x48   : > { %775 = vmatpush.bf16.msra.mxu1 %v2096_v45  ;;  %v1408_v9 = vld [vmem:[%s2215_s5 + $0x24] sm:$0xf0]  ;;  %v1403_v13 = vor.u32 %v1814_v6, %v1400_v7  ;;  %v2241_v15 = vld [vmem:[%s2612_s1 + $0x130] sm:$0xff]  ;;  %v2279_v21 = vld [vmem:[%s2612_s1 + $0x120] sm:$0xff] }
  0x49   : > { %789 = vmatpush.bf16.msra.mxu2 %v2103_v46  ;;  %v1411_v14 = vor.u32 %v1815_v8, %v1408_v9  ;;  %v2246_v16 = vld [vmem:[%s2612_s1 + $0x170] sm:$0xff]  ;;  %v2260_v18 = vld [vmem:[%s2612_s1 + $0x128] sm:$0xff]  ;;  %v2284_v22 = vld [vmem:[%s2612_s1 + $0x160] sm:$0xff] }
  0x4a   : > { %803 = vmatpush.bf16.msra.mxu3 %v2108_v47  ;;  %v2253_v17 = vld [vmem:[%s2612_s1 + $0x1b0] sm:$0xff]  ;;  %v2265_v19 = vld [vmem:[%s2612_s1 + $0x168] sm:$0xff]  ;;  %v2291_v23 = vld [vmem:[%s2612_s1 + $0x1a0] sm:$0xff] }
  0x4b   : > { %762 = vmatpush.bf16.msra.mxu0 %v2115_v48  ;;  %v2272_v20 = vld [vmem:[%s2612_s1 + $0x1a8] sm:$0xff]  ;;  %v2298_v24 = vld [vmem:[%s2612_s1 + $0x118] sm:$0xff]  ;;  %v2317_v27 = vld [vmem:[%s2612_s1 + $0x110] sm:$0xff] }
  0x4c   : > { %776 = vmatpush.bf16.msra.mxu1 %v2120_v49  ;;  %v2303_v25 = vld [vmem:[%s2612_s1 + $0x158] sm:$0xff]  ;;  %v2322_v28 = vld [vmem:[%s2612_s1 + $0x150] sm:$0xff]  ;;  %v2336_v30 = vld [vmem:[%s2612_s1 + $0x108] sm:$0xff] }
  0x4d   : > { %790 = vmatpush.bf16.msra.mxu2 %v2127_v50  ;;  %v2310_v26 = vld [vmem:[%s2612_s1 + $0x198] sm:$0xff]  ;;  %v2329_v29 = vld [vmem:[%s2612_s1 + $0x190] sm:$0xff]  ;;  %v2341_v31 = vld [vmem:[%s2612_s1 + $0x148] sm:$0xff] }
  0x4e   : > { %804 = vmatpush.bf16.msra.mxu3 %v2132_v51  ;;  %2628 = vst [vmem:[#allocation6_spill] sm:$0xff] %v2329_v29  ;;  %v2348_v2 = vld [vmem:[%s2612_s1 + $0x188] sm:$0xff]  ;;  %v2353_v3 = vld [vmem:[%s2612_s1 + $0x100] sm:$0xff]  ;;  %v1414_v6 = vld [vmem:[%s2215_s5 + $0x10] sm:$0xf] }
  0x4f   : > { %763 = vmatpush.bf16.msra.mxu0 %v2140_v52  ;;  %2629 = vst [vmem:[#allocation7_spill] sm:$0xff] %v2341_v31  ;;  %v2358_v4 = vld [vmem:[%s2612_s1 + $0x140] sm:$0xff]  ;;  %v1819_v7 = vld [vmem:[%s2215_s5 + $0x28] sm:$0xf0]  ;;  %v1422_v8 = vld [vmem:[%s2215_s5 + $0x18] sm:$0xf] }
  0x50   : > { %777 = vmatpush.bf16.msra.mxu1 %v2145_v53  ;;  %2630 = vst [vmem:[#allocation8_spill] sm:$0xff] %v2348_v2  ;;  %v2365_v5 = vld [vmem:[%s2612_s1 + $0x180] sm:$0xff]  ;;  %v1820_v9 = vld [vmem:[%s2215_s5 + $0x30] sm:$0xf0] }
  0x51   : > { %791 = vmatpush.bf16.msra.mxu2 %v2152_v54 }
  0x52   : > { %805 = vmatpush.bf16.msra.mxu3 %v2157_v55 }
  0x53   : > { %764 = vmatpush.bf16.msra.mxu0 %v2164_v56 }
  0x54   : > { %778 = vmatpush.bf16.msra.mxu1 %v2169_v57 }
  0x55   : > { %792 = vmatpush.bf16.msra.mxu2 %v2176_v58 }
  0x56   : > { %806 = vmatpush.bf16.msra.mxu3 %v2181_v59 }
  0x57   : > { %765 = vmatpush.bf16.msra.mxu0 %v2186_v60 }
  0x58   : > { %779 = vmatpush.bf16.msra.mxu1 %v2191_v61 }
  0x59   : > { %793 = vmatpush.bf16.msra.mxu2 %v2196_v62 }
  0x5a   : > { %807 = vmatpush.bf16.msra.mxu3 %v2201_v63  ;;  %766 = vmatmul.bf16.vlgmr.msra.gmra.mxu0 %v1399_v11  ;;  %v1816_v11 = vld [vmem:[%s2215_s5 + $0x14] sm:$0xf] }
  0x5b   : > { %814 = vmatpush.bf16.msrb.mxu0 %v2208_v0  ;;  %780 = vmatmul.bf16.vlgmr.msra.gmra.mxu1 %v1403_v13  ;;  %v1658_v13 = vld [vmem:[%s2215_s5 + $0x38] sm:$0xf] }
  0x5c   : > { %828 = vmatpush.bf16.msrb.mxu1 %v2213_v1  ;;  %794 = vmatmul.bf16.vlgmr.msra.gmra.mxu2 %v1407_v12  ;;  %v1416_v12 = vld [vmem:[%s2215_s5 + $0x2c] sm:$0xf0] }
  0x5d   : > { %842 = vmatpush.bf16.msrb.mxu2 %v2230_v10  ;;  %808 = vmatmul.bf16.vlgmr.msra.gmra.mxu3 %v1411_v14  ;;  %v1824_v14 = vld [vmem:[%s2215_s5 + $0x50] sm:$0xf0] }
  0x5e   : > { %901 = vmatpush.bf16.msrb.mxu3 %v2021_v32 }
  0x5f   : > { %815 = vmatpush.bf16.msrb.mxu0 %v2241_v15 }
  0x60   : > { %829 = vmatpush.bf16.msrb.mxu1 %v2246_v16 }
  0x61   : > { %843 = vmatpush.bf16.msrb.mxu2 %v2253_v17 }
  0x62   : > { %902 = vmatpush.bf16.msrb.mxu3 %v2043_v36 }
  0x63   : > { %816 = vmatpush.bf16.msrb.mxu0 %v2260_v18 }
  0x64   : > { %830 = vmatpush.bf16.msrb.mxu1 %v2265_v19 }
  0x65   : > { %844 = vmatpush.bf16.msrb.mxu2 %v2272_v20 }
  0x66   : > { %903 = vmatpush.bf16.msrb.mxu3 %v2067_v40 }
  0x67   : > { %817 = vmatpush.bf16.msrb.mxu0 %v2279_v21 }
  0x68   : > { %831 = vmatpush.bf16.msrb.mxu1 %v2284_v22 }
  0x69   : > { %845 = vmatpush.bf16.msrb.mxu2 %v2291_v23 }
  0x6a   : > { %904 = vmatpush.bf16.msrb.mxu3 %v2091_v44 }
  0x6b   : > { %818 = vmatpush.bf16.msrb.mxu0 %v2298_v24 }
  0x6c   : > { %832 = vmatpush.bf16.msrb.mxu1 %v2303_v25 }
  0x6d   : > { %846 = vmatpush.bf16.msrb.mxu2 %v2310_v26 }
  0x6e   : > { %905 = vmatpush.bf16.msrb.mxu3 %v2115_v48 }
  0x6f   : > { %819 = vmatpush.bf16.msrb.mxu0 %v2317_v27 }
  0x70   : > { %833 = vmatpush.bf16.msrb.mxu1 %v2322_v28 }
  0x71   : > { %847 = vmatpush.bf16.msrb.mxu2 %v2329_v29  ;;  %v1419_v29 = vor.u32 %v1816_v11, %v1416_v12 }
  0x72   : > { %906 = vmatpush.bf16.msrb.mxu3 %v2140_v52  ;;  %v1423_v52 = vor.u32 %v1820_v9, %v1422_v8  ;;  %v1674_v8 = vld [vmem:[%s2215_s5 + $0x48] sm:$0xf]  ;;  %v1826_v9 = vld [vmem:[%s2215_s5 + $0x60] sm:$0xf0] }
  0x73   : > { %820 = vmatpush.bf16.msrb.mxu0 %v2336_v30 }
  0x74   : > { %834 = vmatpush.bf16.msrb.mxu1 %v2341_v31  ;;  %v1415_v31 = vor.u32 %v1819_v7, %v1414_v6  ;;  %v1666_v6 = vld [vmem:[%s2215_s5 + $0x40] sm:$0xf]  ;;  %v1825_v7 = vld [vmem:[%s2215_s5 + $0x58] sm:$0xf0] }
  0x75   : > { %848 = vmatpush.bf16.msrb.mxu2 %v2348_v2  ;;  %v1659_v2 = vor.u32 %v1824_v14, %v1658_v13  ;;  %v1667_v13 = vor.u32 %v1825_v7, %v1666_v6  ;;  %v1675_v14 = vor.u32 %v1826_v9, %v1674_v8  ;;  %v1823_v6 = vld [vmem:[%s2215_s5 + $0x4c] sm:$0xf]  ;;  %v1676_v7 = vld [vmem:[%s2215_s5 + $0x64] sm:$0xf0]  ;;  %v1682_v8 = vld [vmem:[%s2215_s5 + $0x50] sm:$0xf] }
  0x76   : > { %907 = vmatpush.bf16.msrb.mxu3 %v2164_v56  ;;  %v1827_v9 = vld [vmem:[%s2215_s5 + $0x68] sm:$0xf0] }
  0x77   : > { %821 = vmatpush.bf16.msrb.mxu0 %v2353_v3 }
  0x78   : > { %835 = vmatpush.bf16.msrb.mxu1 %v2358_v4 }
  0x79   : > { %849 = vmatpush.bf16.msrb.mxu2 %v2365_v5 }
  0x7a   : > { %908 = vmatpush.bf16.msrb.mxu3 %v2186_v60  ;;  %822 = vmatmul.bf16.vlgmr.msrb.gmra.mxu0 %v1415_v31  ;;  %v1822_v31 = vld [vmem:[%s2215_s5 + $0x44] sm:$0xf] }
  0x7b   : > { %915 = vmatpush.bf16.msra.mxu0 %v2026_v33  ;;  %836 = vmatmul.bf16.vlgmr.msrb.gmra.mxu1 %v1419_v29  ;;  %v1660_v29 = vld [vmem:[%s2215_s5 + $0x54] sm:$0xf0] }
  0x7c   : > { %929 = vmatpush.bf16.msra.mxu1 %v2031_v34  ;;  %850 = vmatmul.bf16.vlgmr.msrb.gmra.mxu2 %v1423_v52  ;;  %v1821_v52 = vld [vmem:[%s2215_s5 + $0x3c] sm:$0xf] }
  0x7d   : > { %943 = vmatpush.bf16.msra.mxu2 %v2036_v35  ;;  %909 = vmatmul.bf16.vlgmr.msrb.gmra.mxu3 %v1659_v2  ;;  %v1668_v2 = vld [vmem:[%s2215_s5 + $0x5c] sm:$0xf0]  ;;  %v1663_v11 = vor.u32 %v1821_v52, %v1660_v29  ;;  %v2631_v52 = vld [vmem:[#allocation6_spill] sm:$0xff] }
  0x7e   : > { %957 = vmatpush.bf16.msra.mxu3 %v2208_v0  ;;  %v1671_v12 = vor.u32 %v1822_v31, %v1668_v2  ;;  %v2632_v29 = vld [vmem:[#allocation3_spill] sm:$0xff]  ;;  %v2634_v2 = vld [vmem:[#allocation8_spill] sm:$0xff] }
  0x7f   : > { %916 = vmatpush.bf16.msra.mxu0 %v2048_v37  ;;  %v2633_v31 = vld [vmem:[#allocation7_spill] sm:$0xff] }
  0x80   : > { %930 = vmatpush.bf16.msra.mxu1 %v2055_v38 }
  0x81   : > { %944 = vmatpush.bf16.msra.mxu2 %v2060_v39 }
  0x82   : > { %958 = vmatpush.bf16.msra.mxu3 %v2241_v15 }
  0x83   : > { %917 = vmatpush.bf16.msra.mxu0 %v2072_v41 }
  0x84   : > { %931 = vmatpush.bf16.msra.mxu1 %v2079_v42 }
  0x85   : > { %945 = vmatpush.bf16.msra.mxu2 %v2084_v43 }
  0x86   : > { %959 = vmatpush.bf16.msra.mxu3 %v2260_v18 }
  0x87   : > { %918 = vmatpush.bf16.msra.mxu0 %v2096_v45 }
  0x88   : > { %932 = vmatpush.bf16.msra.mxu1 %v2103_v46 }
  0x89   : > { %946 = vmatpush.bf16.msra.mxu2 %v2108_v47 }
  0x8a   : > { %960 = vmatpush.bf16.msra.mxu3 %v2279_v21 }
  0x8b   : > { %919 = vmatpush.bf16.msra.mxu0 %v2120_v49 }
  0x8c   : > { %933 = vmatpush.bf16.msra.mxu1 %v2127_v50 }
  0x8d   : > { %947 = vmatpush.bf16.msra.mxu2 %v2132_v51 }
  0x8e   : > { %961 = vmatpush.bf16.msra.mxu3 %v2298_v24 }
  0x8f   : > { %920 = vmatpush.bf16.msra.mxu0 %v2145_v53 }
  0x90   : > { %934 = vmatpush.bf16.msra.mxu1 %v2152_v54 }
  0x91   : > { %948 = vmatpush.bf16.msra.mxu2 %v2157_v55 }
  0x92   : > { %962 = vmatpush.bf16.msra.mxu3 %v2317_v27 }
  0x93   : > { %921 = vmatpush.bf16.msra.mxu0 %v2169_v57 }
  0x94   : > { %935 = vmatpush.bf16.msra.mxu1 %v2176_v58 }
  0x95   : > { %949 = vmatpush.bf16.msra.mxu2 %v2181_v59 }
  0x96   : > { %963 = vmatpush.bf16.msra.mxu3 %v2336_v30 }
  0x97   : > { %922 = vmatpush.bf16.msra.mxu0 %v2191_v61 }
  0x98   : > { %936 = vmatpush.bf16.msra.mxu1 %v2196_v62 }
  0x99   : > { %950 = vmatpush.bf16.msra.mxu2 %v2201_v63 }
  0x9a   : > { %964 = vmatpush.bf16.msra.mxu3 %v2353_v3  ;;  %923 = vmatmul.bf16.vlgmr.msra.gmra.mxu0 %v1663_v11  ;;  %v1694_v11 = vld [vmem:[%s2215_s5 + $0x70] sm:$0xf] }
  0x9b   : > { %971 = vmatpush.bf16.msrb.mxu0 %v2213_v1  ;;  %937 = vmatmul.bf16.vlgmr.msra.gmra.mxu1 %v1667_v13  ;;  %v1828_v13 = vld [vmem:[%s2215_s5 + $0x74] sm:$0xf] }
  0x9c   : > { %985 = vmatpush.bf16.msrb.mxu1 %v2230_v10  ;;  %951 = vmatmul.bf16.vlgmr.msra.gmra.mxu2 %v1671_v12  ;;  %v1831_v12 = vld [vmem:[%s2215_s5 + $0x88] sm:$0xf0] }
  0x9d   : > { %1046 = vmatpush.bf16.msrb.mxu2 %v2021_v32  ;;  %965 = vmatmul.bf16.vlgmr.msra.gmra.mxu3 %v1675_v14  ;;  %v1696_v14 = vld [vmem:[%s2215_s5 + $0x8c] sm:$0xf0] }
  0x9e   : > { %1060 = vmatpush.bf16.msrb.mxu3 %v2026_v33 }
  0x9f   : > { %972 = vmatpush.bf16.msrb.mxu0 %v2246_v16 }
  0xa0   : > { %986 = vmatpush.bf16.msrb.mxu1 %v2253_v17 }
  0xa1   : > { %1047 = vmatpush.bf16.msrb.mxu2 %v2043_v36 }
  0xa2   : > { %1061 = vmatpush.bf16.msrb.mxu3 %v2048_v37 }
  0xa3   : > { %973 = vmatpush.bf16.msrb.mxu0 %v2265_v19 }
  0xa4   : > { %987 = vmatpush.bf16.msrb.mxu1 %v2272_v20 }
  0xa5   : > { %1048 = vmatpush.bf16.msrb.mxu2 %v2067_v40 }
  0xa6   : > { %1062 = vmatpush.bf16.msrb.mxu3 %v2072_v41 }
  0xa7   : > { %974 = vmatpush.bf16.msrb.mxu0 %v2284_v22 }
  0xa8   : > { %988 = vmatpush.bf16.msrb.mxu1 %v2291_v23 }
  0xa9   : > { %1049 = vmatpush.bf16.msrb.mxu2 %v2091_v44 }
  0xaa   : > { %1063 = vmatpush.bf16.msrb.mxu3 %v2096_v45 }
  0xab   : > { %975 = vmatpush.bf16.msrb.mxu0 %v2303_v25 }
  0xac   : > { %989 = vmatpush.bf16.msrb.mxu1 %v2310_v26 }
  0xad   : > { %1050 = vmatpush.bf16.msrb.mxu2 %v2115_v48 }
  0xae   : > { %1064 = vmatpush.bf16.msrb.mxu3 %v2120_v49 }
  0xaf   : > { %976 = vmatpush.bf16.msrb.mxu0 %v2322_v28 }
  0xb0   : > { %990 = vmatpush.bf16.msrb.mxu1 %v2631_v52 }
  0xb1   : > { %1051 = vmatpush.bf16.msrb.mxu2 %v2632_v29  ;;  %v1683_v29 = vor.u32 %v1827_v9, %v1682_v8  ;;  %v1830_v8 = vld [vmem:[%s2215_s5 + $0x84] sm:$0xf]  ;;  %v1712_v9 = vld [vmem:[%s2215_s5 + $0x9c] sm:$0xf0] }
  0xb2   : > { %1065 = vmatpush.bf16.msrb.mxu3 %v2145_v53  ;;  %v1679_v53 = vor.u32 %v1823_v6, %v1676_v7  ;;  %v1829_v6 = vld [vmem:[%s2215_s5 + $0x7c] sm:$0xf]  ;;  %v1704_v7 = vld [vmem:[%s2215_s5 + $0x94] sm:$0xf0] }
  0xb3   : > { %977 = vmatpush.bf16.msrb.mxu0 %v2633_v31 }
  0xb4   : > { %991 = vmatpush.bf16.msrb.mxu1 %v2634_v2  ;;  %v1695_v2 = vor.u32 %v1831_v12, %v1694_v11 }
  0xb5   : > { %1052 = vmatpush.bf16.msrb.mxu2 %v2164_v56  ;;  %v1699_v56 = vor.u32 %v1828_v13, %v1696_v14  ;;  %v1707_v13 = vor.u32 %v1829_v6, %v1704_v7  ;;  %v1715_v14 = vor.u32 %v1830_v8, %v1712_v9  ;;  %v1835_v7 = vld [vmem:[%s2215_s5 + $0xac] sm:$0xf]  ;;  %v1732_v8 = vld [vmem:[%s2215_s5 + $0xc4] sm:$0xf0]  ;;  %v1738_v9 = vld [vmem:[%s2215_s5 + $0xb0] sm:$0xf] }
  0xb6   : > { %1066 = vmatpush.bf16.msrb.mxu3 %v2169_v57 }
  0xb7   : > { %978 = vmatpush.bf16.msrb.mxu0 %v2358_v4 }
  0xb8   : > { %992 = vmatpush.bf16.msrb.mxu1 %v2365_v5 }
  0xb9   : > { %1053 = vmatpush.bf16.msrb.mxu2 %v2186_v60 }
  0xba   : > { %1067 = vmatpush.bf16.msrb.mxu3 %v2191_v61  ;;  %979 = vmatmul.bf16.vlgmr.msrb.gmra.mxu0 %v1679_v53  ;;  %v1702_v53 = vld [vmem:[%s2215_s5 + $0x78] sm:$0xf] }
  0xbb   : > { %1074 = vmatpush.bf16.msra.mxu0 %v2031_v34  ;;  %993 = vmatmul.bf16.vlgmr.msrb.gmra.mxu1 %v1683_v29  ;;  %v1710_v29 = vld [vmem:[%s2215_s5 + $0x80] sm:$0xf] }
  0xbc   : > { %1088 = vmatpush.bf16.msra.mxu1 %v2036_v35  ;;  %1054 = vmatmul.bf16.vlgmr.msrb.gmra.mxu2 %v1695_v2  ;;  %v1833_v2 = vld [vmem:[%s2215_s5 + $0x98] sm:$0xf0] }
  0xbd   : > { %1102 = vmatpush.bf16.msra.mxu2 %v2208_v0  ;;  %1068 = vmatmul.bf16.vlgmr.msrb.gmra.mxu3 %v1699_v56  ;;  %v1832_v56 = vld [vmem:[%s2215_s5 + $0x90] sm:$0xf0]  ;;  %v1711_v12 = vor.u32 %v1833_v2, %v1710_v29  ;;  %v1718_v29 = vld [vmem:[%s2215_s5 + $0x88] sm:$0xf]  ;;  %v1834_v2 = vld [vmem:[%s2215_s5 + $0xa0] sm:$0xf0] }
  0xbe   : > { %1116 = vmatpush.bf16.msra.mxu3 %v2213_v1  ;;  %v1703_v11 = vor.u32 %v1832_v56, %v1702_v53  ;;  %v2637_v56 = vld [vmem:[#allocation8_spill] sm:$0xff] }
  0xbf   : > { %1075 = vmatpush.bf16.msra.mxu0 %v2055_v38 }
  0xc0   : > { %1089 = vmatpush.bf16.msra.mxu1 %v2060_v39 }
  0xc1   : > { %1103 = vmatpush.bf16.msra.mxu2 %v2241_v15 }
  0xc2   : > { %1117 = vmatpush.bf16.msra.mxu3 %v2246_v16 }
  0xc3   : > { %1076 = vmatpush.bf16.msra.mxu0 %v2079_v42 }
  0xc4   : > { %1090 = vmatpush.bf16.msra.mxu1 %v2084_v43 }
  0xc5   : > { %1104 = vmatpush.bf16.msra.mxu2 %v2260_v18 }
  0xc6   : > { %1118 = vmatpush.bf16.msra.mxu3 %v2265_v19 }
  0xc7   : > { %1077 = vmatpush.bf16.msra.mxu0 %v2103_v46 }
  0xc8   : > { %1091 = vmatpush.bf16.msra.mxu1 %v2108_v47 }
  0xc9   : > { %1105 = vmatpush.bf16.msra.mxu2 %v2279_v21 }
  0xca   : > { %1119 = vmatpush.bf16.msra.mxu3 %v2284_v22 }
  0xcb   : > { %1078 = vmatpush.bf16.msra.mxu0 %v2127_v50 }
  0xcc   : > { %1092 = vmatpush.bf16.msra.mxu1 %v2132_v51 }
  0xcd   : > { %1106 = vmatpush.bf16.msra.mxu2 %v2298_v24 }
  0xce   : > { %1120 = vmatpush.bf16.msra.mxu3 %v2303_v25 }
  0xcf   : > { %1079 = vmatpush.bf16.msra.mxu0 %v2152_v54 }
  0xd0   : > { %1093 = vmatpush.bf16.msra.mxu1 %v2157_v55 }
  0xd1   : > { %1107 = vmatpush.bf16.msra.mxu2 %v2317_v27 }
  0xd2   : > { %1121 = vmatpush.bf16.msra.mxu3 %v2322_v28 }
  0xd3   : > { %1080 = vmatpush.bf16.msra.mxu0 %v2176_v58 }
  0xd4   : > { %1094 = vmatpush.bf16.msra.mxu1 %v2181_v59 }
  0xd5   : > { %1108 = vmatpush.bf16.msra.mxu2 %v2336_v30 }
  0xd6   : > { %1122 = vmatpush.bf16.msra.mxu3 %v2633_v31 }
  0xd7   : > { %1081 = vmatpush.bf16.msra.mxu0 %v2196_v62  ;;  %v767_v53 = vpop.f32.mrf.mxu0 }
  0xd8   : > { %1095 = vmatpush.bf16.msra.mxu1 %v2201_v63 }
  0xd9   : > { %1109 = vmatpush.bf16.msra.mxu2 %v2353_v3 }
  0xda   : > { %1123 = vmatpush.bf16.msra.mxu3 %v2358_v4  ;;  %1082 = vmatmul.bf16.vlgmr.msra.gmra.mxu0 %v1703_v11  ;;  %v1839_v11 = vld [vmem:[%s2215_s5 + $0xc8] sm:$0xf0] }
  0xdb   : > { %1130 = vmatpush.bf16.msrb.mxu0 %v2230_v10  ;;  %1096 = vmatmul.bf16.vlgmr.msra.gmra.mxu1 %v1707_v13  ;;  %v1719_v13 = vor.u32 %v1834_v2, %v1718_v29 }
  0xdc   : > { %1191 = vmatpush.bf16.msrb.mxu1 %v2021_v32  ;;  %1110 = vmatmul.bf16.vlgmr.msra.gmra.mxu2 %v1711_v12  ;;  %v781_v32 = vpop.f32.mrf.mxu1  ;;  %v1838_v12 = vld [vmem:[%s2215_s5 + $0xc0] sm:$0xf0] }
  0xdd   : > { %1205 = vmatpush.bf16.msrb.mxu2 %v2026_v33  ;;  %1124 = vmatmul.bf16.vlgmr.msra.gmra.mxu3 %v1715_v14  ;;  %v782_v33 = vadd.f32 %v781_v32, %v767_v53  ;;  %v1735_v14 = vor.u32 %v1835_v7, %v1732_v8  ;;  %v1739_v53 = vor.u32 %v1839_v11, %v1738_v9 }
  0xde   : > { %1219 = vmatpush.bf16.msrb.mxu3 %v2031_v34 }
  0xdf   : > { %1131 = vmatpush.bf16.msrb.mxu0 %v2253_v17  ;;  %v795_v34 = vpop.f32.mrf.mxu2 }
  0xe0   : > { %1192 = vmatpush.bf16.msrb.mxu1 %v2043_v36  ;;  %v796_v36 = vadd.f32 %v795_v34, %v782_v33 }
  0xe1   : > { %1206 = vmatpush.bf16.msrb.mxu2 %v2048_v37  ;;  %v809_v37 = vpop.f32.mrf.mxu3 }
  0xe2   : > { %1220 = vmatpush.bf16.msrb.mxu3 %v2055_v38  ;;  %v769_v38 = vpop.f32.mrf.mxu0 }
  0xe3   : > { %1132 = vmatpush.bf16.msrb.mxu0 %v2272_v20 }
  0xe4   : > { %1193 = vmatpush.bf16.msrb.mxu1 %v2067_v40  ;;  %v783_v40 = vpop.f32.mrf.mxu1 }
  0xe5   : > { %1207 = vmatpush.bf16.msrb.mxu2 %v2072_v41  ;;  %v810_v41 = vadd.f32 %v809_v37, %v796_v36 }
  0xe6   : > { %1221 = vmatpush.bf16.msrb.mxu3 %v2079_v42  ;;  %v784_v42 = vadd.f32 %v783_v40, %v769_v38 }
  0xe7   : > { %1133 = vmatpush.bf16.msrb.mxu0 %v2291_v23 }
  0xe8   : > { %1194 = vmatpush.bf16.msrb.mxu1 %v2091_v44  ;;  %v2635_v44 = vld [vmem:[#allocation3_spill] sm:$0xff] }
  0xe9   : > { %1208 = vmatpush.bf16.msrb.mxu2 %v2096_v45  ;;  %v2636_v45 = vld [vmem:[#allocation4_spill] sm:$0xff] }
  0xea   : > { %1222 = vmatpush.bf16.msrb.mxu3 %v2103_v46  ;;  %v797_v46 = vpop.f32.mrf.mxu2 }
  0xeb   : > { %1134 = vmatpush.bf16.msrb.mxu0 %v2310_v26 }
  0xec   : > { %1195 = vmatpush.bf16.msrb.mxu1 %v2115_v48  ;;  %v798_v48 = vadd.f32 %v797_v46, %v784_v42 }
  0xed   : > { %1209 = vmatpush.bf16.msrb.mxu2 %v2120_v49  ;;  %v811_v49 = vpop.f32.mrf.mxu3 }
  0xee   : > { %1223 = vmatpush.bf16.msrb.mxu3 %v2127_v50  ;;  %v2638_v50 = vld [vmem:[#allocation5_spill] sm:$0xff]  ;;  %v812_v6 = vadd.f32 %v811_v49, %v798_v48 }
  0xef   : > { %1135 = vmatpush.bf16.msrb.mxu0 %v2631_v52 }
  0xf0   : > { %1196 = vmatpush.bf16.msrb.mxu1 %v2635_v44 }
  0xf1   : > { %1210 = vmatpush.bf16.msrb.mxu2 %v2636_v45 }
  0xf2   : > { %1224 = vmatpush.bf16.msrb.mxu3 %v2152_v54  ;;  %v1730_v54 = vld [vmem:[%s2215_s5 + $0xa8] sm:$0xf] }
  0xf3   : > { %1136 = vmatpush.bf16.msrb.mxu0 %v2637_v56 }
  0xf4   : > { %1197 = vmatpush.bf16.msrb.mxu1 %v2638_v50 }
  0xf5   : > { %1211 = vmatpush.bf16.msrb.mxu2 %v2169_v57  ;;  %v1731_v57 = vor.u32 %v1838_v12, %v1730_v54 }
  0xf6   : > { %1225 = vmatpush.bf16.msrb.mxu3 %v2176_v58 }
  0xf7   : > { %1137 = vmatpush.bf16.msrb.mxu0 %v2365_v5  ;;  %v823_v58 = vpop.f32.mrf.mxu0 }
  0xf8   : > { %1198 = vmatpush.bf16.msrb.mxu1 %v2186_v60  ;;  %v837_v60 = vpop.f32.mrf.mxu1 }
  0xf9   : > { %1212 = vmatpush.bf16.msrb.mxu2 %v2191_v61 }
  0xfa   : > { %1226 = vmatpush.bf16.msrb.mxu3 %v2196_v62  ;;  %1138 = vmatmul.bf16.vlgmr.msrb.gmra.mxu0 %v1719_v13 }
  0xfb   : > { %1233 = vmatpush.bf16.msra.mxu0 %v2036_v35  ;;  %1199 = vmatmul.bf16.vlgmr.msrb.gmra.mxu1 %v1731_v57  ;;  %v824_v35 = vadd.f32 %v823_v58, %v810_v41 }
  0xfc   : > { %1247 = vmatpush.bf16.msra.mxu1 %v2208_v0  ;;  %1213 = vmatmul.bf16.vlgmr.msrb.gmra.mxu2 %v1735_v14 }
  0xfd   : > { %1261 = vmatpush.bf16.msra.mxu2 %v2213_v1  ;;  %1227 = vmatmul.bf16.vlgmr.msrb.gmra.mxu3 %v1739_v53  ;;  %v838_v61 = vadd.f32 %v837_v60, %v824_v35 }
  0xfe   : > { %1275 = vmatpush.bf16.msra.mxu3 %v2230_v10 }
  0xff   : > { %1234 = vmatpush.bf16.msra.mxu0 %v2060_v39  ;;  %v851_v39 = vpop.f32.mrf.mxu2  ;;  %v825_v62 = vpop.f32.mrf.mxu0 }
 0x100   : > { %1248 = vmatpush.bf16.msra.mxu1 %v2241_v15  ;;  %v826_v0 = vadd.f32 %v825_v62, %v812_v6  ;;  %v1836_v15 = vld [vmem:[%s2215_s5 + $0xb4] sm:$0xf] }
 0x101   : > { %1262 = vmatpush.bf16.msra.mxu2 %v2246_v16  ;;  %v1740_v16 = vld [vmem:[%s2215_s5 + $0xcc] sm:$0xf0] }
 0x102   : > { %1276 = vmatpush.bf16.msra.mxu3 %v2253_v17  ;;  %v1746_v17 = vld [vmem:[%s2215_s5 + $0xb8] sm:$0xf] }
 0x103   : > { %1235 = vmatpush.bf16.msra.mxu0 %v2084_v43  ;;  %v2557_v43 = vadd.f32 %v851_v39, %v838_v61 }
 0x104   : > { %1249 = vmatpush.bf16.msra.mxu1 %v2260_v18  ;;  %v1840_v18 = vld [vmem:[%s2215_s5 + $0xd0] sm:$0xf0] }
 0x105   : > { %1263 = vmatpush.bf16.msra.mxu2 %v2265_v19  ;;  %v1748_v19 = vld [vmem:[%s2215_s5 + $0xd4] sm:$0xf0] }
 0x106   : > { %1277 = vmatpush.bf16.msra.mxu3 %v2272_v20  ;;  %v1754_v20 = vld [vmem:[%s2215_s5 + $0xc0] sm:$0xf] }
 0x107   : > { %1236 = vmatpush.bf16.msra.mxu0 %v2108_v47  ;;  %v839_v47 = vpop.f32.mrf.mxu1 }
 0x108   : > { %1250 = vmatpush.bf16.msra.mxu1 %v2279_v21  ;;  %v840_v1 = vadd.f32 %v839_v47, %v826_v0  ;;  %v1841_v21 = vld [vmem:[%s2215_s5 + $0xd8] sm:$0xf0] }
 0x109   : > { %1264 = vmatpush.bf16.msra.mxu2 %v2284_v22  ;;  %v1743_v22 = vor.u32 %v1836_v15, %v1740_v16 }
 0x10a   : > { %1278 = vmatpush.bf16.msra.mxu3 %v2291_v23  ;;  %v1747_v23 = vor.u32 %v1840_v18, %v1746_v17 }
 0x10b   : > { %1237 = vmatpush.bf16.msra.mxu0 %v2132_v51  ;;  %v853_v51 = vpop.f32.mrf.mxu2 }
 0x10c   : > { %1251 = vmatpush.bf16.msra.mxu1 %v2298_v24  ;;  %v2567_v10 = vadd.f32 %v853_v51, %v840_v1 }
 0x10d   : > { %1265 = vmatpush.bf16.msra.mxu2 %v2303_v25  ;;  %v910_v25 = vpop.f32.mrf.mxu3 }
 0x10e   : > { %1279 = vmatpush.bf16.msra.mxu3 %v2310_v26 }
 0x10f   : > { %1238 = vmatpush.bf16.msra.mxu0 %v2157_v55  ;;  %v1837_v55 = vld [vmem:[%s2215_s5 + $0xbc] sm:$0xf]  ;;  %s1394_s5 = sshll.u32 %s1370_s15, 1 }
 0x110   : > { %1252 = vmatpush.bf16.msra.mxu1 %v2317_v27  ;;  %v1751_v24 = vor.u32 %v1837_v55, %v1748_v19  ;;  %p261_p8 = scmp.lt.s32.totalorder %s1394_s5, 3 }
 0x111   : > { %1266 = vmatpush.bf16.msra.mxu2 %v2322_v28 }
 0x112   : > { %1280 = vmatpush.bf16.msra.mxu3 %v2631_v52  ;;  %s2643_s5 = smov (!%p261_p8, %s1394_s5), 3 }
 0x113   : > { %1239 = vmatpush.bf16.msra.mxu0 %v2181_v59  ;;  %v1755_v59 = vor.u32 %v1841_v21, %v1754_v20  ;;  %s1395_s14 = sshll.u32 %s2643_s5, 2 }
 0x114   : > { %1253 = vmatpush.bf16.msra.mxu1 %v2336_v30  ;;  %s264_s11 = scalar_lea.vmem %s2614_s3, %s1395_s14 }
 0x115   : > { %1267 = vmatpush.bf16.msra.mxu2 %v2633_v31  ;;  %v912_v28 = vpop.f32.mrf.mxu3 }
 0x116   : > { %1281 = vmatpush.bf16.msra.mxu3 %v2637_v56 }
 0x117   : > { %1240 = vmatpush.bf16.msra.mxu0 %v2201_v63  ;;  %v924_v26 = vpop.f32.mrf.mxu0 }
 0x118   : > { %1254 = vmatpush.bf16.msra.mxu1 %v2353_v3  ;;  %v938_v27 = vpop.f32.mrf.mxu1  ;;  %v925_v30 = vadd.f32 %v924_v26, %v910_v25 }
 0x119   : > { %1268 = vmatpush.bf16.msra.mxu2 %v2358_v4 }
 0x11a   : > { %1282 = vmatpush.bf16.msra.mxu3 %v2365_v5  ;;  %1241 = vmatmul.bf16.vlgmr.msra.gmra.mxu0 %v1743_v22  ;;  %v939_v31 = vadd.f32 %v938_v27, %v925_v30 }
 0x11b   : > { %1255 = vmatmul.bf16.vlgmr.msra.gmra.mxu1 %v1747_v23 }
 0x11c   : > { %1269 = vmatmul.bf16.vlgmr.msra.gmra.mxu2 %v1751_v24 }
 0x11d   : > { %1283 = vmatmul.bf16.vlgmr.msra.gmra.mxu3 %v1755_v59 }
 0x11f   : > { %v952_v52 = vpop.f32.mrf.mxu2  ;;  %v926_v63 = vpop.f32.mrf.mxu0 }
 0x120   : > { %v940_v32 = vpop.f32.mrf.mxu1  ;;  %v966_v3 = vpop.f32.mrf.mxu3  ;;  %v953_v33 = vadd.f32 %v952_v52, %v939_v31  ;;  %v927_v34 = vadd.f32 %v926_v63, %v912_v28 }
 0x122   : > { %v967_v36 = vadd.f32 %v966_v3, %v953_v33  ;;  %v941_v38 = vadd.f32 %v940_v32, %v927_v34  ;;  %v1869_v3 = vld [vmem:[%s2613_s2] ss:$0 sm:$0xff] }
 0x127   : > { %v954_v4 = vpop.f32.mrf.mxu2 }
 0x128   : > { %v955_v41 = vadd.f32 %v954_v4, %v941_v38  ;;  %v968_v44 = vpop.f32.mrf.mxu3 }
 0x12a   : > { %v969_v46 = vadd.f32 %v968_v44, %v955_v41 }
 0x137   : > { %v980_v37 = vpop.f32.mrf.mxu0 }
 0x138   : > { %v994_v5 = vpop.f32.mrf.mxu1  ;;  %v981_v40 = vadd.f32 %v980_v37, %v967_v36 }
 0x13a   : > { %v995_v42 = vadd.f32 %v994_v5, %v981_v40 }
 0x13c   : > { %v999_v45 = vmax.f32 %v2557_v43, %v995_v42 }
 0x13f   : > { %v982_v48 = vpop.f32.mrf.mxu0  ;;  %v1055_v2 = vpop.f32.mrf.mxu2 }
 0x140   : > { %v996_v49 = vpop.f32.mrf.mxu1  ;;  %v983_v56 = vadd.f32 %v982_v48, %v969_v46  ;;  %v1069_v6 = vpop.f32.mrf.mxu3 }
 0x141   : > { %v1070_v60 = vadd.f32 %v1069_v6, %v1055_v2 }
 0x142   : > { %v2586_v50 = vadd.f32 %v996_v49, %v983_v56 }
 0x144   : > { %v1000_v29 = vmax.f32 %v2567_v10, %v2586_v50 }
 0x147   : > { %v1057_v7 = vpop.f32.mrf.mxu2 }
 0x148   : > { %v1071_v8 = vpop.f32.mrf.mxu3 }
 0x149   : > { %v1072_v16 = vadd.f32 %v1071_v8, %v1057_v7 }
 0x157   : > { %v1083_v9 = vpop.f32.mrf.mxu0 }
 0x158   : > { %v1097_v11 = vpop.f32.mrf.mxu1  ;;  %v1084_v43 = vadd.f32 %v1083_v9, %v1070_v60 }
 0x15a   : > { %v1098_v47 = vadd.f32 %v1097_v11, %v1084_v43 }
 0x15f   : > { %v1111_v54 = vpop.f32.mrf.mxu2  ;;  %v1085_v13 = vpop.f32.mrf.mxu0 }
 0x160   : > { %v1125_v12 = vpop.f32.mrf.mxu3  ;;  %v1099_v14 = vpop.f32.mrf.mxu1  ;;  %v1112_v17 = vadd.f32 %v1111_v54, %v1098_v47  ;;  %v1086_v19 = vadd.f32 %v1085_v13, %v1072_v16 }
 0x162   : > { %v1126_v22 = vadd.f32 %v1125_v12, %v1112_v17  ;;  %v1100_v24 = vadd.f32 %v1099_v14, %v1086_v19 }
 0x167   : > { %v1113_v53 = vpop.f32.mrf.mxu2 }
 0x168   : > { %v1127_v57 = vpop.f32.mrf.mxu3  ;;  %v1114_v28 = vadd.f32 %v1113_v53, %v1100_v24 }
 0x16a   : > { %v1128_v34 = vadd.f32 %v1127_v57, %v1114_v28 }
 0x177   : > { %v1139_v58 = vpop.f32.mrf.mxu0 }
 0x178   : > { %v1200_v35 = vpop.f32.mrf.mxu1  ;;  %v1140_v59 = vadd.f32 %v1139_v58, %v1126_v22 }
 0x17a   : > { %v1144_v63 = vmax.f32 %v999_v45, %v1140_v59 }
 0x17f   : > { %v1214_v61 = vpop.f32.mrf.mxu2  ;;  %v1141_v62 = vpop.f32.mrf.mxu0 }
 0x180   : > { %v1228_v39 = vpop.f32.mrf.mxu3  ;;  %v1202_v0 = vpop.f32.mrf.mxu1  ;;  %v1215_v1 = vadd.f32 %v1214_v61, %v1200_v35  ;;  %v1142_v37 = vadd.f32 %v1141_v62, %v1128_v34 }
 0x182   : > { %v1229_v18 = vadd.f32 %v1228_v39, %v1215_v1  ;;  %v1145_v45 = vmax.f32 %v1000_v29, %v1142_v37 }
 0x187   : > { %v1216_v51 = vpop.f32.mrf.mxu2 }
 0x188   : > { %v1230_v15 = vpop.f32.mrf.mxu3  ;;  %v1217_v23 = vadd.f32 %v1216_v51, %v1202_v0 }
 0x18a   : > { %v1231_v30 = vadd.f32 %v1230_v15, %v1217_v23 }
 0x197   : > { %v1242_v55 = vpop.f32.mrf.mxu0 }
 0x198   : > { %v1243_v20 = vadd.f32 %v1242_v55, %v1229_v18  ;;  %v1256_v21 = vpop.f32.mrf.mxu1 }
 0x19a   : > { %v1257_v25 = vadd.f32 %v1256_v21, %v1243_v20 }
 0x19f   : > { %v1270_v26 = vpop.f32.mrf.mxu2  ;;  %v1244_v31 = vpop.f32.mrf.mxu0 }
 0x1a0   : > { %v1284_v27 = vpop.f32.mrf.mxu3  ;;  %v1271_v52 = vadd.f32 %v1270_v26, %v1257_v25  ;;  %v1245_v33 = vadd.f32 %v1244_v31, %v1231_v30  ;;  %v1258_v4 = vpop.f32.mrf.mxu1 }
 0x1a2   : > { %v1285_v32 = vadd.f32 %v1284_v27, %v1271_v52  ;;  %v1259_v38 = vadd.f32 %v1258_v4, %v1245_v33 }
 0x1a4   : > { %v1289_v36 = vmax.f32 %v1144_v63, %v1285_v32 }
 0x1a6   : > { %v1295_v5 = vadd.f32 %v1869_v3, %v1289_v36 }
 0x1a7   : > { %v1272_v40 = vpop.f32.mrf.mxu2 }
 0x1a8   : > { %v1297_v41 = vmax.f32 %v1295_v5, 0.0  ;;  %v1273_v42 = vadd.f32 %v1272_v40, %v1259_v38  ;;  %v1286_v44 = vpop.f32.mrf.mxu3 }
 0x1aa   : > { %v1299_v46 = vpack.c.bf16 %v1297_v41, %v1297_v41  ;;  %v1287_v48 = vadd.f32 %v1286_v44, %v1273_v42 }
 0x1ac   : > { %1302 = vst.msk [vmem:[%s264_s11] sm:$0xf] %vm1301_vm0, %v1299_v46  ;;  %v1290_v49 = vmax.f32 %v1145_v45, %v1287_v48 }
 0x1ae   : > { %v1296_v56 = vadd.f32 %v1869_v3, %v1290_v49 }
 0x1b0   : > { %v1298_v2 = vmax.f32 %v1296_v56, 0.0 }
 0x1b2   : > { %v1300_v6 = vpack.c.bf16 %v1298_v2, %v1298_v2 }
 0x1b4   : > { %1303 = vst.msk [vmem:[%s264_s11 + $0x4] sm:$0xf] %vm1301_vm0, %v1300_v6 }
 0x1b5 PF: > { %p10_p9 = scmp.ge.s32.totalorder %s1931_s16, 4   ;;  %s2639_s12 = smov %s1888_s13 }
 0x1b6   : > { %s2640_s13 = smov %s1940_s19  ;;  %s2641_s14 = smov %s1931_s16 }
 0x1b7   :  { %12 = sbr.rel (!%p10_p9) target bundleno = 2 (0x2), region = 102 }

// kernel: net_forward.5
= control target key start
LH: loop header
LB: loop body
LE: loop exit
PB: predicated region body
PF: predicated region fallthrough
CT: control target
= control target key end

     0   :  { %s5564_s0 = inlined_call_operand.vmem [shape: bf16[2,1024], index: 0, kind: input, shape index: {}]   ;;  %s5565_s1 = inlined_call_operand.vmem [shape: bf16[1024,512], index: 1, kind: input, shape index: {}]   ;;  %s5566_s2 = inlined_call_operand.vmem [shape: f32[1,512], index: 2, kind: input, shape index: {}]   ;;  %s5567_s3 = inlined_call_operand.vmem [shape: bf16[512,10], index: 3, kind: input, shape index: {}]   ;;  %s5568_s4 = inlined_call_operand.vmem [shape: f32[1,10], index: 4, kind: input, shape index: {}]   ;;  %s5569_s5 = inlined_call_operand.hbm [shape: f32[2,10], index: 5, kind: output, shape index: {}]  }
   0x1   :  { %v2454_v0 = vld [vmem:[%s5565_s1 + $0xe0] sm:$0xf]  ;;  %v3522_v1 = vld [vmem:[%s5565_s1 + $0xec] sm:$0xf0] }
   0x2   :  { %v2582_v2 = vld [vmem:[%s5565_s1 + $0x1e0] sm:$0xf]  ;;  %v2455_v3 = vor.u32 %v3522_v1, %v2454_v0  ;;  %v3554_v4 = vld [vmem:[%s5565_s1 + $0x1ec] sm:$0xf0] }
   0x3   :  { %v2710_v5 = vld [vmem:[%s5565_s1 + $0x2e0] sm:$0xf]  ;;  %v3586_v6 = vld [vmem:[%s5565_s1 + $0x2ec] sm:$0xf0]  ;;  %v2583_v7 = vor.u32 %v3554_v4, %v2582_v2 }
   0x4   :  { %v2711_v8 = vor.u32 %v3586_v6, %v2710_v5  ;;  %v2838_v9 = vld [vmem:[%s5565_s1 + $0x3e0] sm:$0xf]  ;;  %v3618_v10 = vld [vmem:[%s5565_s1 + $0x3ec] sm:$0xf0]  ;;  %1586 = vmatpush.bf16.msra.mxu0 %v2455_v3 }
   0x5   :  { %v2438_v11 = vld [vmem:[%s5565_s1 + $0xc0] sm:$0xf]  ;;  %v2839_v12 = vor.u32 %v3618_v10, %v2838_v9  ;;  %v3518_v13 = vld [vmem:[%s5565_s1 + $0xcc] sm:$0xf0]  ;;  %1599 = vmatpush.bf16.msra.mxu1 %v2583_v7 }
   0x6   :  { %v2566_v14 = vld [vmem:[%s5565_s1 + $0x1c0] sm:$0xf]  ;;  %v3550_v15 = vld [vmem:[%s5565_s1 + $0x1cc] sm:$0xf0]  ;;  %1612 = vmatpush.bf16.msra.mxu2 %v2711_v8  ;;  %v2439_v16 = vor.u32 %v3518_v13, %v2438_v11 }
   0x7   :  { %v2567_v17 = vor.u32 %v3550_v15, %v2566_v14  ;;  %v2694_v18 = vld [vmem:[%s5565_s1 + $0x2c0] sm:$0xf]  ;;  %v3582_v19 = vld [vmem:[%s5565_s1 + $0x2cc] sm:$0xf0]  ;;  %1625 = vmatpush.bf16.msra.mxu3 %v2839_v12 }
   0x8   :  { %v2822_v20 = vld [vmem:[%s5565_s1 + $0x3c0] sm:$0xf]  ;;  %v2695_v21 = vor.u32 %v3582_v19, %v2694_v18  ;;  %v3614_v22 = vld [vmem:[%s5565_s1 + $0x3cc] sm:$0xf0]  ;;  %1587 = vmatpush.bf16.msra.mxu0 %v2439_v16 }
   0x9   :  { %v2422_v23 = vld [vmem:[%s5565_s1 + $0xa0] sm:$0xf]  ;;  %v3514_v24 = vld [vmem:[%s5565_s1 + $0xac] sm:$0xf0]  ;;  %v2823_v25 = vor.u32 %v3614_v22, %v2822_v20  ;;  %1600 = vmatpush.bf16.msra.mxu1 %v2567_v17 }
   0xa   :  { %v2550_v26 = vld [vmem:[%s5565_s1 + $0x1a0] sm:$0xf]  ;;  %v3546_v27 = vld [vmem:[%s5565_s1 + $0x1ac] sm:$0xf0]  ;;  %v2423_v29 = vor.u32 %v3514_v24, %v2422_v23  ;;  %1613 = vmatpush.bf16.msra.mxu2 %v2695_v21 }
   0xb   :  { %v2678_v28 = vld [vmem:[%s5565_s1 + $0x2a0] sm:$0xf]  ;;  %v3578_v30 = vld [vmem:[%s5565_s1 + $0x2ac] sm:$0xf0]  ;;  %v2551_v33 = vor.u32 %v3546_v27, %v2550_v26  ;;  %1626 = vmatpush.bf16.msra.mxu3 %v2823_v25 }
   0xc   :  { %v2806_v31 = vld [vmem:[%s5565_s1 + $0x3a0] sm:$0xf]  ;;  %v3610_v32 = vld [vmem:[%s5565_s1 + $0x3ac] sm:$0xf0]  ;;  %v2679_v34 = vor.u32 %v3578_v30, %v2678_v28  ;;  %1588 = vmatpush.bf16.msra.mxu0 %v2423_v29 }
   0xd   :  { %v2406_v35 = vld [vmem:[%s5565_s1 + $0x80] sm:$0xf]  ;;  %v3510_v36 = vld [vmem:[%s5565_s1 + $0x8c] sm:$0xf0]  ;;  %v2807_v38 = vor.u32 %v3610_v32, %v2806_v31  ;;  %1601 = vmatpush.bf16.msra.mxu1 %v2551_v33 }
   0xe   :  { %v2534_v37 = vld [vmem:[%s5565_s1 + $0x180] sm:$0xf]  ;;  %v3542_v39 = vld [vmem:[%s5565_s1 + $0x18c] sm:$0xf0]  ;;  %v2407_v44 = vor.u32 %v3510_v36, %v2406_v35  ;;  %1614 = vmatpush.bf16.msra.mxu2 %v2679_v34 }
   0xf   :  { %v2662_v40 = vld [vmem:[%s5565_s1 + $0x280] sm:$0xf]  ;;  %v3574_v41 = vld [vmem:[%s5565_s1 + $0x28c] sm:$0xf0]  ;;  %v2535_v45 = vor.u32 %v3542_v39, %v2534_v37  ;;  %1627 = vmatpush.bf16.msra.mxu3 %v2807_v38 }
  0x10   :  { %v2790_v42 = vld [vmem:[%s5565_s1 + $0x380] sm:$0xf]  ;;  %v3606_v43 = vld [vmem:[%s5565_s1 + $0x38c] sm:$0xf0]  ;;  %v2663_v46 = vor.u32 %v3574_v41, %v2662_v40  ;;  %1589 = vmatpush.bf16.msra.mxu0 %v2407_v44 }
  0x11   :  { %v2390_v47 = vld [vmem:[%s5565_s1 + $0x60] sm:$0xf]  ;;  %v3506_v48 = vld [vmem:[%s5565_s1 + $0x6c] sm:$0xf0]  ;;  %v2791_v50 = vor.u32 %v3606_v43, %v2790_v42  ;;  %1602 = vmatpush.bf16.msra.mxu1 %v2535_v45 }
  0x12   :  { %v2518_v49 = vld [vmem:[%s5565_s1 + $0x160] sm:$0xf]  ;;  %v3538_v51 = vld [vmem:[%s5565_s1 + $0x16c] sm:$0xf0]  ;;  %v2391_v56 = vor.u32 %v3506_v48, %v2390_v47  ;;  %1615 = vmatpush.bf16.msra.mxu2 %v2663_v46 }
  0x13   :  { %v2646_v52 = vld [vmem:[%s5565_s1 + $0x260] sm:$0xf]  ;;  %v3570_v53 = vld [vmem:[%s5565_s1 + $0x26c] sm:$0xf0]  ;;  %v2519_v57 = vor.u32 %v3538_v51, %v2518_v49  ;;  %1628 = vmatpush.bf16.msra.mxu3 %v2791_v50 }
  0x14   :  { %v2774_v54 = vld [vmem:[%s5565_s1 + $0x360] sm:$0xf]  ;;  %v3602_v55 = vld [vmem:[%s5565_s1 + $0x36c] sm:$0xf0]  ;;  %v2647_v58 = vor.u32 %v3570_v53, %v2646_v52  ;;  %1590 = vmatpush.bf16.msra.mxu0 %v2391_v56 }
  0x15   :  { %v2374_v59 = vld [vmem:[%s5565_s1 + $0x40] sm:$0xf]  ;;  %v3502_v60 = vld [vmem:[%s5565_s1 + $0x4c] sm:$0xf0]  ;;  %v2775_v62 = vor.u32 %v3602_v55, %v2774_v54  ;;  %1603 = vmatpush.bf16.msra.mxu1 %v2519_v57 }
  0x16   :  { %v2502_v61 = vld [vmem:[%s5565_s1 + $0x140] sm:$0xf]  ;;  %v3534_v63 = vld [vmem:[%s5565_s1 + $0x14c] sm:$0xf0]  ;;  %v2375_v4 = vor.u32 %v3502_v60, %v2374_v59  ;;  %1616 = vmatpush.bf16.msra.mxu2 %v2647_v58 }
  0x17   :  { %v2630_v0 = vld [vmem:[%s5565_s1 + $0x240] sm:$0xf]  ;;  %v3566_v1 = vld [vmem:[%s5565_s1 + $0x24c] sm:$0xf0]  ;;  %v2503_v5 = vor.u32 %v3534_v63, %v2502_v61  ;;  %1629 = vmatpush.bf16.msra.mxu3 %v2775_v62 }
  0x18   :  { %v2758_v2 = vld [vmem:[%s5565_s1 + $0x340] sm:$0xf]  ;;  %v3598_v3 = vld [vmem:[%s5565_s1 + $0x34c] sm:$0xf0]  ;;  %v2631_v6 = vor.u32 %v3566_v1, %v2630_v0  ;;  %1591 = vmatpush.bf16.msra.mxu0 %v2375_v4 }
  0x19   :  { %v2358_v7 = vld [vmem:[%s5565_s1 + $0x20] sm:$0xf]  ;;  %v3498_v8 = vld [vmem:[%s5565_s1 + $0x2c] sm:$0xf0]  ;;  %v2759_v10 = vor.u32 %v3598_v3, %v2758_v2  ;;  %1604 = vmatpush.bf16.msra.mxu1 %v2503_v5 }
  0x1a   :  { %v2486_v9 = vld [vmem:[%s5565_s1 + $0x120] sm:$0xf]  ;;  %v3530_v11 = vld [vmem:[%s5565_s1 + $0x12c] sm:$0xf0]  ;;  %v2359_v16 = vor.u32 %v3498_v8, %v2358_v7  ;;  %1617 = vmatpush.bf16.msra.mxu2 %v2631_v6 }
  0x1b   :  { %v2614_v12 = vld [vmem:[%s5565_s1 + $0x220] sm:$0xf]  ;;  %v3562_v13 = vld [vmem:[%s5565_s1 + $0x22c] sm:$0xf0]  ;;  %v2487_v19 = vor.u32 %v3530_v11, %v2486_v9  ;;  %1630 = vmatpush.bf16.msra.mxu3 %v2759_v10 }
  0x1c   :  { %v2742_v14 = vld [vmem:[%s5565_s1 + $0x320] sm:$0xf]  ;;  %v3594_v15 = vld [vmem:[%s5565_s1 + $0x32c] sm:$0xf0]  ;;  %v2615_v20 = vor.u32 %v3562_v13, %v2614_v12  ;;  %1592 = vmatpush.bf16.msra.mxu0 %v2359_v16 }
  0x1d   :  { %v2342_v17 = vld [vmem:[%s5565_s1] sm:$0xf]  ;;  %v3494_v18 = vld [vmem:[%s5565_s1 + $0xc] sm:$0xf0]  ;;  %v2743_v24 = vor.u32 %v3594_v15, %v2742_v14  ;;  %1605 = vmatpush.bf16.msra.mxu1 %v2487_v19 }
  0x1e   :  { %v2470_v21 = vld [vmem:[%s5565_s1 + $0x100] sm:$0xf]  ;;  %v3526_v22 = vld [vmem:[%s5565_s1 + $0x10c] sm:$0xf0]  ;;  %v2343_v31 = vor.u32 %v3494_v18, %v2342_v17  ;;  %1618 = vmatpush.bf16.msra.mxu2 %v2615_v20 }
  0x1f   :  { %v2598_v23 = vld [vmem:[%s5565_s1 + $0x200] sm:$0xf]  ;;  %v3558_v25 = vld [vmem:[%s5565_s1 + $0x20c] sm:$0xf0]  ;;  %v2471_v35 = vor.u32 %v3526_v22, %v2470_v21  ;;  %1631 = vmatpush.bf16.msra.mxu3 %v2743_v24 }
  0x20   :  { %v2726_v26 = vld [vmem:[%s5565_s1 + $0x300] sm:$0xf]  ;;  %v3590_v27 = vld [vmem:[%s5565_s1 + $0x30c] sm:$0xf0]  ;;  %v2599_v36 = vor.u32 %v3558_v25, %v2598_v23  ;;  %1593 = vmatpush.bf16.msra.mxu0 %v2343_v31 }
  0x21   :  { %v2966_v28 = vld [vmem:[%s5565_s1 + $0x4e0] sm:$0xf]  ;;  %v3650_v29 = vld [vmem:[%s5565_s1 + $0x4ec] sm:$0xf0]  ;;  %v2727_v39 = vor.u32 %v3590_v27, %v2726_v26  ;;  %1606 = vmatpush.bf16.msra.mxu1 %v2471_v35 }
  0x22   :  { %v3094_v30 = vld [vmem:[%s5565_s1 + $0x5e0] sm:$0xf]  ;;  %v3682_v32 = vld [vmem:[%s5565_s1 + $0x5ec] sm:$0xf0]  ;;  %v2967_v40 = vor.u32 %v3650_v29, %v2966_v28  ;;  %1619 = vmatpush.bf16.msra.mxu2 %v2599_v36 }
  0x23   :  { %v3222_v33 = vld [vmem:[%s5565_s1 + $0x6e0] sm:$0xf]  ;;  %v3714_v34 = vld [vmem:[%s5565_s1 + $0x6ec] sm:$0xf0]  ;;  %v3095_v41 = vor.u32 %v3682_v32, %v3094_v30  ;;  %1632 = vmatpush.bf16.msra.mxu3 %v2727_v39 }
  0x24   :  { %v3350_v37 = vld [vmem:[%s5565_s1 + $0x7e0] sm:$0xf]  ;;  %v3746_v38 = vld [vmem:[%s5565_s1 + $0x7ec] sm:$0xf0]  ;;  %v3223_v42 = vor.u32 %v3714_v34, %v3222_v33  ;;  %1638 = vmatpush.bf16.msrb.mxu0 %v2967_v40 }
  0x25   :  { %v2950_v43 = vld [vmem:[%s5565_s1 + $0x4c0] sm:$0xf]  ;;  %v3646_v44 = vld [vmem:[%s5565_s1 + $0x4cc] sm:$0xf0]  ;;  %v3351_v46 = vor.u32 %v3746_v38, %v3350_v37  ;;  %1651 = vmatpush.bf16.msrb.mxu1 %v3095_v41 }
  0x26   :  { %v3078_v45 = vld [vmem:[%s5565_s1 + $0x5c0] sm:$0xf]  ;;  %v3678_v47 = vld [vmem:[%s5565_s1 + $0x5cc] sm:$0xf0]  ;;  %v2951_v52 = vor.u32 %v3646_v44, %v2950_v43  ;;  %1664 = vmatpush.bf16.msrb.mxu2 %v3223_v42 }
  0x27   :  { %v3206_v48 = vld [vmem:[%s5565_s1 + $0x6c0] sm:$0xf]  ;;  %v3710_v49 = vld [vmem:[%s5565_s1 + $0x6cc] sm:$0xf0]  ;;  %v3079_v53 = vor.u32 %v3678_v47, %v3078_v45  ;;  %1677 = vmatpush.bf16.msrb.mxu3 %v3351_v46 }
  0x28   :  { %v3334_v50 = vld [vmem:[%s5565_s1 + $0x7c0] sm:$0xf]  ;;  %v3742_v51 = vld [vmem:[%s5565_s1 + $0x7cc] sm:$0xf0]  ;;  %v3207_v54 = vor.u32 %v3710_v49, %v3206_v48  ;;  %1639 = vmatpush.bf16.msrb.mxu0 %v2951_v52 }
  0x29   :  { %v2934_v55 = vld [vmem:[%s5565_s1 + $0x4a0] sm:$0xf]  ;;  %v3642_v56 = vld [vmem:[%s5565_s1 + $0x4ac] sm:$0xf0]  ;;  %v3335_v58 = vor.u32 %v3742_v51, %v3334_v50  ;;  %1652 = vmatpush.bf16.msrb.mxu1 %v3079_v53 }
  0x2a   :  { %v3062_v57 = vld [vmem:[%s5565_s1 + $0x5a0] sm:$0xf]  ;;  %v3674_v59 = vld [vmem:[%s5565_s1 + $0x5ac] sm:$0xf0]  ;;  %v2935_v0 = vor.u32 %v3642_v56, %v2934_v55  ;;  %1665 = vmatpush.bf16.msrb.mxu2 %v3207_v54 }
  0x2b   :  { %v3190_v60 = vld [vmem:[%s5565_s1 + $0x6a0] sm:$0xf]  ;;  %v3706_v61 = vld [vmem:[%s5565_s1 + $0x6ac] sm:$0xf0]  ;;  %v3063_v3 = vor.u32 %v3674_v59, %v3062_v57  ;;  %1678 = vmatpush.bf16.msrb.mxu3 %v3335_v58 }
  0x2c   :  { %v3318_v62 = vld [vmem:[%s5565_s1 + $0x7a0] sm:$0xf]  ;;  %v3738_v63 = vld [vmem:[%s5565_s1 + $0x7ac] sm:$0xf0]  ;;  %v3191_v4 = vor.u32 %v3706_v61, %v3190_v60  ;;  %1640 = vmatpush.bf16.msrb.mxu0 %v2935_v0 }
  0x2d   :  { %v2918_v1 = vld [vmem:[%s5565_s1 + $0x480] sm:$0xf]  ;;  %v3638_v5 = vld [vmem:[%s5565_s1 + $0x48c] sm:$0xf0]  ;;  %v3319_v7 = vor.u32 %v3738_v63, %v3318_v62  ;;  %1653 = vmatpush.bf16.msrb.mxu1 %v3063_v3  ;;  %v3552_v3 = vld [vmem:[%s5565_s1 + $0x1e4] sm:$0xf] }
  0x2e   :  { %v21_v2 = vld [vmem:[%s5564_s0] sm:$0xff]  ;;  %v3670_v8 = vld [vmem:[%s5565_s1 + $0x58c] sm:$0xf0]  ;;  %v2919_v13 = vor.u32 %v3638_v5, %v2918_v1  ;;  %1666 = vmatpush.bf16.msrb.mxu2 %v3191_v4  ;;  %v2584_v5 = vld [vmem:[%s5565_s1 + $0x1f0] sm:$0xf0] }
  0x2f   :  { %v3046_v6 = vld [vmem:[%s5565_s1 + $0x580] sm:$0xf]  ;;  %289 = vst [vmem:[#allocation1] ss:$9 sm:$0xff] %v21_v2  ;;  %v3702_v10 = vld [vmem:[%s5565_s1 + $0x68c] sm:$0xf0]  ;;  %1679 = vmatpush.bf16.msrb.mxu3 %v3319_v7 }
  0x30   :  { %v3174_v9 = vld [vmem:[%s5565_s1 + $0x680] sm:$0xf]  ;;  %v3734_v12 = vld [vmem:[%s5565_s1 + $0x78c] sm:$0xf0]  ;;  %v3047_v14 = vor.u32 %v3670_v8, %v3046_v6  ;;  %1641 = vmatpush.bf16.msrb.mxu0 %v2919_v13  ;;  %v3520_v1 = vld [vmem:[%s5565_s1 + $0xe4] sm:$0xf] }
  0x31   :  { %v3302_v11 = vld [vmem:[%s5565_s1 + $0x780] sm:$0xf]  ;;  %v3175_v15 = vor.u32 %v3702_v10, %v3174_v9  ;;  %v3634_v17 = vld [vmem:[%s5565_s1 + $0x46c] sm:$0xf0]  ;;  %v2456_v2 = vld [vmem:[%s5565_s1 + $0xf0] sm:$0xf0] }
  0x32   :  { %v2902_v16 = vld [vmem:[%s5565_s1 + $0x460] sm:$0xf]  ;;  %v3303_v19 = vor.u32 %v3734_v12, %v3302_v11  ;;  %v3666_v20 = vld [vmem:[%s5565_s1 + $0x56c] sm:$0xf0]  ;;  %1654 = vmatpush.bf16.msrb.mxu1 %v3047_v14  ;;  %v3584_v6 = vld [vmem:[%s5565_s1 + $0x2e4] sm:$0xf]  ;;  %v2459_v13 = vor.u32 %v3520_v1, %v2456_v2  ;;  %v2587_v14 = vor.u32 %v3552_v3, %v2584_v5 }
  0x33   :  { %v3030_v18 = vld [vmem:[%s5565_s1 + $0x560] sm:$0xf]  ;;  %v3698_v22 = vld [vmem:[%s5565_s1 + $0x66c] sm:$0xf0]  ;;  %v2903_v26 = vor.u32 %v3634_v17, %v2902_v16  ;;  %1667 = vmatpush.bf16.msrb.mxu2 %v3175_v15  ;;  %v2712_v7 = vld [vmem:[%s5565_s1 + $0x2f0] sm:$0xf0] }
  0x34   :  { %v3158_v21 = vld [vmem:[%s5565_s1 + $0x660] sm:$0xf]  ;;  %v3730_v24 = vld [vmem:[%s5565_s1 + $0x76c] sm:$0xf0]  ;;  %v3031_v30 = vor.u32 %v3666_v20, %v3030_v18  ;;  %1680 = vmatpush.bf16.msrb.mxu3 %v3303_v19  ;;  %v3616_v10 = vld [vmem:[%s5565_s1 + $0x3e4] sm:$0xf]  ;;  %v2715_v15 = vor.u32 %v3584_v6, %v2712_v7 }
  0x35   :  { %v3286_v23 = vld [vmem:[%s5565_s1 + $0x760] sm:$0xf]  ;;  %v3159_v31 = vor.u32 %v3698_v22, %v3158_v21  ;;  %v3630_v32 = vld [vmem:[%s5565_s1 + $0x44c] sm:$0xf0]  ;;  %1642 = vmatpush.bf16.msrb.mxu0 %v2903_v26  ;;  %v2840_v11 = vld [vmem:[%s5565_s1 + $0x3f0] sm:$0xf0] }
  0x36   :  { %v2886_v25 = vld [vmem:[%s5565_s1 + $0x440] sm:$0xf]  ;;  %v4165_v27 = vld [vmem:[#allocation1 + $0x12] sm:$0xff]  ;;  %v4177_v34 = vld [vmem:[#allocation1 + $0x9] sm:$0xff]  ;;  %v3287_v35 = vor.u32 %v3730_v24, %v3286_v23  ;;  %1655 = vmatpush.bf16.msrb.mxu1 %v3031_v30  ;;  %v2843_v19 = vor.u32 %v3616_v10, %v2840_v11 }
  0x37   :  { %v4167_v28 = vld [vmem:[#allocation1] sm:$0xff]  ;;  %v3662_v36 = vld [vmem:[%s5565_s1 + $0x54c] sm:$0xf0]  ;;  %1620 = vmatmul.bf16.vlgmr.msra.gmra.mxu2 %v4165_v27  ;;  %v2887_v41 = vor.u32 %v3630_v32, %v2886_v25  ;;  %1607 = vmatmul.bf16.vlgmr.msra.gmra.mxu1 %v4177_v34  ;;  %v2440_v17 = vld [vmem:[%s5565_s1 + $0xd0] sm:$0xf0] }
  0x38   :  { %v4169_v29 = vld [vmem:[#allocation1 + $0x1b] sm:$0xff]  ;;  %v3694_v38 = vld [vmem:[%s5565_s1 + $0x64c] sm:$0xf0]  ;;  %1594 = vmatmul.bf16.vlgmr.msra.gmra.mxu0 %v4167_v28  ;;  %1668 = vmatpush.bf16.msrb.mxu2 %v3159_v31  ;;  %v3516_v16 = vld [vmem:[%s5565_s1 + $0xc4] sm:$0xf] }
  0x39   :  { %v3014_v33 = vld [vmem:[%s5565_s1 + $0x540] sm:$0xf]  ;;  %v3726_v40 = vld [vmem:[%s5565_s1 + $0x74c] sm:$0xf0]  ;;  %1633 = vmatmul.bf16.vlgmr.msra.gmra.mxu3 %v4169_v29  ;;  %1643 = vmatpush.bf16.msrb.mxu0 %v2887_v41  ;;  %v3548_v18 = vld [vmem:[%s5565_s1 + $0x1c4] sm:$0xf]  ;;  %v2443_v26 = vor.u32 %v3516_v16, %v2440_v17 }
  0x3a   :  { %v3142_v37 = vld [vmem:[%s5565_s1 + $0x640] sm:$0xf]  ;;  %v3015_v42 = vor.u32 %v3662_v36, %v3014_v33  ;;  %v3626_v45 = vld [vmem:[%s5565_s1 + $0x42c] sm:$0xf0]  ;;  %1681 = vmatpush.bf16.msrb.mxu3 %v3287_v35  ;;  %v2568_v20 = vld [vmem:[%s5565_s1 + $0x1d0] sm:$0xf0] }
  0x3b   :  { %v3270_v39 = vld [vmem:[%s5565_s1 + $0x740] sm:$0xf]  ;;  %v3143_v43 = vor.u32 %v3694_v38, %v3142_v37  ;;  %v3658_v48 = vld [vmem:[%s5565_s1 + $0x52c] sm:$0xf0]  ;;  %v3580_v21 = vld [vmem:[%s5565_s1 + $0x2c4] sm:$0xf]  ;;  %v2571_v33 = vor.u32 %v3548_v18, %v2568_v20 }
  0x3c   :  { %v2870_v44 = vld [vmem:[%s5565_s1 + $0x420] sm:$0xf]  ;;  %v3271_v47 = vor.u32 %v3726_v40, %v3270_v39  ;;  %v3690_v50 = vld [vmem:[%s5565_s1 + $0x62c] sm:$0xf0]  ;;  %1656 = vmatpush.bf16.msrb.mxu1 %v3015_v42  ;;  %v2696_v22 = vld [vmem:[%s5565_s1 + $0x2d0] sm:$0xf0] }
  0x3d   :  { %v2998_v46 = vld [vmem:[%s5565_s1 + $0x520] sm:$0xf]  ;;  %v3722_v52 = vld [vmem:[%s5565_s1 + $0x72c] sm:$0xf0]  ;;  %v2871_v53 = vor.u32 %v3626_v45, %v2870_v44  ;;  %1669 = vmatpush.bf16.msrb.mxu2 %v3143_v43  ;;  %v3612_v23 = vld [vmem:[%s5565_s1 + $0x3c4] sm:$0xf]  ;;  %v2699_v35 = vor.u32 %v3580_v21, %v2696_v22 }
  0x3e   :  { %v3126_v49 = vld [vmem:[%s5565_s1 + $0x620] sm:$0xf]  ;;  %v3622_v55 = vld [vmem:[%s5565_s1 + $0x40c] sm:$0xf0]  ;;  %v2999_v56 = vor.u32 %v3658_v48, %v2998_v46  ;;  %1682 = vmatpush.bf16.msrb.mxu3 %v3271_v47  ;;  %v2824_v24 = vld [vmem:[%s5565_s1 + $0x3d0] sm:$0xf0] }
  0x3f   :  { %v3254_v51 = vld [vmem:[%s5565_s1 + $0x720] sm:$0xf]  ;;  %v3127_v57 = vor.u32 %v3690_v50, %v3126_v49  ;;  %v3654_v59 = vld [vmem:[%s5565_s1 + $0x50c] sm:$0xf0]  ;;  %1644 = vmatpush.bf16.msrb.mxu0 %v2871_v53  ;;  %v4294_v25 = vld [vmem:[#allocation1 + $0x36] sm:$0xff]  ;;  %v2827_v39 = vor.u32 %v3612_v23, %v2824_v24 }
  0x40   :  { %v2854_v54 = vld [vmem:[%s5565_s1 + $0x400] sm:$0xf]  ;;  %v3255_v61 = vor.u32 %v3722_v52, %v3254_v51  ;;  %v3686_v62 = vld [vmem:[%s5565_s1 + $0x60c] sm:$0xf0]  ;;  %1657 = vmatpush.bf16.msrb.mxu1 %v2999_v56  ;;  %v3512_v30 = vld [vmem:[%s5565_s1 + $0xa4] sm:$0xf] }
  0x41   :  { %v2982_v58 = vld [vmem:[%s5565_s1 + $0x500] sm:$0xf]  ;;  %v3718_v0 = vld [vmem:[%s5565_s1 + $0x70c] sm:$0xf0]  ;;  %v2855_v4 = vor.u32 %v3622_v55, %v2854_v54  ;;  %1670 = vmatpush.bf16.msrb.mxu2 %v3127_v57  ;;  %v4299_v31 = vld [vmem:[#allocation1 + $0x24] sm:$0xff] }
  0x42   :  { %v3110_v60 = vld [vmem:[%s5565_s1 + $0x600] sm:$0xf]  ;;  %v2983_v8 = vor.u32 %v3654_v59, %v2982_v58  ;;  %1683 = vmatpush.bf16.msrb.mxu3 %v3255_v61  ;;  %v2424_v36 = vld [vmem:[%s5565_s1 + $0xb0] sm:$0xf0]  ;;  %v3544_v37 = vld [vmem:[%s5565_s1 + $0x1a4] sm:$0xf] }
  0x43   :  { %v3238_v63 = vld [vmem:[%s5565_s1 + $0x700] sm:$0xf]  ;;  %v3111_v9 = vor.u32 %v3686_v62, %v3110_v60  ;;  %1645 = vmatpush.bf16.msrb.mxu0 %v2855_v4  ;;  %v4309_v38 = vld [vmem:[#allocation1 + $0x2d] sm:$0xff]  ;;  %v3576_v41 = vld [vmem:[%s5565_s1 + $0x2a4] sm:$0xf]  ;;  %v2427_v45 = vor.u32 %v3512_v30, %v2424_v36 }
  0x44   :  { %v3239_v12 = vor.u32 %v3718_v0, %v3238_v63  ;;  %1658 = vmatpush.bf16.msrb.mxu1 %v2983_v8  ;;  %v4301_v32 = vld [vmem:[#allocation1 + $0x3f] sm:$0xff]  ;;  %v2552_v40 = vld [vmem:[%s5565_s1 + $0x1b0] sm:$0xf0] }
  0x45   :  { %1671 = vmatpush.bf16.msrb.mxu2 %v3111_v9  ;;  %v2680_v42 = vld [vmem:[%s5565_s1 + $0x2b0] sm:$0xf0]  ;;  %v3608_v43 = vld [vmem:[%s5565_s1 + $0x3a4] sm:$0xf]  ;;  %v2555_v46 = vor.u32 %v3544_v37, %v2552_v40 }
  0x46   :  { %1684 = vmatpush.bf16.msrb.mxu3 %v3239_v12  ;;  %v2808_v44 = vld [vmem:[%s5565_s1 + $0x3b0] sm:$0xf0]  ;;  %v2683_v47 = vor.u32 %v3576_v41, %v2680_v42  ;;  %v3508_v48 = vld [vmem:[%s5565_s1 + $0x84] sm:$0xf] }
  0x47   :  { %1690 = vmatpush.bf16.msra.mxu0 %v2459_v13  ;;  %1659 = vmatmul.bf16.vlgmr.msrb.gmra.mxu1 %v4309_v38  ;;  %v2408_v49 = vld [vmem:[%s5565_s1 + $0x90] sm:$0xf0]  ;;  %v3540_v50 = vld [vmem:[%s5565_s1 + $0x184] sm:$0xf]  ;;  %v2811_v51 = vor.u32 %v3608_v43, %v2808_v44 }
  0x48   :  { %1703 = vmatpush.bf16.msra.mxu1 %v2587_v14  ;;  %1672 = vmatmul.bf16.vlgmr.msrb.gmra.mxu2 %v4294_v25  ;;  %v2536_v52 = vld [vmem:[%s5565_s1 + $0x190] sm:$0xf0]  ;;  %v3572_v53 = vld [vmem:[%s5565_s1 + $0x284] sm:$0xf]  ;;  %v2411_v57 = vor.u32 %v3508_v48, %v2408_v49 }
  0x49   :  { %1716 = vmatpush.bf16.msra.mxu2 %v2715_v15  ;;  %1646 = vmatmul.bf16.vlgmr.msrb.gmra.mxu0 %v4299_v31  ;;  %v2664_v54 = vld [vmem:[%s5565_s1 + $0x290] sm:$0xf0]  ;;  %v3604_v55 = vld [vmem:[%s5565_s1 + $0x384] sm:$0xf]  ;;  %v2539_v58 = vor.u32 %v3540_v50, %v2536_v52 }
  0x4a   :  { %1729 = vmatpush.bf16.msra.mxu3 %v2843_v19  ;;  %v2792_v56 = vld [vmem:[%s5565_s1 + $0x390] sm:$0xf0]  ;;  %v2667_v59 = vor.u32 %v3572_v53, %v2664_v54  ;;  %v3504_v60 = vld [vmem:[%s5565_s1 + $0x64] sm:$0xf] }
  0x4b   :  { %1685 = vmatmul.bf16.vlgmr.msrb.gmra.mxu3 %v4301_v32  ;;  %1691 = vmatpush.bf16.msra.mxu0 %v2443_v26  ;;  %v2392_v61 = vld [vmem:[%s5565_s1 + $0x70] sm:$0xf0]  ;;  %v3536_v62 = vld [vmem:[%s5565_s1 + $0x164] sm:$0xf]  ;;  %v2795_v63 = vor.u32 %v3604_v55, %v2792_v56 }
  0x4c   :  { %1704 = vmatpush.bf16.msra.mxu1 %v2571_v33  ;;  %v2520_v0 = vld [vmem:[%s5565_s1 + $0x170] sm:$0xf0]  ;;  %v3568_v1 = vld [vmem:[%s5565_s1 + $0x264] sm:$0xf]  ;;  %v2395_v5 = vor.u32 %v3504_v60, %v2392_v61 }
  0x4d   :  { %1717 = vmatpush.bf16.msra.mxu2 %v2699_v35  ;;  %v2648_v2 = vld [vmem:[%s5565_s1 + $0x270] sm:$0xf0]  ;;  %v3600_v3 = vld [vmem:[%s5565_s1 + $0x364] sm:$0xf]  ;;  %v2523_v6 = vor.u32 %v3536_v62, %v2520_v0 }
  0x4e   :  { %1730 = vmatpush.bf16.msra.mxu3 %v2827_v39  ;;  %v2776_v4 = vld [vmem:[%s5565_s1 + $0x370] sm:$0xf0]  ;;  %v2651_v7 = vor.u32 %v3568_v1, %v2648_v2  ;;  %v3500_v8 = vld [vmem:[%s5565_s1 + $0x44] sm:$0xf] }
  0x4f   :  { %1692 = vmatpush.bf16.msra.mxu0 %v2427_v45  ;;  %v2376_v9 = vld [vmem:[%s5565_s1 + $0x50] sm:$0xf0]  ;;  %v3532_v10 = vld [vmem:[%s5565_s1 + $0x144] sm:$0xf]  ;;  %v2779_v11 = vor.u32 %v3600_v3, %v2776_v4 }
  0x50   :  { %1705 = vmatpush.bf16.msra.mxu1 %v2555_v46  ;;  %v2504_v12 = vld [vmem:[%s5565_s1 + $0x150] sm:$0xf0]  ;;  %v3564_v13 = vld [vmem:[%s5565_s1 + $0x244] sm:$0xf]  ;;  %v2379_v17 = vor.u32 %v3500_v8, %v2376_v9 }
  0x51   :  { %1718 = vmatpush.bf16.msra.mxu2 %v2683_v47  ;;  %v2632_v14 = vld [vmem:[%s5565_s1 + $0x250] sm:$0xf0]  ;;  %v3596_v15 = vld [vmem:[%s5565_s1 + $0x344] sm:$0xf]  ;;  %v2507_v18 = vor.u32 %v3532_v10, %v2504_v12 }
  0x52   :  { %1731 = vmatpush.bf16.msra.mxu3 %v2811_v51  ;;  %v2760_v16 = vld [vmem:[%s5565_s1 + $0x350] sm:$0xf0]  ;;  %v2635_v19 = vor.u32 %v3564_v13, %v2632_v14  ;;  %v3496_v20 = vld [vmem:[%s5565_s1 + $0x24] sm:$0xf] }
  0x53   :  { %1693 = vmatpush.bf16.msra.mxu0 %v2411_v57  ;;  %v2360_v21 = vld [vmem:[%s5565_s1 + $0x30] sm:$0xf0]  ;;  %v3528_v22 = vld [vmem:[%s5565_s1 + $0x124] sm:$0xf]  ;;  %v2763_v23 = vor.u32 %v3596_v15, %v2760_v16 }
  0x54   :  { %1706 = vmatpush.bf16.msra.mxu1 %v2539_v58  ;;  %v2488_v24 = vld [vmem:[%s5565_s1 + $0x130] sm:$0xf0]  ;;  %v3560_v26 = vld [vmem:[%s5565_s1 + $0x224] sm:$0xf]  ;;  %v2363_v37 = vor.u32 %v3496_v20, %v2360_v21 }
  0x55   :  { %1719 = vmatpush.bf16.msra.mxu2 %v2667_v59  ;;  %v2616_v30 = vld [vmem:[%s5565_s1 + $0x230] sm:$0xf0]  ;;  %v3592_v33 = vld [vmem:[%s5565_s1 + $0x324] sm:$0xf]  ;;  %v2491_v42 = vor.u32 %v3528_v22, %v2488_v24 }
  0x56   :  { %1732 = vmatpush.bf16.msra.mxu3 %v2795_v63  ;;  %v2744_v35 = vld [vmem:[%s5565_s1 + $0x330] sm:$0xf0]  ;;  %v3492_v36 = vld [vmem:[%s5565_s1 + $0x4] sm:$0xf]  ;;  %v2619_v43 = vor.u32 %v3560_v26, %v2616_v30 }
  0x57   :  { %1694 = vmatpush.bf16.msra.mxu0 %v2395_v5  ;;  %v2344_v39 = vld [vmem:[%s5565_s1 + $0x10] sm:$0xf0]  ;;  %v3524_v40 = vld [vmem:[%s5565_s1 + $0x104] sm:$0xf]  ;;  %v2747_v47 = vor.u32 %v3592_v33, %v2744_v35 }
  0x58   :  { %1707 = vmatpush.bf16.msra.mxu1 %v2523_v6  ;;  %v2472_v41 = vld [vmem:[%s5565_s1 + $0x110] sm:$0xf0]  ;;  %v3556_v44 = vld [vmem:[%s5565_s1 + $0x204] sm:$0xf] }
  0x59   :  { %1720 = vmatpush.bf16.msra.mxu2 %v2651_v7  ;;  %v2600_v45 = vld [vmem:[%s5565_s1 + $0x210] sm:$0xf0]  ;;  %v3588_v46 = vld [vmem:[%s5565_s1 + $0x304] sm:$0xf] }
  0x5a   :  { %1733 = vmatpush.bf16.msra.mxu3 %v2779_v11  ;;  %v2728_v48 = vld [vmem:[%s5565_s1 + $0x310] sm:$0xf0]  ;;  %v3648_v49 = vld [vmem:[%s5565_s1 + $0x4e4] sm:$0xf] }
  0x5b   :  { %1695 = vmatpush.bf16.msra.mxu0 %v2379_v17  ;;  %v2968_v50 = vld [vmem:[%s5565_s1 + $0x4f0] sm:$0xf0]  ;;  %v3680_v51 = vld [vmem:[%s5565_s1 + $0x5e4] sm:$0xf] }
  0x5c   :  { %1708 = vmatpush.bf16.msra.mxu1 %v2507_v18 }
  0x5d   :  { %1721 = vmatpush.bf16.msra.mxu2 %v2635_v19 }
  0x5e   :  { %1734 = vmatpush.bf16.msra.mxu3 %v2763_v23 }
  0x5f   :  { %10 = vsyncpa [#allocation3], 0  ;;  %1696 = vmatpush.bf16.msra.mxu0 %v2363_v37  ;;  %v2347_v52 = vor.u32 %v3492_v36, %v2344_v39  ;;  %v3096_v53 = vld [vmem:[%s5565_s1 + $0x5f0] sm:$0xf0]  ;;  %v3712_v54 = vld [vmem:[%s5565_s1 + $0x6e4] sm:$0xf]  ;;  %v2475_v56 = vor.u32 %v3524_v40, %v2472_v41  ;;  %v2603_v57 = vor.u32 %v3556_v44, %v2600_v45  ;;  %v2731_v60 = vor.u32 %v3588_v46, %v2728_v48 }
  0x60   :  { %v3224_v55 = vld [vmem:[%s5565_s1 + $0x6f0] sm:$0xf0]  ;;  %1709 = vmatpush.bf16.msra.mxu1 %v2491_v42  ;;  %v3744_v58 = vld [vmem:[%s5565_s1 + $0x7e4] sm:$0xf]  ;;  %v2971_v61 = vor.u32 %v3648_v49, %v2968_v50  ;;  %v3099_v62 = vor.u32 %v3680_v51, %v3096_v53  ;;  %s3816_s10 = smov [#allocation2]   ;;  %s2331_s13 = sshll.u32 %s5569_s5, 4  ;;  %s2332_s13 = int_to_ptr.hbm [resolvable:$true] %s2331_s13 }
  0x61   :  { %1722 = vmatpush.bf16.msra.mxu2 %v2619_v43  ;;  %v3352_v59 = vld [vmem:[%s5565_s1 + $0x7f0] sm:$0xf0]  ;;  %v3227_v63 = vor.u32 %v3712_v54, %v3224_v55  ;;  %v3644_v0 = vld [vmem:[%s5565_s1 + $0x4c4] sm:$0xf]  ;;  %s2329_s11 = sshll.u32 %s3816_s10, 4  ;;  %vm2322_vm0 = vcmask 74752   ;;  %s2330_s11 = int_to_ptr.vmem [resolvable:$true] %s2329_s11 }
  0x62   :  { %1735 = vmatpush.bf16.msra.mxu3 %v2747_v47  ;;  %v2952_v1 = vld [vmem:[%s5565_s1 + $0x4d0] sm:$0xf0]  ;;  %v3676_v2 = vld [vmem:[%s5565_s1 + $0x5c4] sm:$0xf]  ;;  %v3355_v3 = vor.u32 %v3744_v58, %v3352_v59 }
  0x63   :  { %1697 = vmatpush.bf16.msra.mxu0 %v2347_v52  ;;  %v3080_v4 = vld [vmem:[%s5565_s1 + $0x5d0] sm:$0xf0]  ;;  %v3708_v5 = vld [vmem:[%s5565_s1 + $0x6c4] sm:$0xf]  ;;  %v2955_v9 = vor.u32 %v3644_v0, %v2952_v1 }
  0x64   :  { %v3208_v6 = vld [vmem:[%s5565_s1 + $0x6d0] sm:$0xf0]  ;;  %1710 = vmatpush.bf16.msra.mxu1 %v2475_v56  ;;  %v3740_v7 = vld [vmem:[%s5565_s1 + $0x7c4] sm:$0xf]  ;;  %v3083_v10 = vor.u32 %v3676_v2, %v3080_v4 }
  0x65   :  { %1723 = vmatpush.bf16.msra.mxu2 %v2603_v57  ;;  %v3336_v8 = vld [vmem:[%s5565_s1 + $0x7d0] sm:$0xf0]  ;;  %v3211_v11 = vor.u32 %v3708_v5, %v3208_v6  ;;  %v3640_v12 = vld [vmem:[%s5565_s1 + $0x4a4] sm:$0xf] }
  0x66   :  { %1736 = vmatpush.bf16.msra.mxu3 %v2731_v60  ;;  %v2936_v13 = vld [vmem:[%s5565_s1 + $0x4b0] sm:$0xf0]  ;;  %v3672_v14 = vld [vmem:[%s5565_s1 + $0x5a4] sm:$0xf]  ;;  %v3339_v15 = vor.u32 %v3740_v7, %v3336_v8  ;;  %1698 = vmatmul.bf16.vlgmr.msra.gmra.mxu0 %v4167_v28 }
  0x67   :  { %1742 = vmatpush.bf16.msrb.mxu0 %v2971_v61  ;;  %v3064_v16 = vld [vmem:[%s5565_s1 + $0x5b0] sm:$0xf0]  ;;  %v3704_v17 = vld [vmem:[%s5565_s1 + $0x6a4] sm:$0xf]  ;;  %v2939_v21 = vor.u32 %v3640_v12, %v2936_v13  ;;  %1711 = vmatmul.bf16.vlgmr.msra.gmra.mxu1 %v4177_v34 }
  0x68   :  { %1755 = vmatpush.bf16.msrb.mxu1 %v3099_v62  ;;  %v3192_v18 = vld [vmem:[%s5565_s1 + $0x6b0] sm:$0xf0]  ;;  %1724 = vmatmul.bf16.vlgmr.msra.gmra.mxu2 %v4165_v27  ;;  %v3736_v19 = vld [vmem:[%s5565_s1 + $0x7a4] sm:$0xf]  ;;  %v3067_v22 = vor.u32 %v3672_v14, %v3064_v16 }
  0x69   :  { %1768 = vmatpush.bf16.msrb.mxu2 %v3227_v63  ;;  %v3320_v20 = vld [vmem:[%s5565_s1 + $0x7b0] sm:$0xf0]  ;;  %1737 = vmatmul.bf16.vlgmr.msra.gmra.mxu3 %v4169_v29  ;;  %v3195_v23 = vor.u32 %v3704_v17, %v3192_v18  ;;  %v3636_v24 = vld [vmem:[%s5565_s1 + $0x484] sm:$0xf] }
  0x6a   :  { %1781 = vmatpush.bf16.msrb.mxu3 %v3355_v3  ;;  %v2920_v26 = vld [vmem:[%s5565_s1 + $0x490] sm:$0xf0]  ;;  %v3668_v30 = vld [vmem:[%s5565_s1 + $0x584] sm:$0xf]  ;;  %v3323_v33 = vor.u32 %v3736_v19, %v3320_v20 }
  0x6b   :  { %1743 = vmatpush.bf16.msrb.mxu0 %v2955_v9  ;;  %v3048_v35 = vld [vmem:[%s5565_s1 + $0x590] sm:$0xf0]  ;;  %v3700_v36 = vld [vmem:[%s5565_s1 + $0x684] sm:$0xf]  ;;  %v2923_v41 = vor.u32 %v3636_v24, %v2920_v26  ;;  %v2462_v26 = vld [vmem:[%s5565_s1 + $0xe8] sm:$0xf] }
  0x6c   :  { %1756 = vmatpush.bf16.msrb.mxu1 %v3083_v10  ;;  %v3176_v37 = vld [vmem:[%s5565_s1 + $0x690] sm:$0xf0]  ;;  %v3732_v39 = vld [vmem:[%s5565_s1 + $0x784] sm:$0xf]  ;;  %v3051_v42 = vor.u32 %v3668_v30, %v3048_v35  ;;  %v3523_v30 = vld [vmem:[%s5565_s1 + $0xf4] sm:$0xf0] }
  0x6d   :  { %1769 = vmatpush.bf16.msrb.mxu2 %v3211_v11  ;;  %v3304_v40 = vld [vmem:[%s5565_s1 + $0x790] sm:$0xf0]  ;;  %v3179_v43 = vor.u32 %v3700_v36, %v3176_v37  ;;  %v3632_v44 = vld [vmem:[%s5565_s1 + $0x464] sm:$0xf]  ;;  %v3555_v36 = vld [vmem:[%s5565_s1 + $0x1f4] sm:$0xf0] }
  0x6e   :  { %1782 = vmatpush.bf16.msrb.mxu3 %v3339_v15  ;;  %v2904_v45 = vld [vmem:[%s5565_s1 + $0x470] sm:$0xf0]  ;;  %v3664_v46 = vld [vmem:[%s5565_s1 + $0x564] sm:$0xf]  ;;  %v3307_v47 = vor.u32 %v3732_v39, %v3304_v40  ;;  %v2718_v37 = vld [vmem:[%s5565_s1 + $0x2e8] sm:$0xf] }
  0x6f   :  { %1744 = vmatpush.bf16.msrb.mxu0 %v2939_v21  ;;  %v3032_v48 = vld [vmem:[%s5565_s1 + $0x570] sm:$0xf0]  ;;  %v3696_v49 = vld [vmem:[%s5565_s1 + $0x664] sm:$0xf]  ;;  %v2907_v53 = vor.u32 %v3632_v44, %v2904_v45  ;;  %v3587_v39 = vld [vmem:[%s5565_s1 + $0x2f4] sm:$0xf0]  ;;  %v2463_v45 = vor.u32 %v3523_v30, %v2462_v26 }
  0x70   :  { %1757 = vmatpush.bf16.msrb.mxu1 %v3067_v22  ;;  %v3160_v50 = vld [vmem:[%s5565_s1 + $0x670] sm:$0xf0]  ;;  %v3728_v51 = vld [vmem:[%s5565_s1 + $0x764] sm:$0xf]  ;;  %v3035_v54 = vor.u32 %v3664_v46, %v3032_v48  ;;  %v2446_v48 = vld [vmem:[%s5565_s1 + $0xc8] sm:$0xf] }
  0x71   :  { %1770 = vmatpush.bf16.msrb.mxu2 %v3195_v23  ;;  %v3288_v52 = vld [vmem:[%s5565_s1 + $0x770] sm:$0xf0]  ;;  %v3163_v55 = vor.u32 %v3696_v49, %v3160_v50  ;;  %v3628_v56 = vld [vmem:[%s5565_s1 + $0x444] sm:$0xf]  ;;  %v3519_v49 = vld [vmem:[%s5565_s1 + $0xd4] sm:$0xf0] }
  0x72   :  { %1783 = vmatpush.bf16.msrb.mxu3 %v3323_v33  ;;  %v2888_v57 = vld [vmem:[%s5565_s1 + $0x450] sm:$0xf0]  ;;  %v3660_v58 = vld [vmem:[%s5565_s1 + $0x544] sm:$0xf]  ;;  %v3291_v59 = vor.u32 %v3728_v51, %v3288_v52  ;;  %v2590_v33 = vld [vmem:[%s5565_s1 + $0x1e8] sm:$0xf] }
  0x73   :  { %1745 = vmatpush.bf16.msrb.mxu0 %v2923_v41  ;;  %v3016_v60 = vld [vmem:[%s5565_s1 + $0x550] sm:$0xf0]  ;;  %v3692_v61 = vld [vmem:[%s5565_s1 + $0x644] sm:$0xf]  ;;  %v2891_v1 = vor.u32 %v3628_v56, %v2888_v57  ;;  %v2591_v46 = vor.u32 %v3555_v36, %v2590_v33  ;;  %v2574_v50 = vld [vmem:[%s5565_s1 + $0x1c8] sm:$0xf]  ;;  %v2447_v57 = vor.u32 %v3519_v49, %v2446_v48 }
  0x74   :  { %1758 = vmatpush.bf16.msrb.mxu1 %v3051_v42  ;;  %v3144_v62 = vld [vmem:[%s5565_s1 + $0x650] sm:$0xf0]  ;;  %v3724_v63 = vld [vmem:[%s5565_s1 + $0x744] sm:$0xf]  ;;  %v3019_v2 = vor.u32 %v3660_v58, %v3016_v60  ;;  %v2846_v42 = vld [vmem:[%s5565_s1 + $0x3e8] sm:$0xf] }
  0x75   :  { %1771 = vmatpush.bf16.msrb.mxu2 %v3179_v43  ;;  %v3272_v0 = vld [vmem:[%s5565_s1 + $0x750] sm:$0xf0]  ;;  %v3147_v3 = vor.u32 %v3692_v61, %v3144_v62  ;;  %v3624_v4 = vld [vmem:[%s5565_s1 + $0x424] sm:$0xf]  ;;  %v3619_v43 = vld [vmem:[%s5565_s1 + $0x3f4] sm:$0xf0] }
  0x76   :  { %1784 = vmatpush.bf16.msrb.mxu3 %v3307_v47  ;;  %v2872_v5 = vld [vmem:[%s5565_s1 + $0x430] sm:$0xf0]  ;;  %v3656_v6 = vld [vmem:[%s5565_s1 + $0x524] sm:$0xf]  ;;  %v3275_v7 = vor.u32 %v3724_v63, %v3272_v0  ;;  %v2719_v47 = vor.u32 %v3587_v39, %v2718_v37  ;;  %v2847_v51 = vor.u32 %v3619_v43, %v2846_v42  ;;  %v3551_v52 = vld [vmem:[%s5565_s1 + $0x1d4] sm:$0xf0] }
  0x77   :  { %1746 = vmatpush.bf16.msrb.mxu0 %v2907_v53  ;;  %v3000_v8 = vld [vmem:[%s5565_s1 + $0x530] sm:$0xf0]  ;;  %v3688_v9 = vld [vmem:[%s5565_s1 + $0x624] sm:$0xf]  ;;  %v2875_v13 = vor.u32 %v3624_v4, %v2872_v5  ;;  %v2702_v53 = vld [vmem:[%s5565_s1 + $0x2c8] sm:$0xf]  ;;  %v2575_v58 = vor.u32 %v3551_v52, %v2574_v50 }
  0x78   :  { %1759 = vmatpush.bf16.msrb.mxu1 %v3035_v54  ;;  %v3128_v10 = vld [vmem:[%s5565_s1 + $0x630] sm:$0xf0]  ;;  %v3720_v11 = vld [vmem:[%s5565_s1 + $0x724] sm:$0xf]  ;;  %v3003_v16 = vor.u32 %v3656_v6, %v3000_v8  ;;  %v3583_v54 = vld [vmem:[%s5565_s1 + $0x2d4] sm:$0xf0] }
  0x79   :  { %1772 = vmatpush.bf16.msrb.mxu2 %v3163_v55  ;;  %v3256_v12 = vld [vmem:[%s5565_s1 + $0x730] sm:$0xf0]  ;;  %v3620_v14 = vld [vmem:[%s5565_s1 + $0x404] sm:$0xf]  ;;  %v3131_v17 = vor.u32 %v3688_v9, %v3128_v10  ;;  %v2830_v55 = vld [vmem:[%s5565_s1 + $0x3c8] sm:$0xf] }
  0x7a   :  { %1785 = vmatpush.bf16.msrb.mxu3 %v3291_v59  ;;  %v2856_v15 = vld [vmem:[%s5565_s1 + $0x410] sm:$0xf0]  ;;  %v3652_v18 = vld [vmem:[%s5565_s1 + $0x504] sm:$0xf]  ;;  %v3259_v21 = vor.u32 %v3720_v11, %v3256_v12  ;;  %v3615_v56 = vld [vmem:[%s5565_s1 + $0x3d4] sm:$0xf0]  ;;  %v2703_v59 = vor.u32 %v3583_v54, %v2702_v53 }
  0x7b   :  { %1747 = vmatpush.bf16.msrb.mxu0 %v2891_v1  ;;  %v2984_v19 = vld [vmem:[%s5565_s1 + $0x510] sm:$0xf0]  ;;  %v3684_v20 = vld [vmem:[%s5565_s1 + $0x604] sm:$0xf]  ;;  %v2859_v35 = vor.u32 %v3620_v14, %v2856_v15  ;;  %v2430_v60 = vld [vmem:[%s5565_s1 + $0xa8] sm:$0xf]  ;;  %v2831_v63 = vor.u32 %v3615_v56, %v2830_v55 }
  0x7c   :  { %1760 = vmatpush.bf16.msrb.mxu1 %v3019_v2  ;;  %v3112_v22 = vld [vmem:[%s5565_s1 + $0x610] sm:$0xf0]  ;;  %v3716_v23 = vld [vmem:[%s5565_s1 + $0x704] sm:$0xf]  ;;  %v2987_v40 = vor.u32 %v3652_v18, %v2984_v19  ;;  %v3515_v61 = vld [vmem:[%s5565_s1 + $0xb4] sm:$0xf0] }
  0x7d   :  { %1773 = vmatpush.bf16.msrb.mxu2 %v3147_v3  ;;  %v3240_v24 = vld [vmem:[%s5565_s1 + $0x710] sm:$0xf0]  ;;  %v3115_v41 = vor.u32 %v3684_v20, %v3112_v22  ;;  %v2558_v62 = vld [vmem:[%s5565_s1 + $0x1a8] sm:$0xf]  ;;  %v3547_v0 = vld [vmem:[%s5565_s1 + $0x1b4] sm:$0xf0]  ;;  %v2431_v4 = vor.u32 %v3515_v61, %v2430_v60 }
  0x7e   :  { %1786 = vmatpush.bf16.msrb.mxu3 %v3275_v7  ;;  %v3243_v44 = vor.u32 %v3716_v23, %v3240_v24  ;;  %v2686_v1 = vld [vmem:[%s5565_s1 + $0x2a8] sm:$0xf]  ;;  %v3579_v2 = vld [vmem:[%s5565_s1 + $0x2b4] sm:$0xf0]  ;;  %v2559_v5 = vor.u32 %v3547_v0, %v2558_v62 }
  0x7f   :  { %1748 = vmatpush.bf16.msrb.mxu0 %v2875_v13  ;;  %v2814_v3 = vld [vmem:[%s5565_s1 + $0x3a8] sm:$0xf]  ;;  %v2687_v6 = vor.u32 %v3579_v2, %v2686_v1  ;;  %v3511_v8 = vld [vmem:[%s5565_s1 + $0x94] sm:$0xf0] }
  0x80   :  { %1761 = vmatpush.bf16.msrb.mxu1 %v3003_v16  ;;  %v2414_v7 = vld [vmem:[%s5565_s1 + $0x88] sm:$0xf]  ;;  %v3575_v10 = vld [vmem:[%s5565_s1 + $0x294] sm:$0xf0] }
  0x81   :  { %1774 = vmatpush.bf16.msrb.mxu2 %v3131_v17  ;;  %v2670_v9 = vld [vmem:[%s5565_s1 + $0x288] sm:$0xf]  ;;  %v3607_v12 = vld [vmem:[%s5565_s1 + $0x394] sm:$0xf0]  ;;  %v2415_v13 = vor.u32 %v3511_v8, %v2414_v7 }
  0x82   :  { %1787 = vmatpush.bf16.msrb.mxu3 %v3259_v21  ;;  %v2798_v11 = vld [vmem:[%s5565_s1 + $0x388] sm:$0xf]  ;;  %v2671_v15 = vor.u32 %v3575_v10, %v2670_v9  ;;  %v3507_v17 = vld [vmem:[%s5565_s1 + $0x74] sm:$0xf0] }
  0x83   :  { %1749 = vmatpush.bf16.msrb.mxu0 %v2859_v35  ;;  %v2398_v16 = vld [vmem:[%s5565_s1 + $0x68] sm:$0xf]  ;;  %v2799_v19 = vor.u32 %v3607_v12, %v2798_v11  ;;  %v3539_v20 = vld [vmem:[%s5565_s1 + $0x174] sm:$0xf0] }
  0x84   :  { %1762 = vmatpush.bf16.msrb.mxu1 %v2987_v40  ;;  %v2526_v18 = vld [vmem:[%s5565_s1 + $0x168] sm:$0xf]  ;;  %v3571_v22 = vld [vmem:[%s5565_s1 + $0x274] sm:$0xf0]  ;;  %v2399_v26 = vor.u32 %v3507_v17, %v2398_v16 }
  0x85   :  { %1775 = vmatpush.bf16.msrb.mxu2 %v3115_v41  ;;  %v2654_v21 = vld [vmem:[%s5565_s1 + $0x268] sm:$0xf]  ;;  %v3603_v24 = vld [vmem:[%s5565_s1 + $0x374] sm:$0xf0]  ;;  %v2527_v30 = vor.u32 %v3539_v20, %v2526_v18 }
  0x86   :  { %1788 = vmatpush.bf16.msrb.mxu3 %v3243_v44  ;;  %1750 = vmatmul.bf16.vlgmr.msrb.gmra.mxu0 %v4299_v31  ;;  %v2542_v31 = vld [vmem:[%s5565_s1 + $0x188] sm:$0xf]  ;;  %v2655_v33 = vor.u32 %v3571_v22, %v2654_v21  ;;  %v3503_v36 = vld [vmem:[%s5565_s1 + $0x54] sm:$0xf0] }
  0x87   :  { %1794 = vmatpush.bf16.msra.mxu0 %v2463_v45  ;;  %1763 = vmatmul.bf16.vlgmr.msrb.gmra.mxu1 %v4309_v38  ;;  %v3543_v38 = vld [vmem:[%s5565_s1 + $0x194] sm:$0xf0]  ;;  %v2782_v23 = vld [vmem:[%s5565_s1 + $0x368] sm:$0xf] }
  0x88   :  { %1807 = vmatpush.bf16.msra.mxu1 %v2591_v46  ;;  %1776 = vmatmul.bf16.vlgmr.msrb.gmra.mxu2 %v4294_v25  ;;  %v3611_v25 = vld [vmem:[%s5565_s1 + $0x3b4] sm:$0xf0]  ;;  %v2543_v14 = vor.u32 %v3543_v38, %v2542_v31  ;;  %v2382_v35 = vld [vmem:[%s5565_s1 + $0x48] sm:$0xf]  ;;  %v2783_v39 = vor.u32 %v3603_v24, %v2782_v23 }
  0x89   :  { %1820 = vmatpush.bf16.msra.mxu2 %v2719_v47  ;;  %1789 = vmatmul.bf16.vlgmr.msrb.gmra.mxu3 %v4301_v32  ;;  %v2815_v32 = vor.u32 %v3611_v25, %v2814_v3  ;;  %v2510_v37 = vld [vmem:[%s5565_s1 + $0x148] sm:$0xf]  ;;  %v3535_v40 = vld [vmem:[%s5565_s1 + $0x154] sm:$0xf0]  ;;  %v2383_v45 = vor.u32 %v3503_v36, %v2382_v35 }
  0x8a   :  { %1833 = vmatpush.bf16.msra.mxu3 %v2847_v51  ;;  %v2638_v41 = vld [vmem:[%s5565_s1 + $0x248] sm:$0xf]  ;;  %v3567_v42 = vld [vmem:[%s5565_s1 + $0x254] sm:$0xf0]  ;;  %v2511_v46 = vor.u32 %v3535_v40, %v2510_v37 }
  0x8b   :  { %1795 = vmatpush.bf16.msra.mxu0 %v2447_v57  ;;  %v2766_v43 = vld [vmem:[%s5565_s1 + $0x348] sm:$0xf]  ;;  %v3599_v44 = vld [vmem:[%s5565_s1 + $0x354] sm:$0xf0]  ;;  %v2639_v47 = vor.u32 %v3567_v42, %v2638_v41 }
  0x8c   :  { %1808 = vmatpush.bf16.msra.mxu1 %v2575_v58  ;;  %v2366_v48 = vld [vmem:[%s5565_s1 + $0x28] sm:$0xf]  ;;  %v3499_v49 = vld [vmem:[%s5565_s1 + $0x34] sm:$0xf0]  ;;  %v2767_v51 = vor.u32 %v3599_v44, %v2766_v43 }
  0x8d   :  { %1821 = vmatpush.bf16.msra.mxu2 %v2703_v59  ;;  %v2494_v50 = vld [vmem:[%s5565_s1 + $0x128] sm:$0xf]  ;;  %v3531_v52 = vld [vmem:[%s5565_s1 + $0x134] sm:$0xf0]  ;;  %v2367_v57 = vor.u32 %v3499_v49, %v2366_v48 }
  0x8e   :  { %1834 = vmatpush.bf16.msra.mxu3 %v2831_v63  ;;  %v2622_v53 = vld [vmem:[%s5565_s1 + $0x228] sm:$0xf]  ;;  %v3563_v54 = vld [vmem:[%s5565_s1 + $0x234] sm:$0xf0]  ;;  %v2495_v60 = vor.u32 %v3531_v52, %v2494_v50 }
  0x8f   :  { %1796 = vmatpush.bf16.msra.mxu0 %v2431_v4  ;;  %v2750_v55 = vld [vmem:[%s5565_s1 + $0x328] sm:$0xf]  ;;  %v3595_v56 = vld [vmem:[%s5565_s1 + $0x334] sm:$0xf0]  ;;  %v2623_v61 = vor.u32 %v3563_v54, %v2622_v53 }
  0x90   :  { %1809 = vmatpush.bf16.msra.mxu1 %v2559_v5  ;;  %v2350_v58 = vld [vmem:[%s5565_s1 + $0x8] sm:$0xf]  ;;  %v3495_v59 = vld [vmem:[%s5565_s1 + $0x14] sm:$0xf0]  ;;  %v2751_v1 = vor.u32 %v3595_v56, %v2750_v55 }
  0x91   :  { %1822 = vmatpush.bf16.msra.mxu2 %v2687_v6  ;;  %v2478_v62 = vld [vmem:[%s5565_s1 + $0x108] sm:$0xf]  ;;  %v3527_v63 = vld [vmem:[%s5565_s1 + $0x114] sm:$0xf0]  ;;  %v2351_v7 = vor.u32 %v3495_v59, %v2350_v58 }
  0x92   :  { %1835 = vmatpush.bf16.msra.mxu3 %v2815_v32  ;;  %v2606_v0 = vld [vmem:[%s5565_s1 + $0x208] sm:$0xf]  ;;  %v3559_v2 = vld [vmem:[%s5565_s1 + $0x214] sm:$0xf0]  ;;  %v2479_v38 = vor.u32 %v3527_v63, %v2478_v62 }
  0x93   :  { %1797 = vmatpush.bf16.msra.mxu0 %v2415_v13  ;;  %v2734_v3 = vld [vmem:[%s5565_s1 + $0x308] sm:$0xf]  ;;  %v3591_v25 = vld [vmem:[%s5565_s1 + $0x314] sm:$0xf0]  ;;  %v2607_v9 = vor.u32 %v3559_v2, %v2606_v0 }
  0x94   :  { %1810 = vmatpush.bf16.msra.mxu1 %v2543_v14  ;;  %v2974_v4 = vld [vmem:[%s5565_s1 + $0x4e8] sm:$0xf]  ;;  %v3651_v5 = vld [vmem:[%s5565_s1 + $0x4f4] sm:$0xf0]  ;;  %v2735_v12 = vor.u32 %v3591_v25, %v2734_v3 }
  0x95   :  { %1823 = vmatpush.bf16.msra.mxu2 %v2671_v15  ;;  %v3102_v6 = vld [vmem:[%s5565_s1 + $0x5e8] sm:$0xf]  ;;  %v3683_v8 = vld [vmem:[%s5565_s1 + $0x5f4] sm:$0xf0]  ;;  %v2975_v13 = vor.u32 %v3651_v5, %v2974_v4 }
  0x96   :  { %1836 = vmatpush.bf16.msra.mxu3 %v2799_v19  ;;  %v3230_v31 = vld [vmem:[%s5565_s1 + $0x6e8] sm:$0xf]  ;;  %v3715_v32 = vld [vmem:[%s5565_s1 + $0x6f4] sm:$0xf0]  ;;  %v3103_v14 = vor.u32 %v3683_v8, %v3102_v6 }
  0x97   :  { %1798 = vmatpush.bf16.msra.mxu0 %v2399_v26  ;;  %v3358_v10 = vld [vmem:[%s5565_s1 + $0x7e8] sm:$0xf]  ;;  %v3747_v11 = vld [vmem:[%s5565_s1 + $0x7f4] sm:$0xf0]  ;;  %v3231_v15 = vor.u32 %v3715_v32, %v3230_v31  ;;  %v4987_v32 = vld [vmem:[%s5566_s2] sm:$0xf] }
  0x98   :  { %1811 = vmatpush.bf16.msra.mxu1 %v2527_v30  ;;  %v2958_v16 = vld [vmem:[%s5565_s1 + $0x4c8] sm:$0xf]  ;;  %v3647_v17 = vld [vmem:[%s5565_s1 + $0x4d4] sm:$0xf0]  ;;  %v3359_v19 = vor.u32 %v3747_v11, %v3358_v10 }
  0x99   :  { %1824 = vmatpush.bf16.msra.mxu2 %v2655_v33  ;;  %v3086_v18 = vld [vmem:[%s5565_s1 + $0x5c8] sm:$0xf]  ;;  %v3679_v20 = vld [vmem:[%s5565_s1 + $0x5d4] sm:$0xf0]  ;;  %v2959_v26 = vor.u32 %v3647_v17, %v2958_v16  ;;  %v280_v16 = vperm.slane %v4987_v32, 0 }
  0x9a   :  { %1837 = vmatpush.bf16.msra.mxu3 %v2783_v39  ;;  %v3214_v21 = vld [vmem:[%s5565_s1 + $0x6c8] sm:$0xf]  ;;  %v3711_v22 = vld [vmem:[%s5565_s1 + $0x6d4] sm:$0xf0]  ;;  %v3087_v30 = vor.u32 %v3679_v20, %v3086_v18 }
  0x9b   :  { %1799 = vmatpush.bf16.msra.mxu0 %v2383_v45  ;;  %v3342_v23 = vld [vmem:[%s5565_s1 + $0x7c8] sm:$0xf]  ;;  %v3743_v24 = vld [vmem:[%s5565_s1 + $0x7d4] sm:$0xf0]  ;;  %v3215_v33 = vor.u32 %v3711_v22, %v3214_v21 }
  0x9c   :  { %1812 = vmatpush.bf16.msra.mxu1 %v2511_v46  ;;  %v2942_v35 = vld [vmem:[%s5565_s1 + $0x4a8] sm:$0xf]  ;;  %v3643_v36 = vld [vmem:[%s5565_s1 + $0x4b4] sm:$0xf0]  ;;  %v3343_v39 = vor.u32 %v3743_v24, %v3342_v23 }
  0x9d   :  { %1825 = vmatpush.bf16.msra.mxu2 %v2639_v47  ;;  %v3070_v37 = vld [vmem:[%s5565_s1 + $0x5a8] sm:$0xf]  ;;  %v3675_v40 = vld [vmem:[%s5565_s1 + $0x5b4] sm:$0xf0]  ;;  %v2943_v45 = vor.u32 %v3643_v36, %v2942_v35 }
  0x9e   :  { %1838 = vmatpush.bf16.msra.mxu3 %v2767_v51  ;;  %v3198_v41 = vld [vmem:[%s5565_s1 + $0x6a8] sm:$0xf]  ;;  %v3707_v42 = vld [vmem:[%s5565_s1 + $0x6b4] sm:$0xf0]  ;;  %v3071_v46 = vor.u32 %v3675_v40, %v3070_v37 }
  0x9f   :  { %1800 = vmatpush.bf16.msra.mxu0 %v2367_v57  ;;  %v3326_v43 = vld [vmem:[%s5565_s1 + $0x7a8] sm:$0xf]  ;;  %v3739_v44 = vld [vmem:[%s5565_s1 + $0x7b4] sm:$0xf0] }
  0xa0   :  { %1813 = vmatpush.bf16.msra.mxu1 %v2495_v60  ;;  %v2926_v47 = vld [vmem:[%s5565_s1 + $0x488] sm:$0xf]  ;;  %v3639_v48 = vld [vmem:[%s5565_s1 + $0x494] sm:$0xf0] }
  0xa1   :  { %1826 = vmatpush.bf16.msra.mxu2 %v2623_v61  ;;  %v3182_v49 = vld [vmem:[%s5565_s1 + $0x688] sm:$0xf]  ;;  %v3703_v50 = vld [vmem:[%s5565_s1 + $0x694] sm:$0xf0]  ;;  %v2927_v53 = vor.u32 %v3639_v48, %v2926_v47  ;;  %v3553_v47 = vld [vmem:[%s5565_s1 + $0x1ec] sm:$0xf] }
  0xa2   :  { %1839 = vmatpush.bf16.msra.mxu3 %v2751_v1  ;;  %v3310_v51 = vld [vmem:[%s5565_s1 + $0x788] sm:$0xf]  ;;  %v3735_v52 = vld [vmem:[%s5565_s1 + $0x794] sm:$0xf0]  ;;  %v3183_v55 = vor.u32 %v3703_v50, %v3182_v49  ;;  %v2720_v49 = vld [vmem:[%s5565_s1 + $0x2f8] sm:$0xf0] }
  0xa3   :  { %1801 = vmatpush.bf16.msra.mxu0 %v2351_v7  ;;  %v2910_v56 = vld [vmem:[%s5565_s1 + $0x468] sm:$0xf]  ;;  %v3635_v57 = vld [vmem:[%s5565_s1 + $0x474] sm:$0xf0]  ;;  %v3311_v59 = vor.u32 %v3735_v52, %v3310_v51  ;;  %v3617_v52 = vld [vmem:[%s5565_s1 + $0x3ec] sm:$0xf] }
  0xa4   :  { %1814 = vmatpush.bf16.msra.mxu1 %v2479_v38  ;;  %v3038_v58 = vld [vmem:[%s5565_s1 + $0x568] sm:$0xf]  ;;  %v3667_v60 = vld [vmem:[%s5565_s1 + $0x574] sm:$0xf0]  ;;  %v2911_v1 = vor.u32 %v3635_v57, %v2910_v56 }
  0xa5   :  { %1827 = vmatpush.bf16.msra.mxu2 %v2607_v9  ;;  %v3166_v61 = vld [vmem:[%s5565_s1 + $0x668] sm:$0xf]  ;;  %v3699_v62 = vld [vmem:[%s5565_s1 + $0x674] sm:$0xf0]  ;;  %v3039_v3 = vor.u32 %v3667_v60, %v3038_v58 }
  0xa6   :  { %1840 = vmatpush.bf16.msra.mxu3 %v2735_v12  ;;  %1802 = vmatmul.bf16.vlgmr.msra.gmra.mxu0 %v4167_v28  ;;  %v3054_v28 = vld [vmem:[%s5565_s1 + $0x588] sm:$0xf]  ;;  %v3731_v0 = vld [vmem:[%s5565_s1 + $0x774] sm:$0xf0]  ;;  %v3167_v25 = vor.u32 %v3699_v62, %v3166_v61  ;;  %v3517_v61 = vld [vmem:[%s5565_s1 + $0xcc] sm:$0xf] }
  0xa7   :  { %1846 = vmatpush.bf16.msrb.mxu0 %v2975_v13  ;;  %1815 = vmatmul.bf16.vlgmr.msra.gmra.mxu1 %v4177_v34  ;;  %v3671_v34 = vld [vmem:[%s5565_s1 + $0x594] sm:$0xf0]  ;;  %v3294_v63 = vld [vmem:[%s5565_s1 + $0x768] sm:$0xf]  ;;  %v2448_v62 = vld [vmem:[%s5565_s1 + $0xd8] sm:$0xf0] }
  0xa8   :  { %1859 = vmatpush.bf16.msrb.mxu1 %v3103_v14  ;;  %1828 = vmatmul.bf16.vlgmr.msra.gmra.mxu2 %v4165_v27  ;;  %v3199_v27 = vor.u32 %v3707_v42, %v3198_v41  ;;  %v3055_v54 = vor.u32 %v3671_v34, %v3054_v28  ;;  %v2894_v2 = vld [vmem:[%s5565_s1 + $0x448] sm:$0xf]  ;;  %v3631_v4 = vld [vmem:[%s5565_s1 + $0x454] sm:$0xf0]  ;;  %v3295_v7 = vor.u32 %v3731_v0, %v3294_v63  ;;  %v3585_v34 = vld [vmem:[%s5565_s1 + $0x2ec] sm:$0xf] }
  0xa9   :  { %1872 = vmatpush.bf16.msrb.mxu2 %v3231_v15  ;;  %1841 = vmatmul.bf16.vlgmr.msra.gmra.mxu3 %v4169_v29  ;;  %v3327_v29 = vor.u32 %v3739_v44, %v3326_v43  ;;  %v3022_v5 = vld [vmem:[%s5565_s1 + $0x548] sm:$0xf]  ;;  %v3663_v6 = vld [vmem:[%s5565_s1 + $0x554] sm:$0xf0]  ;;  %v2895_v10 = vor.u32 %v3631_v4, %v2894_v2  ;;  %v2723_v60 = vor.u32 %v3585_v34, %v2720_v49  ;;  %v3549_v63 = vld [vmem:[%s5565_s1 + $0x1cc] sm:$0xf] }
  0xaa   :  { %1885 = vmatpush.bf16.msrb.mxu3 %v3359_v19  ;;  %v3150_v8 = vld [vmem:[%s5565_s1 + $0x648] sm:$0xf]  ;;  %v3695_v31 = vld [vmem:[%s5565_s1 + $0x654] sm:$0xf0]  ;;  %v3023_v12 = vor.u32 %v3663_v6, %v3022_v5  ;;  %v3581_v2 = vld [vmem:[%s5565_s1 + $0x2cc] sm:$0xf] }
  0xab   :  { %1847 = vmatpush.bf16.msrb.mxu0 %v2959_v26  ;;  %v3278_v38 = vld [vmem:[%s5565_s1 + $0x748] sm:$0xf]  ;;  %v3727_v9 = vld [vmem:[%s5565_s1 + $0x754] sm:$0xf0]  ;;  %v3151_v13 = vor.u32 %v3695_v31, %v3150_v8  ;;  %v3613_v5 = vld [vmem:[%s5565_s1 + $0x3cc] sm:$0xf]  ;;  %v2451_v8 = vor.u32 %v3517_v61, %v2448_v62 }
  0xac   :  { %1860 = vmatpush.bf16.msrb.mxu1 %v3087_v30  ;;  %v2878_v11 = vld [vmem:[%s5565_s1 + $0x428] sm:$0xf]  ;;  %v3627_v14 = vld [vmem:[%s5565_s1 + $0x434] sm:$0xf0]  ;;  %v3279_v17 = vor.u32 %v3727_v9, %v3278_v38  ;;  %v2832_v6 = vld [vmem:[%s5565_s1 + $0x3d8] sm:$0xf0] }
  0xad   :  { %1873 = vmatpush.bf16.msrb.mxu2 %v3215_v33  ;;  %v3006_v15 = vld [vmem:[%s5565_s1 + $0x528] sm:$0xf]  ;;  %v3659_v18 = vld [vmem:[%s5565_s1 + $0x534] sm:$0xf0]  ;;  %v2879_v23 = vor.u32 %v3627_v14, %v2878_v11  ;;  %v3513_v9 = vld [vmem:[%s5565_s1 + $0xac] sm:$0xf] }
  0xae   :  { %1886 = vmatpush.bf16.msrb.mxu3 %v3343_v39  ;;  %v3134_v19 = vld [vmem:[%s5565_s1 + $0x628] sm:$0xf]  ;;  %v3691_v20 = vld [vmem:[%s5565_s1 + $0x634] sm:$0xf0]  ;;  %v3007_v33 = vor.u32 %v3659_v18, %v3006_v15  ;;  %v3545_v11 = vld [vmem:[%s5565_s1 + $0x1ac] sm:$0xf] }
  0xaf   :  { %1848 = vmatpush.bf16.msrb.mxu0 %v2943_v45  ;;  %v3262_v21 = vld [vmem:[%s5565_s1 + $0x728] sm:$0xf]  ;;  %v3723_v22 = vld [vmem:[%s5565_s1 + $0x734] sm:$0xf0]  ;;  %v3135_v35 = vor.u32 %v3691_v20, %v3134_v19  ;;  %v2560_v14 = vld [vmem:[%s5565_s1 + $0x1b8] sm:$0xf0] }
  0xb0   :  { %1861 = vmatpush.bf16.msrb.mxu1 %v3071_v46  ;;  %v2862_v24 = vld [vmem:[%s5565_s1 + $0x408] sm:$0xf]  ;;  %v3623_v26 = vld [vmem:[%s5565_s1 + $0x414] sm:$0xf0]  ;;  %v3263_v42 = vor.u32 %v3723_v22, %v3262_v21  ;;  %v3521_v46 = vld [vmem:[%s5565_s1 + $0xec] sm:$0xf] }
  0xb1   :  { %1874 = vmatpush.bf16.msrb.mxu2 %v3199_v27  ;;  %v2990_v36 = vld [vmem:[%s5565_s1 + $0x508] sm:$0xf]  ;;  %v3655_v37 = vld [vmem:[%s5565_s1 + $0x514] sm:$0xf0]  ;;  %v2464_v27 = vld [vmem:[%s5565_s1 + $0xf8] sm:$0xf0]  ;;  %v2863_v28 = vor.u32 %v3623_v26, %v2862_v24  ;;  %v2563_v26 = vor.u32 %v3545_v11, %v2560_v14 }
  0xb2   :  { %1887 = vmatpush.bf16.msrb.mxu3 %v3327_v29  ;;  %v3118_v39 = vld [vmem:[%s5565_s1 + $0x608] sm:$0xf]  ;;  %v3687_v43 = vld [vmem:[%s5565_s1 + $0x614] sm:$0xf0]  ;;  %v2592_v29 = vld [vmem:[%s5565_s1 + $0x1f8] sm:$0xf0]  ;;  %v2991_v50 = vor.u32 %v3655_v37, %v2990_v36  ;;  %v2467_v56 = vor.u32 %v3521_v46, %v2464_v27 }
  0xb3   :  { %1849 = vmatpush.bf16.msrb.mxu0 %v2927_v53  ;;  %v3246_v44 = vld [vmem:[%s5565_s1 + $0x708] sm:$0xf]  ;;  %v3719_v45 = vld [vmem:[%s5565_s1 + $0x714] sm:$0xf0]  ;;  %v3119_v51 = vor.u32 %v3687_v43, %v3118_v39  ;;  %v2848_v53 = vld [vmem:[%s5565_s1 + $0x3f8] sm:$0xf0] }
  0xb4   :  { %1862 = vmatpush.bf16.msrb.mxu1 %v3055_v54  ;;  %v1608_v41 = vpop.f32.mrf.mxu1  ;;  %v2851_v0 = vor.u32 %v3617_v52, %v2848_v53  ;;  %v3577_v15 = vld [vmem:[%s5565_s1 + $0x2ac] sm:$0xf]  ;;  %v5116_v18 = vld [vmem:[#allocation1 + $0x3f] sm:$0xff] }
  0xb5   :  { %1875 = vmatpush.bf16.msrb.mxu2 %v3183_v55  ;;  %v1595_v30 = vpop.f32.mrf.mxu0  ;;  %v3247_v55 = vor.u32 %v3719_v45, %v3246_v44  ;;  %v3609_v19 = vld [vmem:[%s5565_s1 + $0x3ac] sm:$0xf]  ;;  %v2816_v20 = vld [vmem:[%s5565_s1 + $0x3b8] sm:$0xf0] }
  0xb6   :  { %1888 = vmatpush.bf16.msrb.mxu3 %v3311_v59  ;;  %v1596_v40 = vadd.f32 %v1595_v30, %v280_v16  ;;  %v2595_v59 = vor.u32 %v3553_v47, %v2592_v29  ;;  %v2688_v16 = vld [vmem:[%s5565_s1 + $0x2b8] sm:$0xf0]  ;;  %v5125_v22 = vld [vmem:[#allocation1 + $0x2d] sm:$0xff]  ;;  %v2819_v37 = vor.u32 %v3609_v19, %v2816_v20 }
  0xb7   :  { %1850 = vmatpush.bf16.msrb.mxu0 %v2911_v1  ;;  %v2576_v1 = vld [vmem:[%s5565_s1 + $0x1d8] sm:$0xf0]  ;;  %v2691_v30 = vor.u32 %v3577_v15, %v2688_v16  ;;  %v3541_v36 = vld [vmem:[%s5565_s1 + $0x18c] sm:$0xf] }
  0xb8   :  { %1863 = vmatpush.bf16.msrb.mxu1 %v3039_v3  ;;  %v1609_v48 = vadd.f32 %v1608_v41, %v1596_v40  ;;  %v2704_v3 = vld [vmem:[%s5565_s1 + $0x2d8] sm:$0xf0]  ;;  %v2579_v31 = vor.u32 %v3549_v63, %v2576_v1  ;;  %v3573_v40 = vld [vmem:[%s5565_s1 + $0x28c] sm:$0xf] }
  0xb9   :  { %1876 = vmatpush.bf16.msrb.mxu2 %v3167_v25  ;;  %v2707_v38 = vor.u32 %v3581_v2, %v2704_v3  ;;  %v2544_v39 = vld [vmem:[%s5565_s1 + $0x198] sm:$0xf0]  ;;  %v3505_v47 = vld [vmem:[%s5565_s1 + $0x6c] sm:$0xf] }
  0xba   :  { %1889 = vmatpush.bf16.msrb.mxu3 %v3295_v7  ;;  %v1621_v54 = vpop.f32.mrf.mxu2  ;;  %v2672_v41 = vld [vmem:[%s5565_s1 + $0x298] sm:$0xf0]  ;;  %v2547_v46 = vor.u32 %v3541_v36, %v2544_v39  ;;  %v3601_v53 = vld [vmem:[%s5565_s1 + $0x36c] sm:$0xf] }
  0xbb   :  { %1851 = vmatpush.bf16.msrb.mxu0 %v2895_v10  ;;  %v1622_v57 = vadd.f32 %v1621_v54, %v1609_v48  ;;  %v2432_v10 = vld [vmem:[%s5565_s1 + $0xb8] sm:$0xf0]  ;;  %v2675_v27 = vor.u32 %v3573_v40, %v2672_v41  ;;  %v3533_v61 = vld [vmem:[%s5565_s1 + $0x14c] sm:$0xf] }
  0xbc   :  { %1864 = vmatpush.bf16.msrb.mxu1 %v3023_v12  ;;  %v1634_v58 = vpop.f32.mrf.mxu3  ;;  %v1610_v7 = vpop.f32.mrf.mxu1  ;;  %v5101_v12 = vld [vmem:[#allocation1 + $0x36] sm:$0xff]  ;;  %v3565_v1 = vld [vmem:[%s5565_s1 + $0x24c] sm:$0xf] }
  0xbd   :  { %1877 = vmatpush.bf16.msrb.mxu2 %v3151_v13  ;;  %v1635_v25 = vadd.f32 %v1634_v58, %v1622_v57  ;;  %v1597_v4 = vpop.f32.mrf.mxu0  ;;  %v2835_v13 = vor.u32 %v3613_v5, %v2832_v6  ;;  %v2800_v43 = vld [vmem:[%s5565_s1 + $0x398] sm:$0xf0]  ;;  %v3529_v11 = vld [vmem:[%s5565_s1 + $0x12c] sm:$0xf] }
  0xbe   :  { %1890 = vmatpush.bf16.msrb.mxu3 %v3279_v17  ;;  %v5113_v17 = vld [vmem:[#allocation1 + $0x24] sm:$0xff]  ;;  %v2400_v48 = vld [vmem:[%s5565_s1 + $0x78] sm:$0xf0]  ;;  %v3597_v4 = vld [vmem:[%s5565_s1 + $0x34c] sm:$0xf] }
  0xbf   :  { %1852 = vmatpush.bf16.msrb.mxu0 %v2879_v23  ;;  %v2435_v23 = vor.u32 %v3513_v9, %v2432_v10  ;;  %v2656_v52 = vld [vmem:[%s5565_s1 + $0x278] sm:$0xf0]  ;;  %v3497_v9 = vld [vmem:[%s5565_s1 + $0x2c] sm:$0xf] }
  0xc0   :  { %1865 = vmatpush.bf16.msrb.mxu1 %v3007_v33  ;;  %v3509_v33 = vld [vmem:[%s5565_s1 + $0x8c] sm:$0xf]  ;;  %v2784_v54 = vld [vmem:[%s5565_s1 + $0x378] sm:$0xf0] }
  0xc1   :  { %1878 = vmatpush.bf16.msrb.mxu2 %v3135_v35  ;;  %v2416_v35 = vld [vmem:[%s5565_s1 + $0x98] sm:$0xf0]  ;;  %v2787_v63 = vor.u32 %v3601_v53, %v2784_v54  ;;  %v3561_v16 = vld [vmem:[%s5565_s1 + $0x22c] sm:$0xf] }
  0xc2   :  { %1891 = vmatpush.bf16.msrb.mxu3 %v3263_v42  ;;  %v1623_v21 = vpop.f32.mrf.mxu2  ;;  %v3605_v42 = vld [vmem:[%s5565_s1 + $0x38c] sm:$0xf]  ;;  %v2419_v44 = vor.u32 %v3509_v33, %v2416_v35  ;;  %v2640_v2 = vld [vmem:[%s5565_s1 + $0x258] sm:$0xf0] }
  0xc3   :  { %1853 = vmatpush.bf16.msrb.mxu0 %v2863_v28  ;;  %v3537_v28 = vld [vmem:[%s5565_s1 + $0x16c] sm:$0xf]  ;;  %v2803_v49 = vor.u32 %v3605_v42, %v2800_v43  ;;  %v2768_v5 = vld [vmem:[%s5565_s1 + $0x358] sm:$0xf0] }
  0xc4   :  { %1866 = vmatpush.bf16.msrb.mxu1 %v2991_v50  ;;  %v1636_v24 = vpop.f32.mrf.mxu3  ;;  %v1660_v34 = vpop.f32.mrf.mxu1  ;;  %v2528_v50 = vld [vmem:[%s5565_s1 + $0x178] sm:$0xf0]  ;;  %v2771_v14 = vor.u32 %v3597_v4, %v2768_v5  ;;  %v3593_v20 = vld [vmem:[%s5565_s1 + $0x32c] sm:$0xf] }
  0xc5   :  { %1879 = vmatpush.bf16.msrb.mxu2 %v3119_v51  ;;  %v3569_v51 = vld [vmem:[%s5565_s1 + $0x26c] sm:$0xf]  ;;  %v2531_v57 = vor.u32 %v3537_v28, %v2528_v50  ;;  %v2368_v10 = vld [vmem:[%s5565_s1 + $0x38] sm:$0xf0] }
  0xc6   :  { %1892 = vmatpush.bf16.msrb.mxu3 %v3247_v55  ;;  %1854 = vmatmul.bf16.vlgmr.msrb.gmra.mxu0 %v5113_v17  ;;  %v1647_v45 = vpop.f32.mrf.mxu0  ;;  %v2659_v58 = vor.u32 %v3569_v51, %v2656_v52  ;;  %v2496_v15 = vld [vmem:[%s5565_s1 + $0x138] sm:$0xf0]  ;;  %v3493_v24 = vld [vmem:[%s5565_s1 + $0xc] sm:$0xf] }
  0xc7   :  { %1898 = vmatpush.bf16.msra.mxu0 %v2467_v56  ;;  %1867 = vmatmul.bf16.vlgmr.msrb.gmra.mxu1 %v5125_v22  ;;  %v1648_v29 = vadd.f32 %v1647_v45, %v1635_v25  ;;  %v2403_v56 = vor.u32 %v3505_v47, %v2400_v48  ;;  %v2624_v19 = vld [vmem:[%s5565_s1 + $0x238] sm:$0xf0]  ;;  %v3525_v35 = vld [vmem:[%s5565_s1 + $0x10c] sm:$0xf] }
  0xc8   :  { %1911 = vmatpush.bf16.msra.mxu1 %v2595_v59  ;;  %1880 = vmatmul.bf16.vlgmr.msrb.gmra.mxu2 %v5101_v12  ;;  %v3501_v59 = vld [vmem:[%s5565_s1 + $0x4c] sm:$0xf]  ;;  %v2752_v21 = vld [vmem:[%s5565_s1 + $0x338] sm:$0xf0]  ;;  %v2627_v33 = vor.u32 %v3561_v16, %v2624_v19 }
  0xc9   :  { %1924 = vmatpush.bf16.msra.mxu2 %v2723_v60  ;;  %1893 = vmatmul.bf16.vlgmr.msrb.gmra.mxu3 %v5116_v18  ;;  %v1661_v55 = vadd.f32 %v1660_v34, %v1648_v29  ;;  %v2384_v60 = vld [vmem:[%s5565_s1 + $0x58] sm:$0xf0]  ;;  %v2755_v40 = vor.u32 %v3593_v20, %v2752_v21  ;;  %v3589_v42 = vld [vmem:[%s5565_s1 + $0x30c] sm:$0xf] }
  0xca   :  { %1937 = vmatpush.bf16.msra.mxu3 %v2851_v0  ;;  %v2512_v0 = vld [vmem:[%s5565_s1 + $0x158] sm:$0xf0]  ;;  %v2387_v6 = vor.u32 %v3501_v59, %v2384_v60  ;;  %v3649_v45 = vld [vmem:[%s5565_s1 + $0x4ec] sm:$0xf] }
  0xcb   :  { %1899 = vmatpush.bf16.msra.mxu0 %v2451_v8  ;;  %v1673_v62 = vpop.f32.mrf.mxu2  ;;  %v2480_v36 = vld [vmem:[%s5565_s1 + $0x118] sm:$0xf0]  ;;  %v3713_v28 = vld [vmem:[%s5565_s1 + $0x6ec] sm:$0xf] }
  0xcc   :  { %1912 = vmatpush.bf16.msra.mxu1 %v2579_v31  ;;  %v1674_v3 = vadd.f32 %v1673_v62, %v1661_v55  ;;  %v2515_v31 = vor.u32 %v3533_v61, %v2512_v0  ;;  %v2608_v41 = vld [vmem:[%s5565_s1 + $0x218] sm:$0xf0]  ;;  %v2483_v34 = vor.u32 %v3525_v35, %v2480_v36  ;;  %v3745_v50 = vld [vmem:[%s5565_s1 + $0x7ec] sm:$0xf] }
  0xcd   :  { %1925 = vmatpush.bf16.msra.mxu2 %v2707_v38  ;;  %v2643_v38 = vor.u32 %v3565_v1, %v2640_v2  ;;  %v2736_v43 = vld [vmem:[%s5565_s1 + $0x318] sm:$0xf0]  ;;  %v3709_v61 = vld [vmem:[%s5565_s1 + $0x6cc] sm:$0xf] }
  0xce   :  { %1938 = vmatpush.bf16.msra.mxu3 %v2835_v13  ;;  %v1686_v25 = vpop.f32.mrf.mxu3  ;;  %v1649_v8 = vpop.f32.mrf.mxu0  ;;  %v3104_v48 = vld [vmem:[%s5565_s1 + $0x5f8] sm:$0xf0]  ;;  %v2739_v52 = vor.u32 %v3589_v42, %v2736_v43  ;;  %v3673_v5 = vld [vmem:[%s5565_s1 + $0x5ac] sm:$0xf] }
  0xcf   :  { %1900 = vmatpush.bf16.msra.mxu0 %v2435_v23  ;;  %v5200_v7 = vadd.f32 %v1686_v25, %v1674_v3  ;;  %v1662_v13 = vpop.f32.mrf.mxu1  ;;  %v2371_v23 = vor.u32 %v3497_v9, %v2368_v10  ;;  %v3232_v29 = vld [vmem:[%s5565_s1 + $0x6f8] sm:$0xf0]  ;;  %v3641_v25 = vld [vmem:[%s5565_s1 + $0x4ac] sm:$0xf]  ;;  %v3786_v8 = vld [vmem:[#allocation1 + $0x12] sm:$0xff] }
  0xd0   :  { %1913 = vmatpush.bf16.msra.mxu1 %v2563_v26  ;;  %v2352_v26 = vld [vmem:[%s5565_s1 + $0x18] sm:$0xf0]  ;;  %v3235_v55 = vor.u32 %v3713_v28, %v3232_v29  ;;  %v3737_v10 = vld [vmem:[%s5565_s1 + $0x7ac] sm:$0xf]  ;;  %v3787_v13 = vld [vmem:[#allocation1] sm:$0xff] }
  0xd1   :  { %1926 = vmatpush.bf16.msra.mxu2 %v2691_v30  ;;  %v2499_v30 = vor.u32 %v3529_v11, %v2496_v15  ;;  %v2355_v47 = vor.u32 %v3493_v24, %v2352_v26  ;;  %v3360_v51 = vld [vmem:[%s5565_s1 + $0x7f8] sm:$0xf0]  ;;  %v3789_v16 = vld [vmem:[#allocation1 + $0x9] sm:$0xff] }
  0xd2   :  { %1939 = vmatpush.bf16.msra.mxu3 %v2819_v37  ;;  %v3557_v37 = vld [vmem:[%s5565_s1 + $0x20c] sm:$0xf]  ;;  %v3363_v59 = vor.u32 %v3745_v50, %v3360_v51  ;;  %v3088_v60 = vld [vmem:[%s5565_s1 + $0x5d8] sm:$0xf0] }
  0xd3   :  { %1901 = vmatpush.bf16.msra.mxu0 %v2419_v44  ;;  %v1675_v39 = vpop.f32.mrf.mxu2  ;;  %v3216_v62 = vld [vmem:[%s5565_s1 + $0x6d8] sm:$0xf0]  ;;  %v3637_v21 = vld [vmem:[%s5565_s1 + $0x48c] sm:$0xf] }
  0xd4   :  { %1914 = vmatpush.bf16.msra.mxu1 %v2547_v46  ;;  %v2976_v46 = vld [vmem:[%s5565_s1 + $0x4f8] sm:$0xf0]  ;;  %v3219_v3 = vor.u32 %v3709_v61, %v3216_v62  ;;  %v3669_v24 = vld [vmem:[%s5565_s1 + $0x58c] sm:$0xf] }
  0xd5   :  { %1927 = vmatpush.bf16.msra.mxu2 %v2675_v27  ;;  %v3681_v27 = vld [vmem:[%s5565_s1 + $0x5ec] sm:$0xf]  ;;  %v2979_v53 = vor.u32 %v3649_v45, %v2976_v46  ;;  %v3344_v0 = vld [vmem:[%s5565_s1 + $0x7d8] sm:$0xf0] }
  0xd6   :  { %1940 = vmatpush.bf16.msra.mxu3 %v2803_v49  ;;  %v1688_v44 = vpop.f32.mrf.mxu3  ;;  %v2611_v49 = vor.u32 %v3557_v37, %v2608_v41  ;;  %v3107_v54 = vor.u32 %v3681_v27, %v3104_v48  ;;  %v2944_v4 = vld [vmem:[%s5565_s1 + $0x4b8] sm:$0xf0]  ;;  %v3733_v36 = vld [vmem:[%s5565_s1 + $0x78c] sm:$0xf] }
  0xd7   :  { %1902 = vmatpush.bf16.msra.mxu0 %v2403_v56  ;;  %v3645_v56 = vld [vmem:[%s5565_s1 + $0x4cc] sm:$0xf]  ;;  %v3200_v9 = vld [vmem:[%s5565_s1 + $0x6b8] sm:$0xf0]  ;;  %v2947_v15 = vor.u32 %v3641_v25, %v2944_v4 }
  0xd8   :  { %1915 = vmatpush.bf16.msra.mxu1 %v2531_v57  ;;  %v2960_v57 = vld [vmem:[%s5565_s1 + $0x4d8] sm:$0xf0]  ;;  %v3633_v43 = vld [vmem:[%s5565_s1 + $0x46c] sm:$0xf] }
  0xd9   :  { %1928 = vmatpush.bf16.msra.mxu2 %v2659_v58  ;;  %v3677_v58 = vld [vmem:[%s5565_s1 + $0x5cc] sm:$0xf]  ;;  %v2963_v1 = vor.u32 %v3645_v56, %v2960_v57  ;;  %v3328_v11 = vld [vmem:[%s5565_s1 + $0x7b8] sm:$0xf0] }
  0xda   :  { %1941 = vmatpush.bf16.msra.mxu3 %v2787_v63  ;;  %v3741_v63 = vld [vmem:[%s5565_s1 + $0x7cc] sm:$0xf]  ;;  %v3091_v2 = vor.u32 %v3677_v58, %v3088_v60  ;;  %v3331_v26 = vor.u32 %v3737_v10, %v3328_v11  ;;  %v3184_v35 = vld [vmem:[%s5565_s1 + $0x698] sm:$0xf0]  ;;  %v281_v11 = vperm.slane %v4987_v32, 1 }
  0xdb   :  { %1903 = vmatpush.bf16.msra.mxu0 %v2387_v6  ;;  %v3347_v6 = vor.u32 %v3741_v63, %v3344_v0  ;;  %v3312_v37 = vld [vmem:[%s5565_s1 + $0x798] sm:$0xf0]  ;;  %v3665_v45 = vld [vmem:[%s5565_s1 + $0x56c] sm:$0xf] }
  0xdc   :  { %1916 = vmatpush.bf16.msra.mxu1 %v2515_v31  ;;  %v3072_v31 = vld [vmem:[%s5565_s1 + $0x5b8] sm:$0xf0]  ;;  %v3315_v27 = vor.u32 %v3733_v36, %v3312_v37  ;;  %v3697_v48 = vld [vmem:[%s5565_s1 + $0x66c] sm:$0xf] }
  0xdd   :  { %1929 = vmatpush.bf16.msra.mxu2 %v2643_v38  ;;  %v3705_v38 = vld [vmem:[%s5565_s1 + $0x6ac] sm:$0xf]  ;;  %v3075_v19 = vor.u32 %v3673_v5, %v3072_v31  ;;  %v2912_v44 = vld [vmem:[%s5565_s1 + $0x478] sm:$0xf0] }
  0xde   :  { %1942 = vmatpush.bf16.msra.mxu3 %v2771_v14  ;;  %v3788_v14 = vld [vmem:[#allocation1 + $0x1b] sm:$0xff]  ;;  %v3203_v20 = vor.u32 %v3705_v38, %v3200_v9  ;;  %v3729_v29 = vld [vmem:[%s5565_s1 + $0x76c] sm:$0xf] }
  0xdf   :  { %1904 = vmatpush.bf16.msra.mxu0 %v2371_v23  ;;  %v2928_v23 = vld [vmem:[%s5565_s1 + $0x498] sm:$0xf0]  ;;  %v3693_v58 = vld [vmem:[%s5565_s1 + $0x64c] sm:$0xf] }
  0xe0   :  { %1917 = vmatpush.bf16.msra.mxu1 %v2499_v30  ;;  %v3056_v30 = vld [vmem:[%s5565_s1 + $0x598] sm:$0xf0]  ;;  %v2931_v39 = vor.u32 %v3637_v21, %v2928_v23  ;;  %v3725_v61 = vld [vmem:[%s5565_s1 + $0x74c] sm:$0xf] }
  0xe1   :  { %1930 = vmatpush.bf16.msra.mxu2 %v2627_v33  ;;  %v3701_v33 = vld [vmem:[%s5565_s1 + $0x68c] sm:$0xf]  ;;  %v3059_v41 = vor.u32 %v3669_v24, %v3056_v30  ;;  %v3168_v28 = vld [vmem:[%s5565_s1 + $0x678] sm:$0xf0] }
  0xe2   :  { %1943 = vmatpush.bf16.msra.mxu3 %v2755_v40  ;;  %v3187_v42 = vor.u32 %v3701_v33, %v3184_v35  ;;  %v3171_v51 = vor.u32 %v3697_v48, %v3168_v28  ;;  %v3024_v57 = vld [vmem:[%s5565_s1 + $0x558] sm:$0xf0]  ;;  %v3657_v4 = vld [vmem:[%s5565_s1 + $0x52c] sm:$0xf] }
  0xe3   :  { %1905 = vmatpush.bf16.msra.mxu0 %v2355_v47  ;;  %v5346_v40 = vpop.f32.mrf.mxu0  ;;  %v3040_v47 = vld [vmem:[%s5565_s1 + $0x578] sm:$0xf0]  ;;  %v3689_v31 = vld [vmem:[%s5565_s1 + $0x62c] sm:$0xf] }
  0xe4   :  { %1918 = vmatpush.bf16.msra.mxu1 %v2483_v34  ;;  %v5357_v46 = vpop.f32.mrf.mxu1  ;;  %v3296_v34 = vld [vmem:[%s5565_s1 + $0x778] sm:$0xf0]  ;;  %v3043_v50 = vor.u32 %v3665_v45, %v3040_v47  ;;  %v3721_v9 = vld [vmem:[%s5565_s1 + $0x72c] sm:$0xf]  ;;  %v1700_v37 = vadd.f32 %v5346_v40, %v281_v11  ;;  %v3754_v40 = vld [vmem:[%s5567_s3 + $0x30] sm:$0xff] }
  0xe5   :  { %1931 = vmatpush.bf16.msra.mxu2 %v2611_v49  ;;  %v2915_v49 = vor.u32 %v3633_v43, %v2912_v44  ;;  %v3299_v56 = vor.u32 %v3729_v29, %v3296_v34  ;;  %v3280_v62 = vld [vmem:[%s5565_s1 + $0x758] sm:$0xf0]  ;;  %v3717_v35 = vld [vmem:[%s5565_s1 + $0x70c] sm:$0xf]  ;;  %v3766_v11 = vld [vmem:[%s5567_s3 + $0x90] sm:$0xff] }
  0xe6   :  { %1944 = vmatpush.bf16.msra.mxu3 %v2739_v52  ;;  %1906 = vmatmul.bf16.vlgmr.msra.gmra.mxu0 %v3787_v13  ;;  %v3629_v52 = vld [vmem:[%s5565_s1 + $0x44c] sm:$0xf]  ;;  %v2880_v25 = vld [vmem:[%s5565_s1 + $0x438] sm:$0xf0] }
  0xe7   :  { %1950 = vmatpush.bf16.msrb.mxu0 %v2979_v53  ;;  %1919 = vmatmul.bf16.vlgmr.msra.gmra.mxu1 %v3789_v16  ;;  %v2896_v53 = vld [vmem:[%s5565_s1 + $0x458] sm:$0xf0]  ;;  %v3621_v16 = vld [vmem:[%s5565_s1 + $0x40c] sm:$0xf] }
  0xe8   :  { %1963 = vmatpush.bf16.msrb.mxu1 %v3107_v54  ;;  %1932 = vmatmul.bf16.vlgmr.msra.gmra.mxu2 %v3786_v8  ;;  %v3661_v54 = vld [vmem:[%s5565_s1 + $0x54c] sm:$0xf]  ;;  %v2899_v63 = vor.u32 %v3629_v52, %v2896_v53  ;;  %v3008_v8 = vld [vmem:[%s5565_s1 + $0x538] sm:$0xf0] }
  0xe9   :  { %1976 = vmatpush.bf16.msrb.mxu2 %v3235_v55  ;;  %1945 = vmatmul.bf16.vlgmr.msra.gmra.mxu3 %v3788_v14  ;;  %v3136_v38 = vld [vmem:[%s5565_s1 + $0x638] sm:$0xf0]  ;;  %v3011_v14 = vor.u32 %v3657_v4, %v3008_v8  ;;  %v3753_v28 = vld [vmem:[%s5567_s3 + $0x28] sm:$0xff]  ;;  %v3756_v8 = vld [vmem:[%s5567_s3 + $0x40] sm:$0xff] }
  0xea   :  { %1989 = vmatpush.bf16.msrb.mxu3 %v3363_v59  ;;  %v3152_v59 = vld [vmem:[%s5565_s1 + $0x658] sm:$0xf0]  ;;  %v3761_v29 = vld [vmem:[%s5567_s3 + $0x68] sm:$0xff] }
  0xeb   :  { %1951 = vmatpush.bf16.msrb.mxu0 %v2963_v1  ;;  %v5383_v55 = vpop.f32.mrf.mxu2  ;;  %v1701_v0 = vpop.f32.mrf.mxu0  ;;  %v3027_v1 = vor.u32 %v3661_v54, %v3024_v57  ;;  %v3264_v10 = vld [vmem:[%s5565_s1 + $0x738] sm:$0xf0]  ;;  %v3750_v57 = vld [vmem:[%s5567_s3 + $0x10] sm:$0xff] }
  0xec   :  { %1964 = vmatpush.bf16.msrb.mxu1 %v3091_v2  ;;  %v5394_v60 = vpop.f32.mrf.mxu3  ;;  %v3155_v2 = vor.u32 %v3693_v58, %v3152_v59  ;;  %v1714_v5 = vpop.f32.mrf.mxu1  ;;  %v3267_v23 = vor.u32 %v3721_v9, %v3264_v10  ;;  %v2992_v24 = vld [vmem:[%s5565_s1 + $0x518] sm:$0xf0]  ;;  %v3749_v0 = vld [vmem:[%s5567_s3 + $0x8] sm:$0xff] }
  0xed   :  { %1977 = vmatpush.bf16.msrb.mxu2 %v3219_v3  ;;  %v3625_v3 = vld [vmem:[%s5565_s1 + $0x42c] sm:$0xf]  ;;  %v3120_v30 = vld [vmem:[%s5565_s1 + $0x618] sm:$0xf0]  ;;  %v3748_v5 = vld [vmem:[%s5567_s3] sm:$0xff] }
  0xee   :  { %1990 = vmatpush.bf16.msrb.mxu3 %v3347_v6  ;;  %v3283_v6 = vor.u32 %v3725_v61, %v3280_v62  ;;  %v2883_v13 = vor.u32 %v3625_v3, %v2880_v25  ;;  %v3248_v36 = vld [vmem:[%s5565_s1 + $0x718] sm:$0xf0]  ;;  %v3758_v61 = vld [vmem:[%s5567_s3 + $0x50] sm:$0xff] }
  0xef   :  { %1952 = vmatpush.bf16.msrb.mxu0 %v2947_v15  ;;  %v3139_v15 = vor.u32 %v3689_v31, %v3136_v38  ;;  %v3251_v43 = vor.u32 %v3717_v35, %v3248_v36  ;;  %v3755_v44 = vld [vmem:[%s5567_s3 + $0x38] sm:$0xff] }
  0xf0   :  { %1965 = vmatpush.bf16.msrb.mxu1 %v3075_v19  ;;  %v2864_v19 = vld [vmem:[%s5565_s1 + $0x418] sm:$0xf0] }
  0xf1   :  { %1978 = vmatpush.bf16.msrb.mxu2 %v3203_v20  ;;  %v3653_v20 = vld [vmem:[%s5565_s1 + $0x50c] sm:$0xf]  ;;  %v3763_v45 = vld [vmem:[%s5567_s3 + $0x78] sm:$0xff] }
  0xf2   :  { %1991 = vmatpush.bf16.msrb.mxu3 %v3331_v26  ;;  %v3685_v26 = vld [vmem:[%s5565_s1 + $0x60c] sm:$0xf]  ;;  %v3771_v47 = vld [vmem:[%s5567_s3 + $0xb8] sm:$0xff] }
  0xf3   :  { %1953 = vmatpush.bf16.msrb.mxu0 %v2931_v39  ;;  %v1727_v21 = vpop.f32.mrf.mxu2  ;;  %v2867_v39 = vor.u32 %v3621_v16, %v2864_v19  ;;  %v3759_v53 = vld [vmem:[%s5567_s3 + $0x58] sm:$0xff]  ;;  %v3764_v19 = vld [vmem:[%s5567_s3 + $0x80] sm:$0xff] }
  0xf4   :  { %1966 = vmatpush.bf16.msrb.mxu1 %v3059_v41  ;;  %v1740_v33 = vpop.f32.mrf.mxu3  ;;  %v2995_v41 = vor.u32 %v3653_v20, %v2992_v24  ;;  %v282_v20 = vperm.slane %v4987_v32, 2 }
  0xf5   :  { %1979 = vmatpush.bf16.msrb.mxu2 %v3187_v42  ;;  %v3123_v42 = vor.u32 %v3685_v26, %v3120_v30 }
  0xf6   :  { %1992 = vmatpush.bf16.msrb.mxu3 %v3315_v27  ;;  %v1713_v27 = vadd.f32 %v5357_v46, %v1700_v37  ;;  %v3762_v46 = vld [vmem:[%s5567_s3 + $0x70] sm:$0xff] }
  0xf7   :  { %1954 = vmatpush.bf16.msrb.mxu0 %v2915_v49 }
  0xf8   :  { %1967 = vmatpush.bf16.msrb.mxu1 %v3043_v50  ;;  %v1726_v48 = vadd.f32 %v5383_v55, %v1713_v27  ;;  %v3770_v50 = vld [vmem:[%s5567_s3 + $0xb0] sm:$0xff] }
  0xf9   :  { %1980 = vmatpush.bf16.msrb.mxu2 %v3171_v51  ;;  %v3751_v51 = vld [vmem:[%s5567_s3 + $0x18] sm:$0xff] }
  0xfa   :  { %1993 = vmatpush.bf16.msrb.mxu3 %v3299_v56  ;;  %v3769_v56 = vld [vmem:[%s5567_s3 + $0xa8] sm:$0xff] }
  0xfb   :  { %1955 = vmatpush.bf16.msrb.mxu0 %v2899_v63 }
  0xfc   :  { %1968 = vmatpush.bf16.msrb.mxu1 %v3027_v1  ;;  %v3767_v1 = vld [vmem:[%s5567_s3 + $0x98] sm:$0xff] }
  0xfd   :  { %1981 = vmatpush.bf16.msrb.mxu2 %v3155_v2  ;;  %v3757_v2 = vld [vmem:[%s5567_s3 + $0x48] sm:$0xff] }
  0xfe   :  { %1994 = vmatpush.bf16.msrb.mxu3 %v3283_v6  ;;  %v2002_v6 = vmax.f32 %v5200_v7, 0.0 }
  0xff   :  { %1956 = vmatpush.bf16.msrb.mxu0 %v2883_v13 }
 0x100   :  { %1969 = vmatpush.bf16.msrb.mxu1 %v3011_v14  ;;  %v2006_v38 = vpack.c.bf16 %v2002_v6, %v2002_v6  ;;  %v3765_v14 = vld [vmem:[%s5567_s3 + $0x88] sm:$0xff] }
 0x101   :  { %1982 = vmatpush.bf16.msrb.mxu2 %v3139_v15 }
 0x102   :  { %1995 = vmatpush.bf16.msrb.mxu3 %v3267_v23 }
 0x103   :  { %1957 = vmatpush.bf16.msrb.mxu0 %v2867_v39 }
 0x104   :  { %1970 = vmatpush.bf16.msrb.mxu1 %v2995_v41  ;;  %v1764_v49 = vpop.f32.mrf.mxu1 }
 0x105   :  { %1983 = vmatpush.bf16.msrb.mxu2 %v3123_v42 }
 0x106   :  { %1996 = vmatpush.bf16.msrb.mxu3 %v3251_v43  ;;  %1958 = vmatmul.bf16.vlgmr.msrb.gmra.mxu0 %v5113_v17  ;;  %v1739_v17 = vadd.f32 %v5394_v60, %v1726_v48  ;;  %v3768_v60 = vld [vmem:[%s5567_s3 + $0xa0] sm:$0xff] }
 0x107   :  { %2270 = vmatpush.bf16.msra.mxu0 %v3755_v44  ;;  %1971 = vmatmul.bf16.vlgmr.msrb.gmra.mxu1 %v5125_v22  ;;  %v1751_v22 = vpop.f32.mrf.mxu0  ;;  %v3779_v44 = vld [vmem:[%s5567_s3 + $0xf8] sm:$0xff] }
 0x108   :  { %2283 = vmatpush.bf16.msra.mxu1 %v3763_v45  ;;  %1984 = vmatmul.bf16.vlgmr.msrb.gmra.mxu2 %v5101_v12  ;;  %v3752_v12 = vld [vmem:[%s5567_s3 + $0x20] sm:$0xff]  ;;  %v1752_v34 = vadd.f32 %v1751_v22, %v1739_v17  ;;  %v3775_v22 = vld [vmem:[%s5567_s3 + $0xd8] sm:$0xff] }
 0x109   :  { %1997 = vmatmul.bf16.vlgmr.msrb.gmra.mxu3 %v5116_v18  ;;  %2296 = vmatpush.bf16.msra.mxu2 %v3771_v47  ;;  %v3760_v18 = vld [vmem:[%s5567_s3 + $0x60] sm:$0xff] }
 0x10a   :  { %v1765_v52 = vadd.f32 %v1764_v49, %v1752_v34  ;;  %2309 = vmatpush.bf16.msra.mxu3 %v3779_v44 }
 0x10b   :  { %2271 = vmatpush.bf16.msra.mxu0 %v3754_v40  ;;  %v1777_v54 = vpop.f32.mrf.mxu2  ;;  %v3778_v40 = vld [vmem:[%s5567_s3 + $0xf0] sm:$0xff] }
 0x10c   :  { %2284 = vmatpush.bf16.msra.mxu1 %v3762_v46  ;;  %v1790_v55 = vpop.f32.mrf.mxu3  ;;  %v1778_v58 = vadd.f32 %v1777_v54, %v1765_v52  ;;  %v1766_v62 = vpop.f32.mrf.mxu1  ;;  %v3772_v54 = vld [vmem:[%s5567_s3 + $0xc0] sm:$0xff] }
 0x10d   :  { %2297 = vmatpush.bf16.msra.mxu2 %v3770_v50  ;;  %v3773_v50 = vld [vmem:[%s5567_s3 + $0xc8] sm:$0xff] }
 0x10e   :  { %v1791_v63 = vadd.f32 %v1790_v55, %v1778_v58  ;;  %2310 = vmatpush.bf16.msra.mxu3 %v3778_v40 }
 0x10f   :  { %2272 = vmatpush.bf16.msra.mxu0 %v3753_v28  ;;  %v1753_v59 = vpop.f32.mrf.mxu0  ;;  %v3777_v28 = vld [vmem:[%s5567_s3 + $0xe8] sm:$0xff] }
 0x110   :  { %2285 = vmatpush.bf16.msra.mxu1 %v3761_v29  ;;  %v2003_v4 = vmax.f32 %v1791_v63, 0.0 }
 0x111   :  { %2298 = vmatpush.bf16.msra.mxu2 %v3769_v56  ;;  %v283_v56 = vperm.slane %v4987_v32, 3 }
 0x112   :  { %v2007_v31 = vpack.c.bf16 %v2003_v4, %v2003_v4  ;;  %2311 = vmatpush.bf16.msra.mxu3 %v3777_v28 }
 0x113   :  { %2273 = vmatpush.bf16.msra.mxu0 %v3752_v12  ;;  %v1779_v3 = vpop.f32.mrf.mxu2  ;;  %v3776_v12 = vld [vmem:[%s5567_s3 + $0xe0] sm:$0xff] }
 0x114   :  { %2286 = vmatpush.bf16.msra.mxu1 %v3760_v18  ;;  %v1792_v25 = vpop.f32.mrf.mxu3  ;;  %v3774_v18 = vld [vmem:[%s5567_s3 + $0xd0] sm:$0xff] }
 0x115   :  { %2299 = vmatpush.bf16.msra.mxu2 %v3768_v60 }
 0x116   :  { %2312 = vmatpush.bf16.msra.mxu3 %v3776_v12 }
 0x117   :  { %2274 = vmatpush.bf16.msra.mxu0 %v3751_v51 }
 0x118   :  { %2287 = vmatpush.bf16.msra.mxu1 %v3759_v53 }
 0x119   :  { %2300 = vmatpush.bf16.msra.mxu2 %v3767_v1 }
 0x11a   :  { %2313 = vmatpush.bf16.msra.mxu3 %v3775_v22 }
 0x11b   :  { %2275 = vmatpush.bf16.msra.mxu0 %v3750_v57 }
 0x11c   :  { %2288 = vmatpush.bf16.msra.mxu1 %v3758_v61 }
 0x11d   :  { %2301 = vmatpush.bf16.msra.mxu2 %v3766_v11 }
 0x11e   :  { %2314 = vmatpush.bf16.msra.mxu3 %v3774_v18 }
 0x11f   :  { %2276 = vmatpush.bf16.msra.mxu0 %v3749_v0 }
 0x120   :  { %2289 = vmatpush.bf16.msra.mxu1 %v3757_v2 }
 0x121   :  { %2302 = vmatpush.bf16.msra.mxu2 %v3765_v14 }
 0x122   :  { %2315 = vmatpush.bf16.msra.mxu3 %v3773_v50 }
 0x123   :  { %2277 = vmatpush.bf16.msra.mxu0 %v3748_v5  ;;  %v1803_v9 = vpop.f32.mrf.mxu0 }
 0x124   :  { %2290 = vmatpush.bf16.msra.mxu1 %v3756_v8  ;;  %v1816_v10 = vpop.f32.mrf.mxu1  ;;  %v1804_v24 = vadd.f32 %v1803_v9, %v282_v20 }
 0x125   :  { %2303 = vmatpush.bf16.msra.mxu2 %v3764_v19 }
 0x126   :  { %2278 = vmatmul.bf16.vlgmr.msra.gmra.mxu0 %v2006_v38  ;;  %v1817_v26 = vadd.f32 %v1816_v10, %v1804_v24  ;;  %2316 = vmatpush.bf16.msra.mxu3 %v3772_v54  ;;  %v3781_v10 = vld [vmem:[%s5568_s4] ss:$0 sm:$0xff] }
 0x127   :  { %2291 = vmatmul.bf16.vlgmr.msra.gmra.mxu1 %v2007_v31 }
 0x12b   :  { %v1829_v13 = vpop.f32.mrf.mxu2  ;;  %v1805_v15 = vpop.f32.mrf.mxu0 }
 0x12c   :  { %v1842_v7 = vpop.f32.mrf.mxu3  ;;  %v1818_v16 = vpop.f32.mrf.mxu1  ;;  %v1830_v30 = vadd.f32 %v1829_v13, %v1817_v26 }
 0x12e   :  { %v1843_v33 = vadd.f32 %v1842_v7, %v1830_v30 }
 0x133   :  { %v1831_v21 = vpop.f32.mrf.mxu2 }
 0x134   :  { %v1844_v23 = vpop.f32.mrf.mxu3 }
 0x143   :  { %v1855_v35 = vpop.f32.mrf.mxu0 }
 0x144   :  { %v1856_v36 = vadd.f32 %v1855_v35, %v1843_v33  ;;  %v1868_v37 = vpop.f32.mrf.mxu1 }
 0x146   :  { %v1869_v39 = vadd.f32 %v1868_v37, %v1856_v36 }
 0x14b   :  { %v1881_v41 = vpop.f32.mrf.mxu2  ;;  %v1857_v27 = vpop.f32.mrf.mxu0 }
 0x14c   :  { %v1882_v42 = vadd.f32 %v1881_v41, %v1869_v39  ;;  %v1894_v43 = vpop.f32.mrf.mxu3  ;;  %v1870_v47 = vpop.f32.mrf.mxu1 }
 0x14e   :  { %v1895_v45 = vadd.f32 %v1894_v43, %v1882_v42 }
 0x150   :  { %v2004_v46 = vmax.f32 %v1895_v45, 0.0 }
 0x152   :  { %v2008_v48 = vpack.c.bf16 %v2004_v46, %v2004_v46 }
 0x153   :  { %v1883_v17 = vpop.f32.mrf.mxu2 }
 0x154   :  { %2304 = vmatmul.bf16.vlgmr.msra.gmra.mxu2 %v2008_v48  ;;  %v1896_v29 = vpop.f32.mrf.mxu3 }
 0x163   :  { %v1907_v34 = vpop.f32.mrf.mxu0 }
 0x164   :  { %v1920_v49 = vpop.f32.mrf.mxu1  ;;  %v1908_v59 = vadd.f32 %v1907_v34, %v283_v56 }
 0x166   :  { %v1921_v60 = vadd.f32 %v1920_v49, %v1908_v59 }
 0x16b   :  { %v1933_v51 = vpop.f32.mrf.mxu2  ;;  %v1909_v53 = vpop.f32.mrf.mxu0 }
 0x16c   :  { %v1946_v52 = vpop.f32.mrf.mxu3  ;;  %v1922_v55 = vpop.f32.mrf.mxu1  ;;  %v1934_v61 = vadd.f32 %v1933_v51, %v1921_v60 }
 0x16e   :  { %v1947_v62 = vadd.f32 %v1946_v52, %v1934_v61 }
 0x173   :  { %v1935_v57 = vpop.f32.mrf.mxu2 }
 0x174   :  { %v1948_v58 = vpop.f32.mrf.mxu3 }
 0x183   :  { %v1959_v63 = vpop.f32.mrf.mxu0 }
 0x184   :  { %v1972_v0 = vpop.f32.mrf.mxu1  ;;  %v1960_v1 = vadd.f32 %v1959_v63, %v1947_v62 }
 0x186   :  { %v1973_v2 = vadd.f32 %v1972_v0, %v1960_v1 }
 0x18b   :  { %v1985_v3 = vpop.f32.mrf.mxu2  ;;  %v1961_v5 = vpop.f32.mrf.mxu0 }
 0x18c   :  { %v1986_v25 = vadd.f32 %v1985_v3, %v1973_v2  ;;  %v1998_v4 = vpop.f32.mrf.mxu3  ;;  %v1974_v6 = vpop.f32.mrf.mxu1 }
 0x18e   :  { %v1999_v8 = vadd.f32 %v1998_v4, %v1986_v25 }
 0x190   :  { %v2005_v31 = vmax.f32 %v1999_v8, 0.0 }
 0x192   :  { %v2009_v38 = vpack.c.bf16 %v2005_v31, %v2005_v31 }
 0x193   :  { %v1987_v9 = vpop.f32.mrf.mxu2 }
 0x194   :  { %v2000_v32 = vpop.f32.mrf.mxu3  ;;  %2317 = vmatmul.bf16.vlgmr.msra.gmra.mxu3 %v2009_v38 }
 0x1a3   :  { %v2279_v11 = vpop.f32.mrf.mxu0 }
 0x1a4   :  { %v2280_v13 = vadd.f32 %v3781_v10, %v2279_v11  ;;  %v2292_v7 = vpop.f32.mrf.mxu1 }
 0x1a6   :  { %v2293_v14 = vadd.f32 %v2292_v7, %v2280_v13 }
 0x1ab   :  { %v2281_v15 = vpop.f32.mrf.mxu0 }
 0x1ac   :  { %v2294_v16 = vpop.f32.mrf.mxu1 }
 0x1d7   :  { %v2305_v19 = vpop.f32.mrf.mxu2 }
 0x1d8   :  { %v2306_v21 = vadd.f32 %v2305_v19, %v2293_v14 }
 0x1df   :  { %v2307_v20 = vpop.f32.mrf.mxu2 }
 0x217   :  { %v2318_v23 = vpop.f32.mrf.mxu3 }
 0x218   :  { %v2319_v24 = vadd.f32 %v2318_v23, %v2306_v21 }
 0x21a   :  { %2323 = vst.msk [vmem:[#allocation2] sm:$0x3] %vm2322_vm0, %v2319_v24 }
 0x21b   :  { %2334 = dma.vmem_to_hbm [thread:$0]  %s2330_s11, 32, %s2332_s13, [#allocation3]  }
 0x21f   :  { %v2320_v26 = vpop.f32.mrf.mxu3 }
 0x220   :  { %3814 = dma.done.wait [#allocation3], 32  }
 0x221   :  { %3815 = vsyncadd [#allocation3], 4294967264 }
 0x222   :  { %2339 = vsyncpa [#allocation3], 1 }

</bundles_post_ra>
